<compile_context>
chip_gen: v6e
topology: v6e:2x2x1
jax: 0.10.0
libtpu: 0.0.40
codegen_flags: <defaults>
</compile_context>

<pallas_src>
import functools

import jax
import jax.numpy as jnp
from jax.experimental import pallas as pl
from jax.experimental.pallas import tpu as pltpu


_LPAD = 8  # left zero-pad of the expanded-activation scratch (keeps stores 8-aligned)


# ------------------------------ fused kernel --------------------------------


def _fused_block_kernel(x_ref, w1_ref, s1_ref, b1_ref,
                        k2_ref, s2_ref, b2_ref,
                        w3_ref, s3_ref, b3_ref,
                        *rest,
                        H, W, stride, shortcut_mode):
    """One batch element per grid step; everything stays in VMEM.

    shortcut_mode: "none" (stride != 1), "identity", or "project".
    rest = ([wsc_ref, ssc_ref, bsc_ref,] o_ref, e_scratch, y2d_scratch)
    """
    if shortcut_mode == "project":
        wsc_ref, ssc_ref, bsc_ref = rest[0], rest[1], rest[2]
        rest = rest[3:]
    o_ref, e_ref, y2d_ref = rest

    Ho, Wo = (H, W) if stride == 1 else (H // 2, W // 2)
    P = w1_ref.shape[1]

    # ---- stage 1: 1x1 expand + BN + ReLU (flattened-pixel matmul) ----------
    x2d = x_ref[0]                                              # (M2, Cin)
    e2d = jnp.dot(x2d, w1_ref[...], preferred_element_type=jnp.float32)
    e2d = jnp.maximum(e2d * s1_ref[...] + b1_ref[...], 0.0)     # (M2, P)

    # Zero the padded scratch (halo must be 0), then scatter rows into it.
    e_ref[...] = jnp.zeros_like(e_ref)
    if stride == 1:
        for h in range(H):
            e_ref[h + 1, _LPAD:_LPAD + W, :] = e2d[h * W:(h + 1) * W, :]
    else:
        # planes [EE, EO, OE, OO] (row parity, col parity), each (Ho, Wo).
        for p in range(4):
            for r in range(Ho):
                base = (p * Ho + r) * Wo
                e_ref[p, r + 1, _LPAD:_LPAD + Wo, :] = e2d[base:base + Wo, :]

    # ---- stage 2: depthwise 3x3 + BN + ReLU ---------------------------------
    k2 = k2_ref[...]                                            # (3, 3, P)
    acc = jnp.zeros((Ho, Wo, P), jnp.float32)
    if stride == 1:
        xp = e_ref[...]                                         # (H+2, W+2*LPAD, P)
        # 3 W-shifted views, reused across dh (cuts relayout copies 9 -> 3).
        xw = {dw: xp[:, _LPAD - 1 + dw:_LPAD - 1 + dw + W, :] for dw in range(3)}
        for dh in range(3):
            for dw in range(3):
                acc = acc + xw[dw][dh:dh + H, :, :] * k2[dh, dw, :]
    else:
        # With space-to-depth planes every tap is a unit-stride slice:
        # (dh, dw) -> (plane, row_offset, col_offset) in padded plane coords.
        tap = {(0, 0): (3, 0, -1), (0, 1): (2, 0, 0), (0, 2): (3, 0, 0),
               (1, 0): (1, 1, -1), (1, 1): (0, 1, 0), (1, 2): (1, 1, 0),
               (2, 0): (3, 1, -1), (2, 1): (2, 1, 0), (2, 2): (3, 1, 0)}
        pe = [e_ref[p] for p in range(4)]                       # padded planes
        views = {}
        for dh in range(3):
            for dw in range(3):
                p, ro, co = tap[(dh, dw)]
                if (p, co) not in views:
                    views[(p, co)] = pe[p][:, _LPAD + co:_LPAD + co + Wo, :]
                acc = acc + views[(p, co)][ro:ro + Ho, :, :] * k2[dh, dw, :]

    y = jnp.maximum(acc * s2_ref[...] + b2_ref[...], 0.0)       # (Ho, Wo, P)

    # Flatten back to 2-D inside VMEM (aligned row scatter, no HBM traffic).
    for h in range(Ho):
        y2d_ref[h * Wo:(h + 1) * Wo, :] = y[h]
    y2d = y2d_ref[...]                                          # (Ho*Wo, P)

    # ---- stage 3: 1x1 project + BN (+ fused residual) -----------------------
    out = jnp.dot(y2d, w3_ref[...], preferred_element_type=jnp.float32)
    out = out * s3_ref[...] + b3_ref[...]
    if shortcut_mode == "identity":
        out = out + x2d
    elif shortcut_mode == "project":
        sc = jnp.dot(x2d, wsc_ref[...], preferred_element_type=jnp.float32)
        out = out + sc * ssc_ref[...] + bsc_ref[...]
    o_ref[0] = out.astype(o_ref.dtype)


# ------------------------------ block forward -------------------------------


def block_forward(params, x_nchw, in_planes, out_planes, expansion, stride):
    planes = expansion * in_planes
    N, C, H, W = x_nchw.shape
    assert C == in_planes
    # TODO(synk): keep the surrounding network NHWC end-to-end to avoid these
    # per-block layout transposes.
    x = jnp.transpose(x_nchw, (0, 2, 3, 1))                     # NCHW -> NHWC

    if stride == 1:
        Ho, Wo = H, W
        x2d = x.reshape(N, H * W, in_planes)
        shortcut_mode = "identity" if in_planes == out_planes else "project"
        e_scratch = pltpu.VMEM((H + 2, W + 2 * _LPAD, planes), jnp.float32)
    else:
        assert stride == 2 and H % 2 == 0 and W % 2 == 0
        Ho, Wo = H // 2, W // 2
        # Host-side space-to-depth of the *small* (un-expanded) input so the
        # strided depthwise becomes unit-stride inside the kernel.
        planes4 = jnp.stack([x[:, 0::2, 0::2, :], x[:, 0::2, 1::2, :],
                             x[:, 1::2, 0::2, :], x[:, 1::2, 1::2, :]], axis=1)
        x2d = planes4.reshape(N, 4 * Ho * Wo, in_planes)
        shortcut_mode = "none"
        e_scratch = pltpu.VMEM((4, Ho + 1, Wo + _LPAD, planes), jnp.float32)

    M2 = x2d.shape[1]
    Mo = Ho * Wo

    args = [x2d,
            params["w1"], params["s1"].reshape(1, planes),
            params["b1"].reshape(1, planes),
            params["w2"], params["s2"].reshape(1, 1, planes),
            params["b2"].reshape(1, 1, planes),
            params["w3"], params["s3"].reshape(1, out_planes),
            params["b3"].reshape(1, out_planes)]
    in_specs = [
        pl.BlockSpec((1, M2, in_planes), lambda n: (n, 0, 0)),
        pl.BlockSpec((in_planes, planes), lambda n: (0, 0)),
        pl.BlockSpec((1, planes), lambda n: (0, 0)),
        pl.BlockSpec((1, planes), lambda n: (0, 0)),
        pl.BlockSpec((3, 3, planes), lambda n: (0, 0, 0)),
        pl.BlockSpec((1, 1, planes), lambda n: (0, 0, 0)),
        pl.BlockSpec((1, 1, planes), lambda n: (0, 0, 0)),
        pl.BlockSpec((planes, out_planes), lambda n: (0, 0)),
        pl.BlockSpec((1, out_planes), lambda n: (0, 0)),
        pl.BlockSpec((1, out_planes), lambda n: (0, 0)),
    ]
    if shortcut_mode == "project":
        args += [params["wsc"], params["ssc"].reshape(1, out_planes),
                 params["bsc"].reshape(1, out_planes)]
        in_specs += [pl.BlockSpec((in_planes, out_planes), lambda n: (0, 0)),
                     pl.BlockSpec((1, out_planes), lambda n: (0, 0)),
                     pl.BlockSpec((1, out_planes), lambda n: (0, 0))]

    kernel = functools.partial(_fused_block_kernel, H=H, W=W, stride=stride,
                               shortcut_mode=shortcut_mode)
    out2d = pl.pallas_call(
        kernel,
        out_shape=jax.ShapeDtypeStruct((N, Mo, out_planes), jnp.float32),
        grid_spec=pltpu.PrefetchScalarGridSpec(
            num_scalar_prefetch=0,
            grid=(N,),
            in_specs=in_specs,
            out_specs=pl.BlockSpec((1, Mo, out_planes), lambda n: (n, 0, 0)),
            scratch_shapes=[e_scratch, pltpu.VMEM((Mo, planes), jnp.float32)],
        ),
        compiler_params=pltpu.CompilerParams(
            dimension_semantics=("parallel",),
            vmem_limit_bytes=32 * 1024 * 1024),
    )(*args)

    out = out2d.reshape(N, Ho, Wo, out_planes)
    return jnp.transpose(out, (0, 3, 1, 2))                     # NHWC -> NCHW


# --------------------------- params & reference -----------------------------


def init_block_params(key, in_planes, out_planes, expansion, stride):
    planes = expansion * in_planes
    ks = jax.random.split(key, 8)

    def conv(k, shape, fan_in):
        return (jax.random.normal(k, shape, jnp.float32) /
                jnp.sqrt(jnp.float32(fan_in)))

    def bn(k, c):  # fold eval-mode BN into (scale, bias)
        k1, k2, k3, k4 = jax.random.split(k, 4)
        gamma = 1.0 + 0.1 * jax.random.normal(k1, (c,), jnp.float32)
        beta = 0.1 * jax.random.normal(k2, (c,), jnp.float32)
        mean = 0.1 * jax.random.normal(k3, (c,), jnp.float32)
        var = jax.random.uniform(k4, (c,), jnp.float32, 0.5, 1.5)
        s = gamma / jnp.sqrt(var + 1e-5)
        return s, beta - mean * s

    p = {}
    p["w1"] = conv(ks[0], (in_planes, planes), in_planes)       # 1x1 -> (Cin, Cout)
    p["s1"], p["b1"] = bn(ks[1], planes)
    p["w2"] = conv(ks[2], (3, 3, planes), 9)                    # depthwise (3,3,C)
    p["s2"], p["b2"] = bn(ks[3], planes)
    p["w3"] = conv(ks[4], (planes, out_planes), planes)
    p["s3"], p["b3"] = bn(ks[5], out_planes)
    if stride == 1 and in_planes != out_planes:
        p["wsc"] = conv(ks[6], (in_planes, out_planes), in_planes)
        p["ssc"], p["bsc"] = bn(ks[7], out_planes)
    return p


def block_reference(params, x_nchw, in_planes, out_planes, expansion, stride):
    """Pure-JAX reference (lax.conv) for correctness checking."""
    planes = expansion * in_planes
    x = jnp.transpose(x_nchw, (0, 2, 3, 1))
    dn = ("NHWC", "HWIO", "NHWC")

    def conv1x1(a, w):
        return jax.lax.conv_general_dilated(
            a, w.reshape(1, 1, *w.shape), (1, 1), "VALID", dimension_numbers=dn)

    out = jnp.maximum(conv1x1(x, params["w1"]) * params["s1"] + params["b1"], 0.0)
    wdw = params["w2"].reshape(3, 3, 1, planes)
    out = jax.lax.conv_general_dilated(
        out, wdw, (stride, stride), ((1, 1), (1, 1)),
        dimension_numbers=dn, feature_group_count=planes)
    out = jnp.maximum(out * params["s2"] + params["b2"], 0.0)
    out = conv1x1(out, params["w3"]) * params["s3"] + params["b3"]
    if stride == 1:
        if in_planes != out_planes:
            sc = conv1x1(x, params["wsc"]) * params["ssc"] + params["bsc"]
        else:
            sc = x
        out = out + sc
    return jnp.transpose(out, (0, 3, 1, 2))


# ---------------------------------- main -------------------------------------


if __name__ == "__main__":
    key = jax.random.PRNGKey(0)
    kx, kp = jax.random.split(key)
    x = jax.random.normal(kx, (2, 4, 16, 16), jnp.float32)  # NCHW, like PyTorch

    # (in_planes, out_planes, expansion, stride):
    #   projection-shortcut path, identity-shortcut path, strided path
    configs = [(4, 8, 6, 1), (4, 4, 6, 1), (4, 8, 6, 2)]
    for idx, (cin, cout, exp_, st) in enumerate(configs):
        params = init_block_params(jax.random.fold_in(kp, idx), cin, cout, exp_, st)
        out = block_forward(params, x, cin, cout, exp_, st)
        out = jax.block_until_ready(out)
        ref = block_reference(params, x, cin, cout, exp_, st)
        assert out.shape == ref.shape, (out.shape, ref.shape)
        assert jnp.allclose(out, ref, atol=1e-4, rtol=1e-4), f"mismatch cfg {idx}"
    print("KERNEL_OK")
</pallas_src>

<mosaic_0001>
module attributes {stable_mosaic.version = 11 : i64} {
  func.func @_fused_block_kernel(%arg0: i32, %arg1: memref<1x256x4xf32, #tpu.memory_space<vmem>>, %arg2: memref<4x24xf32, #tpu.memory_space<vmem>>, %arg3: memref<1x24xf32, #tpu.memory_space<vmem>>, %arg4: memref<1x24xf32, #tpu.memory_space<vmem>>, %arg5: memref<3x3x24xf32, #tpu.memory_space<vmem>>, %arg6: memref<1x1x24xf32, #tpu.memory_space<vmem>>, %arg7: memref<1x1x24xf32, #tpu.memory_space<vmem>>, %arg8: memref<24x8xf32, #tpu.memory_space<vmem>>, %arg9: memref<1x8xf32, #tpu.memory_space<vmem>>, %arg10: memref<1x8xf32, #tpu.memory_space<vmem>>, %arg11: memref<4x8xf32, #tpu.memory_space<vmem>>, %arg12: memref<1x8xf32, #tpu.memory_space<vmem>>, %arg13: memref<1x8xf32, #tpu.memory_space<vmem>>, %arg14: memref<1x256x8xf32, #tpu.memory_space<vmem>>, %arg15: memref<18x32x24xf32, #tpu.memory_space<vmem>>, %arg16: memref<256x24xf32, #tpu.memory_space<vmem>>) attributes {dimension_semantics = [#tpu.dimension_semantics<parallel>], iteration_bounds = array<i64: 2>, scalar_prefetch = 0 : i64, scratch_operands = 2 : i64, tpu.core_type = #tpu.core_type<tc>, window_params = [{transform_indices = @transform_0, window_bounds = array<i64: 1, 256, 4>}, {pipeline_mode = #tpu.pipeline_mode<synchronous>, transform_indices = @transform_1, window_bounds = array<i64: 4, 24>}, {pipeline_mode = #tpu.pipeline_mode<synchronous>, transform_indices = @transform_2, window_bounds = array<i64: 1, 24>}, {pipeline_mode = #tpu.pipeline_mode<synchronous>, transform_indices = @transform_3, window_bounds = array<i64: 1, 24>}, {pipeline_mode = #tpu.pipeline_mode<synchronous>, transform_indices = @transform_4, window_bounds = array<i64: 3, 3, 24>}, {pipeline_mode = #tpu.pipeline_mode<synchronous>, transform_indices = @transform_5, window_bounds = array<i64: 1, 1, 24>}, {pipeline_mode = #tpu.pipeline_mode<synchronous>, transform_indices = @transform_6, window_bounds = array<i64: 1, 1, 24>}, {pipeline_mode = #tpu.pipeline_mode<synchronous>, transform_indices = @transform_7, window_bounds = array<i64: 24, 8>}, {pipeline_mode = #tpu.pipeline_mode<synchronous>, transform_indices = @transform_8, window_bounds = array<i64: 1, 8>}, {pipeline_mode = #tpu.pipeline_mode<synchronous>, transform_indices = @transform_9, window_bounds = array<i64: 1, 8>}, {pipeline_mode = #tpu.pipeline_mode<synchronous>, transform_indices = @transform_10, window_bounds = array<i64: 4, 8>}, {pipeline_mode = #tpu.pipeline_mode<synchronous>, transform_indices = @transform_11, window_bounds = array<i64: 1, 8>}, {pipeline_mode = #tpu.pipeline_mode<synchronous>, transform_indices = @transform_12, window_bounds = array<i64: 1, 8>}, {transform_indices = @transform_13, window_bounds = array<i64: 1, 256, 8>}]} {
    %c0 = arith.constant 0 : index
    %c0_0 = arith.constant 0 : index
    %c0_1 = arith.constant 0 : index
    %0 = vector.load %arg1[%c0, %c0_0, %c0_1] : memref<1x256x4xf32, #tpu.memory_space<vmem>>, vector<1x256x4xf32>
    %1 = vector.shape_cast %0 : vector<1x256x4xf32> to vector<256x4xf32>
    %c0_2 = arith.constant 0 : index
    %c0_3 = arith.constant 0 : index
    %2 = vector.load %arg2[%c0_2, %c0_3] : memref<4x24xf32, #tpu.memory_space<vmem>>, vector<4x24xf32>
    %cst = arith.constant dense<0.000000e+00> : vector<256x24xf32>
    %3 = tpu.matmul %1, %2, %cst {dimension_numbers = #tpu.dot_dimension_numbers<[1], [0], [0], [1], [0, 0, 1, 1], [], []>} : vector<256x4xf32>, vector<4x24xf32>, vector<256x24xf32> -> vector<256x24xf32>
    %c0_4 = arith.constant 0 : index
    %c0_5 = arith.constant 0 : index
    %4 = vector.load %arg3[%c0_4, %c0_5] : memref<1x24xf32, #tpu.memory_space<vmem>>, vector<1x24xf32>
    %5 = vector.broadcast %4 : vector<1x24xf32> to vector<256x24xf32>
    %6 = arith.mulf %3, %5 : vector<256x24xf32>
    %c0_6 = arith.constant 0 : index
    %c0_7 = arith.constant 0 : index
    %7 = vector.load %arg4[%c0_6, %c0_7] : memref<1x24xf32, #tpu.memory_space<vmem>>, vector<1x24xf32>
    %8 = vector.broadcast %7 : vector<1x24xf32> to vector<256x24xf32>
    %9 = arith.addf %6, %8 : vector<256x24xf32>
    %cst_8 = arith.constant 0.000000e+00 : f32
    %10 = vector.broadcast %cst_8 : f32 to vector<256x24xf32>
    %11 = arith.maximumf %9, %10 : vector<256x24xf32>
    %cst_9 = arith.constant 0.000000e+00 : f32
    %12 = vector.broadcast %cst_9 : f32 to vector<18x32x24xf32>
    %c0_10 = arith.constant 0 : index
    %c0_11 = arith.constant 0 : index
    %c0_12 = arith.constant 0 : index
    %13 = vector.load %arg15[%c0_10, %c0_11, %c0_12] : memref<18x32x24xf32, #tpu.memory_space<vmem>>, vector<18x32x24xf32>
    tpu.vector_store %arg15[%c0_10, %c0_11, %c0_12], %12 {strides = array<i32>} : memref<18x32x24xf32, #tpu.memory_space<vmem>>, vector<18x32x24xf32>,
    %14 = vector.extract_strided_slice %11 {offsets = [0, 0], sizes = [16, 24], strides = [1, 1]} : vector<256x24xf32> to vector<16x24xf32>
    %c1 = arith.constant 1 : index
    %c8 = arith.constant 8 : index
    %c0_13 = arith.constant 0 : index
    %15 = vector.load %arg15[%c1, %c8, %c0_13] : memref<18x32x24xf32, #tpu.memory_space<vmem>>, vector<1x16x24xf32>
    %16 = vector.shape_cast %15 : vector<1x16x24xf32> to vector<16x24xf32>
    %17 = vector.shape_cast %14 : vector<16x24xf32> to vector<1x16x24xf32>
    tpu.vector_store %arg15[%c1, %c8, %c0_13], %17 {strides = array<i32>} : memref<18x32x24xf32, #tpu.memory_space<vmem>>, vector<1x16x24xf32>,
    %18 = vector.extract_strided_slice %11 {offsets = [16, 0], sizes = [16, 24], strides = [1, 1]} : vector<256x24xf32> to vector<16x24xf32>
    %c2 = arith.constant 2 : index
    %c8_14 = arith.constant 8 : index
    %c0_15 = arith.constant 0 : index
    %19 = vector.load %arg15[%c2, %c8_14, %c0_15] : memref<18x32x24xf32, #tpu.memory_space<vmem>>, vector<1x16x24xf32>
    %20 = vector.shape_cast %19 : vector<1x16x24xf32> to vector<16x24xf32>
    %21 = vector.shape_cast %18 : vector<16x24xf32> to vector<1x16x24xf32>
    tpu.vector_store %arg15[%c2, %c8_14, %c0_15], %21 {strides = array<i32>} : memref<18x32x24xf32, #tpu.memory_space<vmem>>, vector<1x16x24xf32>,
    %22 = vector.extract_strided_slice %11 {offsets = [32, 0], sizes = [16, 24], strides = [1, 1]} : vector<256x24xf32> to vector<16x24xf32>
    %c3 = arith.constant 3 : index
    %c8_16 = arith.constant 8 : index
    %c0_17 = arith.constant 0 : index
    %23 = vector.load %arg15[%c3, %c8_16, %c0_17] : memref<18x32x24xf32, #tpu.memory_space<vmem>>, vector<1x16x24xf32>
    %24 = vector.shape_cast %23 : vector<1x16x24xf32> to vector<16x24xf32>
    %25 = vector.shape_cast %22 : vector<16x24xf32> to vector<1x16x24xf32>
    tpu.vector_store %arg15[%c3, %c8_16, %c0_17], %25 {strides = array<i32>} : memref<18x32x24xf32, #tpu.memory_space<vmem>>, vector<1x16x24xf32>,
    %26 = vector.extract_strided_slice %11 {offsets = [48, 0], sizes = [16, 24], strides = [1, 1]} : vector<256x24xf32> to vector<16x24xf32>
    %c4 = arith.constant 4 : index
    %c8_18 = arith.constant 8 : index
    %c0_19 = arith.constant 0 : index
    %27 = vector.load %arg15[%c4, %c8_18, %c0_19] : memref<18x32x24xf32, #tpu.memory_space<vmem>>, vector<1x16x24xf32>
    %28 = vector.shape_cast %27 : vector<1x16x24xf32> to vector<16x24xf32>
    %29 = vector.shape_cast %26 : vector<16x24xf32> to vector<1x16x24xf32>
    tpu.vector_store %arg15[%c4, %c8_18, %c0_19], %29 {strides = array<i32>} : memref<18x32x24xf32, #tpu.memory_space<vmem>>, vector<1x16x24xf32>,
    %30 = vector.extract_strided_slice %11 {offsets = [64, 0], sizes = [16, 24], strides = [1, 1]} : vector<256x24xf32> to vector<16x24xf32>
    %c5 = arith.constant 5 : index
    %c8_20 = arith.constant 8 : index
    %c0_21 = arith.constant 0 : index
    %31 = vector.load %arg15[%c5, %c8_20, %c0_21] : memref<18x32x24xf32, #tpu.memory_space<vmem>>, vector<1x16x24xf32>
    %32 = vector.shape_cast %31 : vector<1x16x24xf32> to vector<16x24xf32>
    %33 = vector.shape_cast %30 : vector<16x24xf32> to vector<1x16x24xf32>
    tpu.vector_store %arg15[%c5, %c8_20, %c0_21], %33 {strides = array<i32>} : memref<18x32x24xf32, #tpu.memory_space<vmem>>, vector<1x16x24xf32>,
    %34 = vector.extract_strided_slice %11 {offsets = [80, 0], sizes = [16, 24], strides = [1, 1]} : vector<256x24xf32> to vector<16x24xf32>
    %c6 = arith.constant 6 : index
    %c8_22 = arith.constant 8 : index
    %c0_23 = arith.constant 0 : index
    %35 = vector.load %arg15[%c6, %c8_22, %c0_23] : memref<18x32x24xf32, #tpu.memory_space<vmem>>, vector<1x16x24xf32>
    %36 = vector.shape_cast %35 : vector<1x16x24xf32> to vector<16x24xf32>
    %37 = vector.shape_cast %34 : vector<16x24xf32> to vector<1x16x24xf32>
    tpu.vector_store %arg15[%c6, %c8_22, %c0_23], %37 {strides = array<i32>} : memref<18x32x24xf32, #tpu.memory_space<vmem>>, vector<1x16x24xf32>,
    %38 = vector.extract_strided_slice %11 {offsets = [96, 0], sizes = [16, 24], strides = [1, 1]} : vector<256x24xf32> to vector<16x24xf32>
    %c7 = arith.constant 7 : index
    %c8_24 = arith.constant 8 : index
    %c0_25 = arith.constant 0 : index
    %39 = vector.load %arg15[%c7, %c8_24, %c0_25] : memref<18x32x24xf32, #tpu.memory_space<vmem>>, vector<1x16x24xf32>
    %40 = vector.shape_cast %39 : vector<1x16x24xf32> to vector<16x24xf32>
    %41 = vector.shape_cast %38 : vector<16x24xf32> to vector<1x16x24xf32>
    tpu.vector_store %arg15[%c7, %c8_24, %c0_25], %41 {strides = array<i32>} : memref<18x32x24xf32, #tpu.memory_space<vmem>>, vector<1x16x24xf32>,
    %42 = vector.extract_strided_slice %11 {offsets = [112, 0], sizes = [16, 24], strides = [1, 1]} : vector<256x24xf32> to vector<16x24xf32>
    %c8_26 = arith.constant 8 : index
    %c8_27 = arith.constant 8 : index
    %c0_28 = arith.constant 0 : index
    %43 = vector.load %arg15[%c8_26, %c8_27, %c0_28] : memref<18x32x24xf32, #tpu.memory_space<vmem>>, vector<1x16x24xf32>
    %44 = vector.shape_cast %43 : vector<1x16x24xf32> to vector<16x24xf32>
    %45 = vector.shape_cast %42 : vector<16x24xf32> to vector<1x16x24xf32>
    tpu.vector_store %arg15[%c8_26, %c8_27, %c0_28], %45 {strides = array<i32>} : memref<18x32x24xf32, #tpu.memory_space<vmem>>, vector<1x16x24xf32>,
    %46 = vector.extract_strided_slice %11 {offsets = [128, 0], sizes = [16, 24], strides = [1, 1]} : vector<256x24xf32> to vector<16x24xf32>
    %c9 = arith.constant 9 : index
    %c8_29 = arith.constant 8 : index
    %c0_30 = arith.constant 0 : index
    %47 = vector.load %arg15[%c9, %c8_29, %c0_30] : memref<18x32x24xf32, #tpu.memory_space<vmem>>, vector<1x16x24xf32>
    %48 = vector.shape_cast %47 : vector<1x16x24xf32> to vector<16x24xf32>
    %49 = vector.shape_cast %46 : vector<16x24xf32> to vector<1x16x24xf32>
    tpu.vector_store %arg15[%c9, %c8_29, %c0_30], %49 {strides = array<i32>} : memref<18x32x24xf32, #tpu.memory_space<vmem>>, vector<1x16x24xf32>,
    %50 = vector.extract_strided_slice %11 {offsets = [144, 0], sizes = [16, 24], strides = [1, 1]} : vector<256x24xf32> to vector<16x24xf32>
    %c10 = arith.constant 10 : index
    %c8_31 = arith.constant 8 : index
    %c0_32 = arith.constant 0 : index
    %51 = vector.load %arg15[%c10, %c8_31, %c0_32] : memref<18x32x24xf32, #tpu.memory_space<vmem>>, vector<1x16x24xf32>
    %52 = vector.shape_cast %51 : vector<1x16x24xf32> to vector<16x24xf32>
    %53 = vector.shape_cast %50 : vector<16x24xf32> to vector<1x16x24xf32>
    tpu.vector_store %arg15[%c10, %c8_31, %c0_32], %53 {strides = array<i32>} : memref<18x32x24xf32, #tpu.memory_space<vmem>>, vector<1x16x24xf32>,
    %54 = vector.extract_strided_slice %11 {offsets = [160, 0], sizes = [16, 24], strides = [1, 1]} : vector<256x24xf32> to vector<16x24xf32>
    %c11 = arith.constant 11 : index
    %c8_33 = arith.constant 8 : index
    %c0_34 = arith.constant 0 : index
    %55 = vector.load %arg15[%c11, %c8_33, %c0_34] : memref<18x32x24xf32, #tpu.memory_space<vmem>>, vector<1x16x24xf32>
    %56 = vector.shape_cast %55 : vector<1x16x24xf32> to vector<16x24xf32>
    %57 = vector.shape_cast %54 : vector<16x24xf32> to vector<1x16x24xf32>
    tpu.vector_store %arg15[%c11, %c8_33, %c0_34], %57 {strides = array<i32>} : memref<18x32x24xf32, #tpu.memory_space<vmem>>, vector<1x16x24xf32>,
    %58 = vector.extract_strided_slice %11 {offsets = [176, 0], sizes = [16, 24], strides = [1, 1]} : vector<256x24xf32> to vector<16x24xf32>
    %c12 = arith.constant 12 : index
    %c8_35 = arith.constant 8 : index
    %c0_36 = arith.constant 0 : index
    %59 = vector.load %arg15[%c12, %c8_35, %c0_36] : memref<18x32x24xf32, #tpu.memory_space<vmem>>, vector<1x16x24xf32>
    %60 = vector.shape_cast %59 : vector<1x16x24xf32> to vector<16x24xf32>
    %61 = vector.shape_cast %58 : vector<16x24xf32> to vector<1x16x24xf32>
    tpu.vector_store %arg15[%c12, %c8_35, %c0_36], %61 {strides = array<i32>} : memref<18x32x24xf32, #tpu.memory_space<vmem>>, vector<1x16x24xf32>,
    %62 = vector.extract_strided_slice %11 {offsets = [192, 0], sizes = [16, 24], strides = [1, 1]} : vector<256x24xf32> to vector<16x24xf32>
    %c13 = arith.constant 13 : index
    %c8_37 = arith.constant 8 : index
    %c0_38 = arith.constant 0 : index
    %63 = vector.load %arg15[%c13, %c8_37, %c0_38] : memref<18x32x24xf32, #tpu.memory_space<vmem>>, vector<1x16x24xf32>
    %64 = vector.shape_cast %63 : vector<1x16x24xf32> to vector<16x24xf32>
    %65 = vector.shape_cast %62 : vector<16x24xf32> to vector<1x16x24xf32>
    tpu.vector_store %arg15[%c13, %c8_37, %c0_38], %65 {strides = array<i32>} : memref<18x32x24xf32, #tpu.memory_space<vmem>>, vector<1x16x24xf32>,
    %66 = vector.extract_strided_slice %11 {offsets = [208, 0], sizes = [16, 24], strides = [1, 1]} : vector<256x24xf32> to vector<16x24xf32>
    %c14 = arith.constant 14 : index
    %c8_39 = arith.constant 8 : index
    %c0_40 = arith.constant 0 : index
    %67 = vector.load %arg15[%c14, %c8_39, %c0_40] : memref<18x32x24xf32, #tpu.memory_space<vmem>>, vector<1x16x24xf32>
    %68 = vector.shape_cast %67 : vector<1x16x24xf32> to vector<16x24xf32>
    %69 = vector.shape_cast %66 : vector<16x24xf32> to vector<1x16x24xf32>
    tpu.vector_store %arg15[%c14, %c8_39, %c0_40], %69 {strides = array<i32>} : memref<18x32x24xf32, #tpu.memory_space<vmem>>, vector<1x16x24xf32>,
    %70 = vector.extract_strided_slice %11 {offsets = [224, 0], sizes = [16, 24], strides = [1, 1]} : vector<256x24xf32> to vector<16x24xf32>
    %c15 = arith.constant 15 : index
    %c8_41 = arith.constant 8 : index
    %c0_42 = arith.constant 0 : index
    %71 = vector.load %arg15[%c15, %c8_41, %c0_42] : memref<18x32x24xf32, #tpu.memory_space<vmem>>, vector<1x16x24xf32>
    %72 = vector.shape_cast %71 : vector<1x16x24xf32> to vector<16x24xf32>
    %73 = vector.shape_cast %70 : vector<16x24xf32> to vector<1x16x24xf32>
    tpu.vector_store %arg15[%c15, %c8_41, %c0_42], %73 {strides = array<i32>} : memref<18x32x24xf32, #tpu.memory_space<vmem>>, vector<1x16x24xf32>,
    %74 = vector.extract_strided_slice %11 {offsets = [240, 0], sizes = [16, 24], strides = [1, 1]} : vector<256x24xf32> to vector<16x24xf32>
    %c16 = arith.constant 16 : index
    %c8_43 = arith.constant 8 : index
    %c0_44 = arith.constant 0 : index
    %75 = vector.load %arg15[%c16, %c8_43, %c0_44] : memref<18x32x24xf32, #tpu.memory_space<vmem>>, vector<1x16x24xf32>
    %76 = vector.shape_cast %75 : vector<1x16x24xf32> to vector<16x24xf32>
    %77 = vector.shape_cast %74 : vector<16x24xf32> to vector<1x16x24xf32>
    tpu.vector_store %arg15[%c16, %c8_43, %c0_44], %77 {strides = array<i32>} : memref<18x32x24xf32, #tpu.memory_space<vmem>>, vector<1x16x24xf32>,
    %c0_45 = arith.constant 0 : index
    %c0_46 = arith.constant 0 : index
    %c0_47 = arith.constant 0 : index
    %78 = vector.load %arg5[%c0_45, %c0_46, %c0_47] : memref<3x3x24xf32, #tpu.memory_space<vmem>>, vector<3x3x24xf32>
    %cst_48 = arith.constant 0.000000e+00 : f32
    %79 = vector.broadcast %cst_48 : f32 to vector<16x16x24xf32>
    %c0_49 = arith.constant 0 : index
    %c0_50 = arith.constant 0 : index
    %c0_51 = arith.constant 0 : index
    %80 = vector.load %arg15[%c0_49, %c0_50, %c0_51] : memref<18x32x24xf32, #tpu.memory_space<vmem>>, vector<18x32x24xf32>
    %81 = vector.extract_strided_slice %80 {offsets = [0, 7, 0], sizes = [18, 16, 24], strides = [1, 1, 1]} : vector<18x32x24xf32> to vector<18x16x24xf32>
    %82 = vector.extract_strided_slice %80 {offsets = [0, 8, 0], sizes = [18, 16, 24], strides = [1, 1, 1]} : vector<18x32x24xf32> to vector<18x16x24xf32>
    %83 = vector.extract_strided_slice %80 {offsets = [0, 9, 0], sizes = [18, 16, 24], strides = [1, 1, 1]} : vector<18x32x24xf32> to vector<18x16x24xf32>
    %84 = vector.extract_strided_slice %81 {offsets = [0, 0, 0], sizes = [16, 16, 24], strides = [1, 1, 1]} : vector<18x16x24xf32> to vector<16x16x24xf32>
    %85 = vector.extract_strided_slice %78 {offsets = [0, 0, 0], sizes = [1, 1, 24], strides = [1, 1, 1]} : vector<3x3x24xf32> to vector<1x1x24xf32>
    %86 = vector.shape_cast %85 : vector<1x1x24xf32> to vector<24xf32>
    %87 = vector.shape_cast %86 : vector<24xf32> to vector<1x1x24xf32>
    %88 = vector.broadcast %87 : vector<1x1x24xf32> to vector<16x16x24xf32>
    %89 = arith.mulf %84, %88 : vector<16x16x24xf32>
    %90 = arith.addf %79, %89 : vector<16x16x24xf32>
    %91 = vector.extract_strided_slice %82 {offsets = [0, 0, 0], sizes = [16, 16, 24], strides = [1, 1, 1]} : vector<18x16x24xf32> to vector<16x16x24xf32>
    %92 = vector.extract_strided_slice %78 {offsets = [0, 1, 0], sizes = [1, 1, 24], strides = [1, 1, 1]} : vector<3x3x24xf32> to vector<1x1x24xf32>
    %93 = vector.shape_cast %92 : vector<1x1x24xf32> to vector<24xf32>
    %94 = vector.shape_cast %93 : vector<24xf32> to vector<1x1x24xf32>
    %95 = vector.broadcast %94 : vector<1x1x24xf32> to vector<16x16x24xf32>
    %96 = arith.mulf %91, %95 : vector<16x16x24xf32>
    %97 = arith.addf %90, %96 : vector<16x16x24xf32>
    %98 = vector.extract_strided_slice %83 {offsets = [0, 0, 0], sizes = [16, 16, 24], strides = [1, 1, 1]} : vector<18x16x24xf32> to vector<16x16x24xf32>
    %99 = vector.extract_strided_slice %78 {offsets = [0, 2, 0], sizes = [1, 1, 24], strides = [1, 1, 1]} : vector<3x3x24xf32> to vector<1x1x24xf32>
    %100 = vector.shape_cast %99 : vector<1x1x24xf32> to vector<24xf32>
    %101 = vector.shape_cast %100 : vector<24xf32> to vector<1x1x24xf32>
    %102 = vector.broadcast %101 : vector<1x1x24xf32> to vector<16x16x24xf32>
    %103 = arith.mulf %98, %102 : vector<16x16x24xf32>
    %104 = arith.addf %97, %103 : vector<16x16x24xf32>
    %105 = vector.extract_strided_slice %81 {offsets = [1, 0, 0], sizes = [16, 16, 24], strides = [1, 1, 1]} : vector<18x16x24xf32> to vector<16x16x24xf32>
    %106 = vector.extract_strided_slice %78 {offsets = [1, 0, 0], sizes = [1, 1, 24], strides = [1, 1, 1]} : vector<3x3x24xf32> to vector<1x1x24xf32>
    %107 = vector.shape_cast %106 : vector<1x1x24xf32> to vector<24xf32>
    %108 = vector.shape_cast %107 : vector<24xf32> to vector<1x1x24xf32>
    %109 = vector.broadcast %108 : vector<1x1x24xf32> to vector<16x16x24xf32>
    %110 = arith.mulf %105, %109 : vector<16x16x24xf32>
    %111 = arith.addf %104, %110 : vector<16x16x24xf32>
    %112 = vector.extract_strided_slice %82 {offsets = [1, 0, 0], sizes = [16, 16, 24], strides = [1, 1, 1]} : vector<18x16x24xf32> to vector<16x16x24xf32>
    %113 = vector.extract_strided_slice %78 {offsets = [1, 1, 0], sizes = [1, 1, 24], strides = [1, 1, 1]} : vector<3x3x24xf32> to vector<1x1x24xf32>
    %114 = vector.shape_cast %113 : vector<1x1x24xf32> to vector<24xf32>
    %115 = vector.shape_cast %114 : vector<24xf32> to vector<1x1x24xf32>
    %116 = vector.broadcast %115 : vector<1x1x24xf32> to vector<16x16x24xf32>
    %117 = arith.mulf %112, %116 : vector<16x16x24xf32>
    %118 = arith.addf %111, %117 : vector<16x16x24xf32>
    %119 = vector.extract_strided_slice %83 {offsets = [1, 0, 0], sizes = [16, 16, 24], strides = [1, 1, 1]} : vector<18x16x24xf32> to vector<16x16x24xf32>
    %120 = vector.extract_strided_slice %78 {offsets = [1, 2, 0], sizes = [1, 1, 24], strides = [1, 1, 1]} : vector<3x3x24xf32> to vector<1x1x24xf32>
    %121 = vector.shape_cast %120 : vector<1x1x24xf32> to vector<24xf32>
    %122 = vector.shape_cast %121 : vector<24xf32> to vector<1x1x24xf32>
    %123 = vector.broadcast %122 : vector<1x1x24xf32> to vector<16x16x24xf32>
    %124 = arith.mulf %119, %123 : vector<16x16x24xf32>
    %125 = arith.addf %118, %124 : vector<16x16x24xf32>
    %126 = vector.extract_strided_slice %81 {offsets = [2, 0, 0], sizes = [16, 16, 24], strides = [1, 1, 1]} : vector<18x16x24xf32> to vector<16x16x24xf32>
    %127 = vector.extract_strided_slice %78 {offsets = [2, 0, 0], sizes = [1, 1, 24], strides = [1, 1, 1]} : vector<3x3x24xf32> to vector<1x1x24xf32>
    %128 = vector.shape_cast %127 : vector<1x1x24xf32> to vector<24xf32>
    %129 = vector.shape_cast %128 : vector<24xf32> to vector<1x1x24xf32>
    %130 = vector.broadcast %129 : vector<1x1x24xf32> to vector<16x16x24xf32>
    %131 = arith.mulf %126, %130 : vector<16x16x24xf32>
    %132 = arith.addf %125, %131 : vector<16x16x24xf32>
    %133 = vector.extract_strided_slice %82 {offsets = [2, 0, 0], sizes = [16, 16, 24], strides = [1, 1, 1]} : vector<18x16x24xf32> to vector<16x16x24xf32>
    %134 = vector.extract_strided_slice %78 {offsets = [2, 1, 0], sizes = [1, 1, 24], strides = [1, 1, 1]} : vector<3x3x24xf32> to vector<1x1x24xf32>
    %135 = vector.shape_cast %134 : vector<1x1x24xf32> to vector<24xf32>
    %136 = vector.shape_cast %135 : vector<24xf32> to vector<1x1x24xf32>
    %137 = vector.broadcast %136 : vector<1x1x24xf32> to vector<16x16x24xf32>
    %138 = arith.mulf %133, %137 : vector<16x16x24xf32>
    %139 = arith.addf %132, %138 : vector<16x16x24xf32>
    %140 = vector.extract_strided_slice %83 {offsets = [2, 0, 0], sizes = [16, 16, 24], strides = [1, 1, 1]} : vector<18x16x24xf32> to vector<16x16x24xf32>
    %141 = vector.extract_strided_slice %78 {offsets = [2, 2, 0], sizes = [1, 1, 24], strides = [1, 1, 1]} : vector<3x3x24xf32> to vector<1x1x24xf32>
    %142 = vector.shape_cast %141 : vector<1x1x24xf32> to vector<24xf32>
    %143 = vector.shape_cast %142 : vector<24xf32> to vector<1x1x24xf32>
    %144 = vector.broadcast %143 : vector<1x1x24xf32> to vector<16x16x24xf32>
    %145 = arith.mulf %140, %144 : vector<16x16x24xf32>
    %146 = arith.addf %139, %145 : vector<16x16x24xf32>
    %c0_52 = arith.constant 0 : index
    %c0_53 = arith.constant 0 : index
    %c0_54 = arith.constant 0 : index
    %147 = vector.load %arg6[%c0_52, %c0_53, %c0_54] : memref<1x1x24xf32, #tpu.memory_space<vmem>>, vector<1x1x24xf32>
    %148 = vector.broadcast %147 : vector<1x1x24xf32> to vector<16x16x24xf32>
    %149 = arith.mulf %146, %148 : vector<16x16x24xf32>
    %c0_55 = arith.constant 0 : index
    %c0_56 = arith.constant 0 : index
    %c0_57 = arith.constant 0 : index
    %150 = vector.load %arg7[%c0_55, %c0_56, %c0_57] : memref<1x1x24xf32, #tpu.memory_space<vmem>>, vector<1x1x24xf32>
    %151 = vector.broadcast %150 : vector<1x1x24xf32> to vector<16x16x24xf32>
    %152 = arith.addf %149, %151 : vector<16x16x24xf32>
    %cst_58 = arith.constant 0.000000e+00 : f32
    %153 = vector.broadcast %cst_58 : f32 to vector<16x16x24xf32>
    %154 = arith.maximumf %152, %153 : vector<16x16x24xf32>
    %155 = vector.extract_strided_slice %154 {offsets = [0, 0, 0], sizes = [1, 16, 24], strides = [1, 1, 1]} : vector<16x16x24xf32> to vector<1x16x24xf32>
    %156 = vector.shape_cast %155 : vector<1x16x24xf32> to vector<16x24xf32>
    %c0_59 = arith.constant 0 : index
    %c0_60 = arith.constant 0 : index
    %157 = vector.load %arg16[%c0_59, %c0_60] : memref<256x24xf32, #tpu.memory_space<vmem>>, vector<16x24xf32>
    tpu.vector_store %arg16[%c0_59, %c0_60], %156 {strides = array<i32>} : memref<256x24xf32, #tpu.memory_space<vmem>>, vector<16x24xf32>,
    %158 = vector.extract_strided_slice %154 {offsets = [1, 0, 0], sizes = [1, 16, 24], strides = [1, 1, 1]} : vector<16x16x24xf32> to vector<1x16x24xf32>
    %159 = vector.shape_cast %158 : vector<1x16x24xf32> to vector<16x24xf32>
    %c16_61 = arith.constant 16 : index
    %c0_62 = arith.constant 0 : index
    %160 = vector.load %arg16[%c16_61, %c0_62] : memref<256x24xf32, #tpu.memory_space<vmem>>, vector<16x24xf32>
    tpu.vector_store %arg16[%c16_61, %c0_62], %159 {strides = array<i32>} : memref<256x24xf32, #tpu.memory_space<vmem>>, vector<16x24xf32>,
    %161 = vector.extract_strided_slice %154 {offsets = [2, 0, 0], sizes = [1, 16, 24], strides = [1, 1, 1]} : vector<16x16x24xf32> to vector<1x16x24xf32>
    %162 = vector.shape_cast %161 : vector<1x16x24xf32> to vector<16x24xf32>
    %c32 = arith.constant 32 : index
    %c0_63 = arith.constant 0 : index
    %163 = vector.load %arg16[%c32, %c0_63] : memref<256x24xf32, #tpu.memory_space<vmem>>, vector<16x24xf32>
    tpu.vector_store %arg16[%c32, %c0_63], %162 {strides = array<i32>} : memref<256x24xf32, #tpu.memory_space<vmem>>, vector<16x24xf32>,
    %164 = vector.extract_strided_slice %154 {offsets = [3, 0, 0], sizes = [1, 16, 24], strides = [1, 1, 1]} : vector<16x16x24xf32> to vector<1x16x24xf32>
    %165 = vector.shape_cast %164 : vector<1x16x24xf32> to vector<16x24xf32>
    %c48 = arith.constant 48 : index
    %c0_64 = arith.constant 0 : index
    %166 = vector.load %arg16[%c48, %c0_64] : memref<256x24xf32, #tpu.memory_space<vmem>>, vector<16x24xf32>
    tpu.vector_store %arg16[%c48, %c0_64], %165 {strides = array<i32>} : memref<256x24xf32, #tpu.memory_space<vmem>>, vector<16x24xf32>,
    %167 = vector.extract_strided_slice %154 {offsets = [4, 0, 0], sizes = [1, 16, 24], strides = [1, 1, 1]} : vector<16x16x24xf32> to vector<1x16x24xf32>
    %168 = vector.shape_cast %167 : vector<1x16x24xf32> to vector<16x24xf32>
    %c64 = arith.constant 64 : index
    %c0_65 = arith.constant 0 : index
    %169 = vector.load %arg16[%c64, %c0_65] : memref<256x24xf32, #tpu.memory_space<vmem>>, vector<16x24xf32>
    tpu.vector_store %arg16[%c64, %c0_65], %168 {strides = array<i32>} : memref<256x24xf32, #tpu.memory_space<vmem>>, vector<16x24xf32>,
    %170 = vector.extract_strided_slice %154 {offsets = [5, 0, 0], sizes = [1, 16, 24], strides = [1, 1, 1]} : vector<16x16x24xf32> to vector<1x16x24xf32>
    %171 = vector.shape_cast %170 : vector<1x16x24xf32> to vector<16x24xf32>
    %c80 = arith.constant 80 : index
    %c0_66 = arith.constant 0 : index
    %172 = vector.load %arg16[%c80, %c0_66] : memref<256x24xf32, #tpu.memory_space<vmem>>, vector<16x24xf32>
    tpu.vector_store %arg16[%c80, %c0_66], %171 {strides = array<i32>} : memref<256x24xf32, #tpu.memory_space<vmem>>, vector<16x24xf32>,
    %173 = vector.extract_strided_slice %154 {offsets = [6, 0, 0], sizes = [1, 16, 24], strides = [1, 1, 1]} : vector<16x16x24xf32> to vector<1x16x24xf32>
    %174 = vector.shape_cast %173 : vector<1x16x24xf32> to vector<16x24xf32>
    %c96 = arith.constant 96 : index
    %c0_67 = arith.constant 0 : index
    %175 = vector.load %arg16[%c96, %c0_67] : memref<256x24xf32, #tpu.memory_space<vmem>>, vector<16x24xf32>
    tpu.vector_store %arg16[%c96, %c0_67], %174 {strides = array<i32>} : memref<256x24xf32, #tpu.memory_space<vmem>>, vector<16x24xf32>,
    %176 = vector.extract_strided_slice %154 {offsets = [7, 0, 0], sizes = [1, 16, 24], strides = [1, 1, 1]} : vector<16x16x24xf32> to vector<1x16x24xf32>
    %177 = vector.shape_cast %176 : vector<1x16x24xf32> to vector<16x24xf32>
    %c112 = arith.constant 112 : index
    %c0_68 = arith.constant 0 : index
    %178 = vector.load %arg16[%c112, %c0_68] : memref<256x24xf32, #tpu.memory_space<vmem>>, vector<16x24xf32>
    tpu.vector_store %arg16[%c112, %c0_68], %177 {strides = array<i32>} : memref<256x24xf32, #tpu.memory_space<vmem>>, vector<16x24xf32>,
    %179 = vector.extract_strided_slice %154 {offsets = [8, 0, 0], sizes = [1, 16, 24], strides = [1, 1, 1]} : vector<16x16x24xf32> to vector<1x16x24xf32>
    %180 = vector.shape_cast %179 : vector<1x16x24xf32> to vector<16x24xf32>
    %c128 = arith.constant 128 : index
    %c0_69 = arith.constant 0 : index
    %181 = vector.load %arg16[%c128, %c0_69] : memref<256x24xf32, #tpu.memory_space<vmem>>, vector<16x24xf32>
    tpu.vector_store %arg16[%c128, %c0_69], %180 {strides = array<i32>} : memref<256x24xf32, #tpu.memory_space<vmem>>, vector<16x24xf32>,
    %182 = vector.extract_strided_slice %154 {offsets = [9, 0, 0], sizes = [1, 16, 24], strides = [1, 1, 1]} : vector<16x16x24xf32> to vector<1x16x24xf32>
    %183 = vector.shape_cast %182 : vector<1x16x24xf32> to vector<16x24xf32>
    %c144 = arith.constant 144 : index
    %c0_70 = arith.constant 0 : index
    %184 = vector.load %arg16[%c144, %c0_70] : memref<256x24xf32, #tpu.memory_space<vmem>>, vector<16x24xf32>
    tpu.vector_store %arg16[%c144, %c0_70], %183 {strides = array<i32>} : memref<256x24xf32, #tpu.memory_space<vmem>>, vector<16x24xf32>,
    %185 = vector.extract_strided_slice %154 {offsets = [10, 0, 0], sizes = [1, 16, 24], strides = [1, 1, 1]} : vector<16x16x24xf32> to vector<1x16x24xf32>
    %186 = vector.shape_cast %185 : vector<1x16x24xf32> to vector<16x24xf32>
    %c160 = arith.constant 160 : index
    %c0_71 = arith.constant 0 : index
    %187 = vector.load %arg16[%c160, %c0_71] : memref<256x24xf32, #tpu.memory_space<vmem>>, vector<16x24xf32>
    tpu.vector_store %arg16[%c160, %c0_71], %186 {strides = array<i32>} : memref<256x24xf32, #tpu.memory_space<vmem>>, vector<16x24xf32>,
    %188 = vector.extract_strided_slice %154 {offsets = [11, 0, 0], sizes = [1, 16, 24], strides = [1, 1, 1]} : vector<16x16x24xf32> to vector<1x16x24xf32>
    %189 = vector.shape_cast %188 : vector<1x16x24xf32> to vector<16x24xf32>
    %c176 = arith.constant 176 : index
    %c0_72 = arith.constant 0 : index
    %190 = vector.load %arg16[%c176, %c0_72] : memref<256x24xf32, #tpu.memory_space<vmem>>, vector<16x24xf32>
    tpu.vector_store %arg16[%c176, %c0_72], %189 {strides = array<i32>} : memref<256x24xf32, #tpu.memory_space<vmem>>, vector<16x24xf32>,
    %191 = vector.extract_strided_slice %154 {offsets = [12, 0, 0], sizes = [1, 16, 24], strides = [1, 1, 1]} : vector<16x16x24xf32> to vector<1x16x24xf32>
    %192 = vector.shape_cast %191 : vector<1x16x24xf32> to vector<16x24xf32>
    %c192 = arith.constant 192 : index
    %c0_73 = arith.constant 0 : index
    %193 = vector.load %arg16[%c192, %c0_73] : memref<256x24xf32, #tpu.memory_space<vmem>>, vector<16x24xf32>
    tpu.vector_store %arg16[%c192, %c0_73], %192 {strides = array<i32>} : memref<256x24xf32, #tpu.memory_space<vmem>>, vector<16x24xf32>,
    %194 = vector.extract_strided_slice %154 {offsets = [13, 0, 0], sizes = [1, 16, 24], strides = [1, 1, 1]} : vector<16x16x24xf32> to vector<1x16x24xf32>
    %195 = vector.shape_cast %194 : vector<1x16x24xf32> to vector<16x24xf32>
    %c208 = arith.constant 208 : index
    %c0_74 = arith.constant 0 : index
    %196 = vector.load %arg16[%c208, %c0_74] : memref<256x24xf32, #tpu.memory_space<vmem>>, vector<16x24xf32>
    tpu.vector_store %arg16[%c208, %c0_74], %195 {strides = array<i32>} : memref<256x24xf32, #tpu.memory_space<vmem>>, vector<16x24xf32>,
    %197 = vector.extract_strided_slice %154 {offsets = [14, 0, 0], sizes = [1, 16, 24], strides = [1, 1, 1]} : vector<16x16x24xf32> to vector<1x16x24xf32>
    %198 = vector.shape_cast %197 : vector<1x16x24xf32> to vector<16x24xf32>
    %c224 = arith.constant 224 : index
    %c0_75 = arith.constant 0 : index
    %199 = vector.load %arg16[%c224, %c0_75] : memref<256x24xf32, #tpu.memory_space<vmem>>, vector<16x24xf32>
    tpu.vector_store %arg16[%c224, %c0_75], %198 {strides = array<i32>} : memref<256x24xf32, #tpu.memory_space<vmem>>, vector<16x24xf32>,
    %200 = vector.extract_strided_slice %154 {offsets = [15, 0, 0], sizes = [1, 16, 24], strides = [1, 1, 1]} : vector<16x16x24xf32> to vector<1x16x24xf32>
    %201 = vector.shape_cast %200 : vector<1x16x24xf32> to vector<16x24xf32>
    %c240 = arith.constant 240 : index
    %c0_76 = arith.constant 0 : index
    %202 = vector.load %arg16[%c240, %c0_76] : memref<256x24xf32, #tpu.memory_space<vmem>>, vector<16x24xf32>
    tpu.vector_store %arg16[%c240, %c0_76], %201 {strides = array<i32>} : memref<256x24xf32, #tpu.memory_space<vmem>>, vector<16x24xf32>,
    %c0_77 = arith.constant 0 : index
    %c0_78 = arith.constant 0 : index
    %203 = vector.load %arg16[%c0_77, %c0_78] : memref<256x24xf32, #tpu.memory_space<vmem>>, vector<256x24xf32>
    %c0_79 = arith.constant 0 : index
    %c0_80 = arith.constant 0 : index
    %204 = vector.load %arg8[%c0_79, %c0_80] : memref<24x8xf32, #tpu.memory_space<vmem>>, vector<24x8xf32>
    %cst_81 = arith.constant dense<0.000000e+00> : vector<256x8xf32>
    %205 = tpu.matmul %203, %204, %cst_81 {dimension_numbers = #tpu.dot_dimension_numbers<[1], [0], [0], [1], [0, 0, 1, 1], [], []>} : vector<256x24xf32>, vector<24x8xf32>, vector<256x8xf32> -> vector<256x8xf32>
    %c0_82 = arith.constant 0 : index
    %c0_83 = arith.constant 0 : index
    %206 = vector.load %arg9[%c0_82, %c0_83] : memref<1x8xf32, #tpu.memory_space<vmem>>, vector<1x8xf32>
    %207 = vector.broadcast %206 : vector<1x8xf32> to vector<256x8xf32>
    %208 = arith.mulf %205, %207 : vector<256x8xf32>
    %c0_84 = arith.constant 0 : index
    %c0_85 = arith.constant 0 : index
    %209 = vector.load %arg10[%c0_84, %c0_85] : memref<1x8xf32, #tpu.memory_space<vmem>>, vector<1x8xf32>
    %210 = vector.broadcast %209 : vector<1x8xf32> to vector<256x8xf32>
    %211 = arith.addf %208, %210 : vector<256x8xf32>
    %c0_86 = arith.constant 0 : index
    %c0_87 = arith.constant 0 : index
    %212 = vector.load %arg11[%c0_86, %c0_87] : memref<4x8xf32, #tpu.memory_space<vmem>>, vector<4x8xf32>
    %cst_88 = arith.constant dense<0.000000e+00> : vector<256x8xf32>
    %213 = tpu.matmul %1, %212, %cst_88 {dimension_numbers = #tpu.dot_dimension_numbers<[1], [0], [0], [1], [0, 0, 1, 1], [], []>} : vector<256x4xf32>, vector<4x8xf32>, vector<256x8xf32> -> vector<256x8xf32>
    %c0_89 = arith.constant 0 : index
    %c0_90 = arith.constant 0 : index
    %214 = vector.load %arg12[%c0_89, %c0_90] : memref<1x8xf32, #tpu.memory_space<vmem>>, vector<1x8xf32>
    %215 = vector.broadcast %214 : vector<1x8xf32> to vector<256x8xf32>
    %216 = arith.mulf %213, %215 : vector<256x8xf32>
    %217 = arith.addf %211, %216 : vector<256x8xf32>
    %c0_91 = arith.constant 0 : index
    %c0_92 = arith.constant 0 : index
    %218 = vector.load %arg13[%c0_91, %c0_92] : memref<1x8xf32, #tpu.memory_space<vmem>>, vector<1x8xf32>
    %219 = vector.broadcast %218 : vector<1x8xf32> to vector<256x8xf32>
    %220 = arith.addf %217, %219 : vector<256x8xf32>
    %c0_93 = arith.constant 0 : index
    %c0_94 = arith.constant 0 : index
    %c0_95 = arith.constant 0 : index
    %221 = vector.load %arg14[%c0_93, %c0_94, %c0_95] : memref<1x256x8xf32, #tpu.memory_space<vmem>>, vector<1x256x8xf32>
    %222 = vector.shape_cast %221 : vector<1x256x8xf32> to vector<256x8xf32>
    %223 = vector.shape_cast %220 : vector<256x8xf32> to vector<1x256x8xf32>
    tpu.vector_store %arg14[%c0_93, %c0_94, %c0_95], %223 {strides = array<i32>} : memref<1x256x8xf32, #tpu.memory_space<vmem>>, vector<1x256x8xf32>,
    return
  }
  func.func @transform_0(%arg0: i32) -> (i32, i32, i32) {
    %c0_i32 = arith.constant 0 : i32
    %c0_i32_0 = arith.constant 0 : i32
    %c0_i32_1 = arith.constant 0 : i32
    return %arg0, %c0_i32, %c0_i32_0 : i32, i32, i32
  }
  func.func @transform_1(%arg0: i32) -> (i32, i32) {
    %c0_i32 = arith.constant 0 : i32
    %c0_i32_0 = arith.constant 0 : i32
    %c0_i32_1 = arith.constant 0 : i32
    return %c0_i32, %c0_i32_0 : i32, i32
  }
  func.func @transform_2(%arg0: i32) -> (i32, i32) {
    %c0_i32 = arith.constant 0 : i32
    %c0_i32_0 = arith.constant 0 : i32
    %c0_i32_1 = arith.constant 0 : i32
    return %c0_i32, %c0_i32_0 : i32, i32
  }
  func.func @transform_3(%arg0: i32) -> (i32, i32) {
    %c0_i32 = arith.constant 0 : i32
    %c0_i32_0 = arith.constant 0 : i32
    %c0_i32_1 = arith.constant 0 : i32
    return %c0_i32, %c0_i32_0 : i32, i32
  }
  func.func @transform_4(%arg0: i32) -> (i32, i32, i32) {
    %c0_i32 = arith.constant 0 : i32
    %c0_i32_0 = arith.constant 0 : i32
    %c0_i32_1 = arith.constant 0 : i32
    %c0_i32_2 = arith.constant 0 : i32
    return %c0_i32, %c0_i32_0, %c0_i32_1 : i32, i32, i32
  }
  func.func @transform_5(%arg0: i32) -> (i32, i32, i32) {
    %c0_i32 = arith.constant 0 : i32
    %c0_i32_0 = arith.constant 0 : i32
    %c0_i32_1 = arith.constant 0 : i32
    %c0_i32_2 = arith.constant 0 : i32
    return %c0_i32, %c0_i32_0, %c0_i32_1 : i32, i32, i32
  }
  func.func @transform_6(%arg0: i32) -> (i32, i32, i32) {
    %c0_i32 = arith.constant 0 : i32
    %c0_i32_0 = arith.constant 0 : i32
    %c0_i32_1 = arith.constant 0 : i32
    %c0_i32_2 = arith.constant 0 : i32
    return %c0_i32, %c0_i32_0, %c0_i32_1 : i32, i32, i32
  }
  func.func @transform_7(%arg0: i32) -> (i32, i32) {
    %c0_i32 = arith.constant 0 : i32
    %c0_i32_0 = arith.constant 0 : i32
    %c0_i32_1 = arith.constant 0 : i32
    return %c0_i32, %c0_i32_0 : i32, i32
  }
  func.func @transform_8(%arg0: i32) -> (i32, i32) {
    %c0_i32 = arith.constant 0 : i32
    %c0_i32_0 = arith.constant 0 : i32
    %c0_i32_1 = arith.constant 0 : i32
    return %c0_i32, %c0_i32_0 : i32, i32
  }
  func.func @transform_9(%arg0: i32) -> (i32, i32) {
    %c0_i32 = arith.constant 0 : i32
    %c0_i32_0 = arith.constant 0 : i32
    %c0_i32_1 = arith.constant 0 : i32
    return %c0_i32, %c0_i32_0 : i32, i32
  }
  func.func @transform_10(%arg0: i32) -> (i32, i32) {
    %c0_i32 = arith.constant 0 : i32
    %c0_i32_0 = arith.constant 0 : i32
    %c0_i32_1 = arith.constant 0 : i32
    return %c0_i32, %c0_i32_0 : i32, i32
  }
  func.func @transform_11(%arg0: i32) -> (i32, i32) {
    %c0_i32 = arith.constant 0 : i32
    %c0_i32_0 = arith.constant 0 : i32
    %c0_i32_1 = arith.constant 0 : i32
    return %c0_i32, %c0_i32_0 : i32, i32
  }
  func.func @transform_12(%arg0: i32) -> (i32, i32) {
    %c0_i32 = arith.constant 0 : i32
    %c0_i32_0 = arith.constant 0 : i32
    %c0_i32_1 = arith.constant 0 : i32
    return %c0_i32, %c0_i32_0 : i32, i32
  }
  func.func @transform_13(%arg0: i32) -> (i32, i32, i32) {
    %c0_i32 = arith.constant 0 : i32
    %c0_i32_0 = arith.constant 0 : i32
    %c0_i32_1 = arith.constant 0 : i32
    return %arg0, %c0_i32, %c0_i32_0 : i32, i32, i32
  }
}

</mosaic_0001>

<bundles_post_ra>
// kernel: tpu_custom_call.1
= control target key start
LH: loop header
LB: loop body
LE: loop exit
PB: predicated region body
PF: predicated region fallthrough
CT: control target
= control target key end

     0   :  { %s4423_s25 = smov 0   ;;  %s7050_s0 = inlined_call_operand.vmem [shape: f32[2,256,4], index: 0, kind: input, shape index: {}]   ;;  %s7051_s1 = inlined_call_operand.vmem [shape: f32[4,24], index: 1, kind: input, shape index: {}]   ;;  %s7052_s2 = inlined_call_operand.vmem [shape: f32[1,24], index: 2, kind: input, shape index: {}]   ;;  %s7053_s3 = inlined_call_operand.vmem [shape: f32[1,24], index: 3, kind: input, shape index: {}]   ;;  %s7054_s4 = inlined_call_operand.vmem [shape: f32[3,3,24], index: 4, kind: input, shape index: {}]   ;;  %s7055_s5 = inlined_call_operand.vmem [shape: f32[1,1,24], index: 5, kind: input, shape index: {}]   ;;  %s7056_s6 = inlined_call_operand.vmem [shape: f32[1,1,24], index: 6, kind: input, shape index: {}]   ;;  %s7057_s7 = inlined_call_operand.vmem [shape: f32[24,8], index: 7, kind: input, shape index: {}]   ;;  %s7058_s8 = inlined_call_operand.vmem [shape: f32[1,8], index: 8, kind: input, shape index: {}]   ;;  %s7059_s9 = inlined_call_operand.vmem [shape: f32[1,8], index: 9, kind: input, shape index: {}]   ;;  %s7060_s10 = inlined_call_operand.vmem [shape: f32[4,8], index: 10, kind: input, shape index: {}]   ;;  %s7061_s11 = inlined_call_operand.vmem [shape: f32[1,8], index: 11, kind: input, shape index: {}]   ;;  %s7062_s12 = inlined_call_operand.vmem [shape: f32[1,8], index: 12, kind: input, shape index: {}]   ;;  %s7063_s13 = inlined_call_operand.vmem [shape: f32[2,256,8], index: 13, kind: output, shape index: {}]  }
   0x1 LB: > { %s3941_s26 = sadd.s32 4294967295, %s4350_s25   ;;  %p3945_p0 = scmp.ge.s32.totalorder %s4350_s25, 1  ;;  %s4350_s25 = sphi %s4423_s25, %s23_s25  }
   0x2   : > { %p387_p1 = scmp.lt.s32.totalorder %s4350_s25, 3 }
   0x4   : > { %p388_p2 = pnand %p3945_p0, %p387_p1 }
   0x6   : > { %391 = sbr.rel (%p388_p2) target bundleno = 788 (0x314), region = 72 }
   0xb   : > { %v473_v0 = vld [vmem:[%s7051_s1] sm:$0xf]  ;;  %vm571_vm0 = vcmask 1043456   ;;  %p431_p3 = scmp.lt.s32.totalorder %s3941_s26, 1  ;;  %vm474_vm1 = vcmask 31744   ;;  %vm910_vm2 = vcmask 195584   ;;  %v1106_v38 = vlaneseq }
   0xc   : > { %4161 = vmatprep.subr.msk.mxu0 %vm571_vm0, %v473_v0  ;;  %4315 = vmatprep.subr.msk.mxu1 %vm571_vm0, %v473_v0  ;;  %v4352_v33 = vmov 0.0   ;;  %v3114_v34 = vld [vmem:[%s7057_s7 + $0x10] sm:$0xff]  ;;  %v3514_v35 = vld [vmem:[%s7060_s10] sm:$0xf]  ;;  %v3113_v36 = vld [vmem:[%s7057_s7 + $0x8] sm:$0xff]  ;;  %vm1274_vm3 = vcmask 1046528  }
   0xd   : > { %4162 = vmatpush3.msk.msra.mxu0 %vm571_vm0, %v473_v0  ;;  %s7270_s26 = smov (!%p431_p3, %s3941_s26), 1  ;;  %4316 = vmatpush3.msk.msra.mxu1 %vm571_vm0, %v473_v0  ;;  %913 = vst.msk [vmem:[#allocation2 + $0x10] sm:$0xff] %vm910_vm2, %v4352_v33  ;;  %914 = vst.msk [vmem:[#allocation2 + $0x18] sm:$0xff] %vm910_vm2, %v4352_v33  ;;  %v3112_v37 = vld [vmem:[%s7057_s7] sm:$0xff]  ;;  %v1107_v39 = vshrl.u32 %v1106_v38, 7  ;;  %vm1519_vm4 = vcmask 1045504  }
   0xe   : > { %s4058_s29 = sshll.u32 %s7270_s26, 8  ;;  %917 = vst.msk [vmem:[#allocation2 + $0x30] sm:$0xff] %vm910_vm2, %v4352_v33  ;;  %918 = vst.msk [vmem:[#allocation2 + $0x38] sm:$0xff] %vm910_vm2, %v4352_v33  ;;  %4211 = vmatprep.subr.mxu1 %v3114_v34  ;;  %4265 = vmatprep.subr.msk.mxu0 %vm571_vm0, %v3514_v35  ;;  %v1031_v41 = vld [vmem:[%s7054_s4] sm:$0x7]  ;;  %vm3030_vm5 = vcmask 195591  }
   0xf   : > { %s4446_s15 = scalar_lea.vmem %s7050_s0, %s4058_s29  ;;  %911 = vst.msk [vmem:[#allocation2] sm:$0xff] %vm910_vm2, %v4352_v33  ;;  %912 = vst.msk [vmem:[#allocation2 + $0x8] sm:$0xff] %vm910_vm2, %v4352_v33  ;;  %v4824_v40 = vsub.s32 1, %v1107_v39  ;;  %v1421_v42 = vsub.s32 2, %v1107_v39  ;;  %v1108_v45 = vsub.s32 0, %v1107_v39  ;;  %vm3033_vm6 = vcmask 194560   ;;  %s6837_s14 = scalar_lea.vmem %s7063_s13, %s4058_s29 }
  0x10   : > { %v4449_v1 = vld [vmem:[%s4446_s15] sm:$0xff]  ;;  %v4452_v2 = vld [vmem:[%s4446_s15 + $0x8] sm:$0xff]  ;;  %v4455_v3 = vld [vmem:[%s4446_s15 + $0x10] sm:$0xff]  ;;  %915 = vst.msk [vmem:[#allocation2 + $0x20] sm:$0xff] %vm910_vm2, %v4352_v33  ;;  %vm3853_vm7 = vcmask 64512  }
  0x11   : > { %4163 = vmatprep.mubr.msk.f32.mxu0 %vm474_vm1, %v4449_v1  ;;  %v4464_v4 = vld [vmem:[%s4446_s15 + $0x18] sm:$0xff]  ;;  %v4467_v5 = vld [vmem:[%s4446_s15 + $0x20] sm:$0xff]  ;;  %v4473_v7 = vld [vmem:[%s4446_s15 + $0x88] sm:$0xff]  ;;  %916 = vst.msk [vmem:[#allocation2 + $0x28] sm:$0xff] %vm910_vm2, %v4352_v33  ;;  %v4834_v43 = vrot.slane %v1031_v41, %v4824_v40  ;;  %v4838_v47 = vrot.slane %v1031_v41, %v1421_v42  ;;  %v4842_v51 = vrot.slane %v1031_v41, %v1108_v45 }
  0x12   : > { %4164 = vmatmul.mubr.msk.f32.vlgmr.msra.gmra.mxu0 %vm474_vm1, %v4452_v2  ;;  %v4470_v6 = vld [vmem:[%s4446_s15 + $0x80] sm:$0xff]  ;;  %v4478_v8 = vld [vmem:[%s4446_s15 + $0x90] sm:$0xff]  ;;  %v4487_v9 = vld [vmem:[%s4446_s15 + $0x28] sm:$0xff]  ;;  %919 = vst.msk [vmem:[#allocation2 + $0x40] sm:$0xff] %vm910_vm2, %v4352_v33 }
  0x13   : > { %4166 = vmatprep.mubr.msk.f32.mxu0 %vm474_vm1, %v4455_v3  ;;  %4187 = vmatprep.mubr.msk.f32.mxu1 %vm474_vm1, %v4470_v6  ;;  %v4492_v10 = vld [vmem:[%s4446_s15 + $0x98] sm:$0xff]  ;;  %v4495_v11 = vld [vmem:[%s4446_s15 + $0x30] sm:$0xff]  ;;  %v4498_v12 = vld [vmem:[%s4446_s15 + $0xa0] sm:$0xff]  ;;  %920 = vst.msk [vmem:[#allocation2 + $0x48] sm:$0xff] %vm910_vm2, %v4352_v33 }
  0x14   : > { %4188 = vmatmul.mubr.msk.f32.vlgmr.msra.gmra.mxu1 %vm474_vm1, %v4473_v7  ;;  %v4507_v13 = vld [vmem:[%s4446_s15 + $0x38] sm:$0xff]  ;;  %v4512_v14 = vld [vmem:[%s4446_s15 + $0xa8] sm:$0xff]  ;;  %v4515_v15 = vld [vmem:[%s4446_s15 + $0x40] sm:$0xff]  ;;  %921 = vst.msk [vmem:[#allocation2 + $0x50] sm:$0xff] %vm910_vm2, %v4352_v33  ;;  %4266 = vmatpush3.msk.msra.mxu0 %vm571_vm0, %v3514_v35 }
  0x15   : > { %4190 = vmatprep.mubr.msk.f32.mxu1 %vm474_vm1, %v4478_v8  ;;  %v4518_v16 = vld [vmem:[%s4446_s15 + $0xb0] sm:$0xff]  ;;  %v4527_v17 = vld [vmem:[%s4446_s15 + $0x48] sm:$0xff]  ;;  %v4532_v18 = vld [vmem:[%s4446_s15 + $0xb8] sm:$0xff]  ;;  %922 = vst.msk [vmem:[#allocation2 + $0x58] sm:$0xff] %vm910_vm2, %v4352_v33  ;;  %4212 = vmatpush3.msra.mxu1 %v3114_v34 }
  0x16   : > { %4167 = vmatmul.mubr.msk.f32.gmra.mxu0 %vm474_vm1, %v4464_v4  ;;  %v4535_v19 = vld [vmem:[%s4446_s15 + $0x50] sm:$0xff]  ;;  %v4538_v20 = vld [vmem:[%s4446_s15 + $0xc0] sm:$0xff]  ;;  %v4547_v21 = vld [vmem:[%s4446_s15 + $0x58] sm:$0xff]  ;;  %923 = vst.msk [vmem:[#allocation2 + $0x60] sm:$0xff] %vm910_vm2, %v4352_v33  ;;  %4213 = vmatprep.subr.mxu1 %v3113_v36 }
  0x17   : > { %4169 = vmatprep.mubr.msk.f32.mxu0 %vm474_vm1, %v4467_v5  ;;  %v4552_v22 = vld [vmem:[%s4446_s15 + $0xc8] sm:$0xff]  ;;  %v4555_v23 = vld [vmem:[%s4446_s15 + $0x60] sm:$0xff]  ;;  %v4558_v24 = vld [vmem:[%s4446_s15 + $0xd0] sm:$0xff]  ;;  %924 = vst.msk [vmem:[#allocation2 + $0x68] sm:$0xff] %vm910_vm2, %v4352_v33  ;;  %4214 = vmatpush3.msra.mxu1 %v3113_v36 }
  0x18   : > { %4191 = vmatmul.mubr.msk.f32.gmra.mxu1 %vm474_vm1, %v4492_v10  ;;  %v4567_v25 = vld [vmem:[%s4446_s15 + $0x68] sm:$0xff]  ;;  %v4572_v26 = vld [vmem:[%s4446_s15 + $0xd8] sm:$0xff]  ;;  %v4575_v27 = vld [vmem:[%s4446_s15 + $0x70] sm:$0xff]  ;;  %925 = vst.msk [vmem:[#allocation2 + $0x70] sm:$0xff] %vm910_vm2, %v4352_v33  ;;  %4215 = vmatprep.subr.mxu1 %v3112_v37 }
  0x19   : > { %4193 = vmatprep.mubr.msk.f32.mxu1 %vm474_vm1, %v4498_v12  ;;  %v4578_v28 = vld [vmem:[%s4446_s15 + $0xe0] sm:$0xff]  ;;  %v4587_v29 = vld [vmem:[%s4446_s15 + $0x78] sm:$0xff]  ;;  %v4592_v30 = vld [vmem:[%s4446_s15 + $0xe8] sm:$0xff]  ;;  %926 = vst.msk [vmem:[#allocation2 + $0x78] sm:$0xff] %vm910_vm2, %v4352_v33  ;;  %4216 = vmatpush3.msra.mxu1 %v3112_v37 }
  0x1a   : > { %4170 = vmatmul.mubr.msk.f32.gmra.mxu0 %vm474_vm1, %v4487_v9  ;;  %v4595_v31 = vld [vmem:[%s4446_s15 + $0xf0] sm:$0xff]  ;;  %v4604_v32 = vld [vmem:[%s4446_s15 + $0xf8] sm:$0xff]  ;;  %927 = vst.msk [vmem:[#allocation2 + $0x80] sm:$0xff] %vm910_vm2, %v4352_v33  ;;  %928 = vst.msk [vmem:[#allocation2 + $0x88] sm:$0xff] %vm910_vm2, %v4352_v33 }
  0x1b   : > { %4172 = vmatprep.mubr.msk.f32.mxu0 %vm474_vm1, %v4495_v11  ;;  %929 = vst.msk [vmem:[#allocation2 + $0x90] sm:$0xff] %vm910_vm2, %v4352_v33  ;;  %930 = vst.msk [vmem:[#allocation2 + $0x98] sm:$0xff] %vm910_vm2, %v4352_v33  ;;  %v1036_v44 = vld [vmem:[#allocation2 + $0x10] sm:$0xff]  ;;  %v1035_v46 = vld [vmem:[#allocation2 + $0x8] sm:$0xff] }
  0x1c   : > { %4194 = vmatmul.mubr.msk.f32.gmra.mxu1 %vm474_vm1, %v4512_v14  ;;  %931 = vst.msk [vmem:[#allocation2 + $0xa0] sm:$0xff] %vm910_vm2, %v4352_v33  ;;  %932 = vst.msk [vmem:[#allocation2 + $0xa8] sm:$0xff] %vm910_vm2, %v4352_v33  ;;  %v1037_v48 = vld [vmem:[#allocation2 + $0x18] sm:$0xff]  ;;  %v1211_v49 = vmul.f32 %v4834_v43, %v1036_v44  ;;  %v1210_v50 = vmul.f32 %v4834_v43, %v1035_v46  ;;  %v1034_v52 = vld [vmem:[#allocation2] sm:$0xff]  ;;  %v1424_v53 = vmul.f32 %v4838_v47, %v1036_v44 }
  0x1d   : > { %4196 = vmatprep.mubr.msk.f32.mxu1 %vm474_vm1, %v4518_v16  ;;  %933 = vst.msk [vmem:[#allocation2 + $0xb0] sm:$0xff] %vm910_vm2, %v4352_v33  ;;  %934 = vst.msk [vmem:[#allocation2 + $0xb8] sm:$0xff] %vm910_vm2, %v4352_v33  ;;  %v1425_v54 = vmul.f32 %v4838_v47, %v1037_v48  ;;  %v1032_v55 = vld [vmem:[%s7054_s4 + $0x4] sm:$0x7]  ;;  %v1423_v58 = vmul.f32 %v4838_v47, %v1035_v46  ;;  %v1110_v59 = vmul.f32 %v4842_v51, %v1034_v52  ;;  %v1041_v0 = vld [vmem:[#allocation2 + $0x38] sm:$0xff] }
  0x1e   : > { %4173 = vmatmul.mubr.msk.f32.gmra.mxu0 %vm474_vm1, %v4507_v13  ;;  %935 = vst.msk [vmem:[#allocation2 + $0xc0] sm:$0xff] %vm910_vm2, %v4352_v33  ;;  %936 = vst.msk [vmem:[#allocation2 + $0xc8] sm:$0xff] %vm910_vm2, %v4352_v33  ;;  %v1276_v56 = vrot.slane %v1211_v49, 1  ;;  %v1275_v57 = vrot.slane %v1210_v50, 1  ;;  %v1112_v60 = vmul.f32 %v4842_v51, %v1036_v44  ;;  %v1521_v61 = vrot.slane %v1424_v53, 2 }
  0x1f   : > { %4175 = vmatprep.mubr.msk.f32.mxu0 %vm474_vm1, %v4515_v15  ;;  %937 = vst.msk [vmem:[#allocation2 + $0xd0] sm:$0xff] %vm910_vm2, %v4352_v33  ;;  %938 = vst.msk [vmem:[#allocation2 + $0xd8] sm:$0xff] %vm910_vm2, %v4352_v33  ;;  %v1523_v62 = vrot.slane %v1425_v54, 2  ;;  %v4852_v63 = vrot.slane %v1032_v55, %v1421_v42 }
  0x20   : > { %4197 = vmatmul.mubr.msk.f32.gmra.mxu1 %vm474_vm1, %v4532_v18  ;;  %939 = vst.msk [vmem:[#allocation2 + $0xe0] sm:$0xff] %vm910_vm2, %v4352_v33  ;;  %940 = vst.msk [vmem:[#allocation2 + $0xe8] sm:$0xff] %vm910_vm2, %v4352_v33 }
  0x21   : > { %4199 = vmatprep.mubr.msk.f32.mxu1 %vm474_vm1, %v4538_v20  ;;  %941 = vst.msk [vmem:[#allocation2 + $0xf0] sm:$0xff] %vm910_vm2, %v4352_v33  ;;  %942 = vst.msk [vmem:[#allocation2 + $0xf8] sm:$0xff] %vm910_vm2, %v4352_v33  ;;  %v1050_v48 = vld [vmem:[#allocation2 + $0x80] sm:$0xff] }
  0x22   : > { %4176 = vmatmul.mubr.msk.f32.gmra.mxu0 %vm474_vm1, %v4527_v17  ;;  %943 = vst.msk [vmem:[#allocation2 + $0x100] sm:$0xff] %vm910_vm2, %v4352_v33  ;;  %944 = vst.msk [vmem:[#allocation2 + $0x108] sm:$0xff] %vm910_vm2, %v4352_v33 }
  0x23   : > { %4178 = vmatprep.mubr.msk.f32.mxu0 %vm474_vm1, %v4535_v19  ;;  %945 = vst.msk [vmem:[#allocation2 + $0x110] sm:$0xff] %vm910_vm2, %v4352_v33  ;;  %946 = vst.msk [vmem:[#allocation2 + $0x118] sm:$0xff] %vm910_vm2, %v4352_v33 }
  0x24   : > { %4200 = vmatmul.mubr.msk.f32.gmra.mxu1 %vm474_vm1, %v4552_v22  ;;  %947 = vst.msk [vmem:[#allocation2 + $0x120] sm:$0xff] %vm910_vm2, %v4352_v33  ;;  %948 = vst.msk [vmem:[#allocation2 + $0x128] sm:$0xff] %vm910_vm2, %v4352_v33  ;;  %v1057_v41 = vld [vmem:[#allocation2 + $0xb8] sm:$0xff] }
  0x25   : > { %4202 = vmatprep.mubr.msk.f32.mxu1 %vm474_vm1, %v4558_v24  ;;  %949 = vst.msk [vmem:[#allocation2 + $0x130] sm:$0xff] %vm910_vm2, %v4352_v33  ;;  %950 = vst.msk [vmem:[#allocation2 + $0x138] sm:$0xff] %vm910_vm2, %v4352_v33 }
  0x26   : > { %4179 = vmatmul.mubr.msk.f32.gmra.mxu0 %vm474_vm1, %v4547_v21  ;;  %951 = vst.msk [vmem:[#allocation2 + $0x140] sm:$0xff] %vm910_vm2, %v4352_v33  ;;  %952 = vst.msk [vmem:[#allocation2 + $0x148] sm:$0xff] %vm910_vm2, %v4352_v33 }
  0x27   : > { %4181 = vmatprep.mubr.msk.f32.mxu0 %vm474_vm1, %v4555_v23  ;;  %953 = vst.msk [vmem:[#allocation2 + $0x150] sm:$0xff] %vm910_vm2, %v4352_v33  ;;  %954 = vst.msk [vmem:[#allocation2 + $0x158] sm:$0xff] %vm910_vm2, %v4352_v33 }
  0x28   : > { %4203 = vmatmul.mubr.msk.f32.gmra.mxu1 %vm474_vm1, %v4572_v26  ;;  %955 = vst.msk [vmem:[#allocation2 + $0x160] sm:$0xff] %vm910_vm2, %v4352_v33  ;;  %956 = vst.msk [vmem:[#allocation2 + $0x168] sm:$0xff] %vm910_vm2, %v4352_v33 }
  0x29   : > { %4205 = vmatprep.mubr.msk.f32.mxu1 %vm474_vm1, %v4578_v28  ;;  %957 = vst.msk [vmem:[#allocation2 + $0x170] sm:$0xff] %vm910_vm2, %v4352_v33  ;;  %958 = vst.msk [vmem:[#allocation2 + $0x178] sm:$0xff] %vm910_vm2, %v4352_v33 }
  0x2a   : > { %4182 = vmatmul.mubr.msk.f32.gmra.mxu0 %vm474_vm1, %v4567_v25  ;;  %959 = vst.msk [vmem:[#allocation2 + $0x180] sm:$0xff] %vm910_vm2, %v4352_v33  ;;  %960 = vst.msk [vmem:[#allocation2 + $0x188] sm:$0xff] %vm910_vm2, %v4352_v33 }
  0x2b   : > { %4184 = vmatprep.mubr.msk.f32.mxu0 %vm474_vm1, %v4575_v27  ;;  %961 = vst.msk [vmem:[#allocation2 + $0x190] sm:$0xff] %vm910_vm2, %v4352_v33  ;;  %962 = vst.msk [vmem:[#allocation2 + $0x198] sm:$0xff] %vm910_vm2, %v4352_v33 }
  0x2c   : > { %4206 = vmatmul.mubr.msk.f32.gmra.mxu1 %vm474_vm1, %v4592_v30  ;;  %963 = vst.msk [vmem:[#allocation2 + $0x1a0] sm:$0xff] %vm910_vm2, %v4352_v33  ;;  %964 = vst.msk [vmem:[#allocation2 + $0x1a8] sm:$0xff] %vm910_vm2, %v4352_v33 }
  0x2d   : > { %4208 = vmatprep.mubr.msk.f32.mxu1 %vm474_vm1, %v4595_v31  ;;  %965 = vst.msk [vmem:[#allocation2 + $0x1b0] sm:$0xff] %vm910_vm2, %v4352_v33  ;;  %966 = vst.msk [vmem:[#allocation2 + $0x1b8] sm:$0xff] %vm910_vm2, %v4352_v33 }
  0x2e   : > { %4185 = vmatmul.mubr.msk.f32.gmra.mxu0 %vm474_vm1, %v4587_v29  ;;  %967 = vst.msk [vmem:[#allocation2 + $0x1c0] sm:$0xff] %vm910_vm2, %v4352_v33  ;;  %968 = vst.msk [vmem:[#allocation2 + $0x1c8] sm:$0xff] %vm910_vm2, %v4352_v33 }
  0x2f   : > { %4267 = vmatprep.mubr.msk.f32.mxu0 %vm474_vm1, %v4449_v1  ;;  %969 = vst.msk [vmem:[#allocation2 + $0x1d0] sm:$0xff] %vm910_vm2, %v4352_v33  ;;  %970 = vst.msk [vmem:[#allocation2 + $0x1d8] sm:$0xff] %vm910_vm2, %v4352_v33  ;;  %v1111_v1 = vmul.f32 %v4842_v51, %v1035_v46 }
  0x30   : > { %4209 = vmatmul.mubr.msk.f32.gmra.mxu1 %vm474_vm1, %v4604_v32  ;;  %971 = vst.msk [vmem:[#allocation2 + $0x1e0] sm:$0xff] %vm910_vm2, %v4352_v33  ;;  %972 = vst.msk [vmem:[#allocation2 + $0x1e8] sm:$0xff] %vm910_vm2, %v4352_v33 }
  0x31   : > { %973 = vst.msk [vmem:[#allocation2 + $0x1f0] sm:$0xff] %vm910_vm2, %v4352_v33  ;;  %974 = vst.msk [vmem:[#allocation2 + $0x1f8] sm:$0xff] %vm910_vm2, %v4352_v33 }
  0x32   : > { %975 = vst.msk [vmem:[#allocation2 + $0x200] sm:$0xff] %vm910_vm2, %v4352_v33  ;;  %976 = vst.msk [vmem:[#allocation2 + $0x208] sm:$0xff] %vm910_vm2, %v4352_v33  ;;  %4268 = vmatmul.mubr.msk.f32.vlgmr.msra.gmra.mxu0 %vm474_vm1, %v4452_v2  ;;  %v1033_v2 = vld [vmem:[%s7054_s4 + $0x8] sm:$0x7] }
  0x33   : > { %977 = vst.msk [vmem:[#allocation2 + $0x210] sm:$0xff] %vm910_vm2, %v4352_v33  ;;  %978 = vst.msk [vmem:[#allocation2 + $0x218] sm:$0xff] %vm910_vm2, %v4352_v33  ;;  %4270 = vmatprep.mubr.msk.f32.mxu0 %vm474_vm1, %v4455_v3  ;;  %v1277_v3 = vsel %vm1274_vm3, %v1275_v57, %v1276_v56  ;;  %v4913_v38 = vrot.slane %v1033_v2, %v4824_v40 }
  0x34   : > { %979 = vst.msk [vmem:[#allocation2 + $0x220] sm:$0xff] %vm910_vm2, %v4352_v33  ;;  %980 = vst.msk [vmem:[#allocation2 + $0x228] sm:$0xff] %vm910_vm2, %v4352_v33 }
  0x35   : > { %981 = vst.msk [vmem:[#allocation2 + $0x230] sm:$0xff] %vm910_vm2, %v4352_v33  ;;  %982 = vst.msk [vmem:[#allocation2 + $0x238] sm:$0xff] %vm910_vm2, %v4352_v33 }
  0x36   : > { %4271 = vmatmul.mubr.msk.f32.gmra.mxu0 %vm474_vm1, %v4464_v4  ;;  %v1520_v4 = vrot.slane %v1423_v58, 2 }
  0x37   : > { %4273 = vmatprep.mubr.msk.f32.mxu0 %vm474_vm1, %v4467_v5  ;;  %v1371_v5 = vadd.f32 %v1275_v57, %v1110_v59  ;;  %v4952_v59 = vmul.f32 %v4838_v47, %v1057_v41 }
  0x39   : > { %7116 = vst [vmem:[#allocation10_spill] sm:$0xff] %v4952_v59  ;;  %v1062_v59 = vld [vmem:[#allocation2 + $0xe0] sm:$0xff] }
  0x3a   : > { %4274 = vmatmul.mubr.msk.f32.gmra.mxu0 %vm474_vm1, %v4487_v9  ;;  %v4862_v9 = vmul.f32 %v4838_v47, %v1041_v0 }
  0x3b   : > { %4276 = vmatprep.mubr.msk.f32.mxu0 %vm474_vm1, %v4495_v11  ;;  %v4866_v11 = vmul.f32 %v4852_v63, %v1041_v0 }
  0x3e   : > { %4277 = vmatmul.mubr.msk.f32.gmra.mxu0 %vm474_vm1, %v4507_v13  ;;  %v1372_v13 = vadd.f32 %v1277_v3, %v1111_v1  ;;  %v1054_v1 = vld [vmem:[#allocation2 + $0xa0] sm:$0xff] }
  0x3f   : > { %4279 = vmatprep.mubr.msk.f32.mxu0 %vm474_vm1, %v4515_v15  ;;  %v1522_v15 = vsel %vm1519_vm4, %v1520_v4, %v1521_v61 }
  0x42   : > { %4280 = vmatmul.mubr.msk.f32.gmra.mxu0 %vm474_vm1, %v4527_v17 }
  0x43   : > { %4282 = vmatprep.mubr.msk.f32.mxu0 %vm474_vm1, %v4535_v19 }
  0x46   : > { %4283 = vmatmul.mubr.msk.f32.gmra.mxu0 %vm474_vm1, %v4547_v21  ;;  %v1042_v21 = vld [vmem:[#allocation2 + $0x40] sm:$0xff] }
  0x47   : > { %4285 = vmatprep.mubr.msk.f32.mxu0 %vm474_vm1, %v4555_v23 }
  0x4a   : > { %4286 = vmatmul.mubr.msk.f32.gmra.mxu0 %vm474_vm1, %v4567_v25 }
  0x4b   : > { %4288 = vmatprep.mubr.msk.f32.mxu0 %vm474_vm1, %v4575_v27  ;;  %v4888_v27 = vadd.f32 %v1522_v15, %v1372_v13  ;;  %v1058_v15 = vld [vmem:[#allocation2 + $0xc0] sm:$0xff] }
  0x4c   : > { %v4992_v58 = vmul.f32 %v4842_v51, %v1058_v15 }
  0x4e   : > { %4289 = vmatmul.mubr.msk.f32.gmra.mxu0 %vm474_vm1, %v4587_v29  ;;  %v1046_v29 = vld [vmem:[#allocation2 + $0x60] sm:$0xff]  ;;  %7124 = vst [vmem:[#allocation18_spill] sm:$0xff] %v4992_v58 }
  0x4f   : > { %4291 = vmatprep.mubr.msk.f32.mxu0 %vm474_vm1, %v4470_v6  ;;  %v1373_v6 = vadd.f32 %v1276_v56, %v1112_v60  ;;  %v4926_v46 = vmul.f32 %v4842_v51, %v1046_v29 }
  0x52   : > { %4292 = vmatmul.mubr.msk.f32.gmra.mxu0 %vm474_vm1, %v4473_v7  ;;  %v4859_v7 = vrot.slane %v1032_v55, %v1108_v45 }
  0x53   : > { %4294 = vmatprep.mubr.msk.f32.mxu0 %vm474_vm1, %v4478_v8  ;;  %v1038_v8 = vld [vmem:[#allocation2 + $0x20] sm:$0xff] }
  0x54   : > { %v1700_v17 = vmul.f32 %v4859_v7, %v1038_v8  ;;  %v4907_v36 = vmul.f32 %v4859_v7, %v1042_v21  ;;  %v4932_v49 = vmul.f32 %v4859_v7, %v1046_v29  ;;  %v4960_v0 = vmul.f32 %v4859_v7, %v1050_v48 }
  0x56   : > { %4295 = vmatmul.mubr.msk.f32.gmra.mxu0 %vm474_vm1, %v4492_v10  ;;  %v1524_v10 = vsel %vm1519_vm4, %v1521_v61, %v1523_v62  ;;  %v4957_v62 = vmul.f32 %v4842_v51, %v1050_v48  ;;  %7117 = vst [vmem:[#allocation11_spill] sm:$0xff] %v4960_v0 }
  0x57   : > { %4297 = vmatprep.mubr.msk.f32.mxu0 %vm474_vm1, %v4498_v12  ;;  %v4868_v12 = vrot.slane %v1033_v2, %v1421_v42  ;;  %v4872_v19 = vadd.f32 %v1524_v10, %v1373_v6  ;;  %v4921_v42 = vld [vmem:[%s7052_s2] ss:$0 sm:$0xff] }
  0x59   : > { %v4970_v6 = vmul.f32 %v4868_v12, %v1057_v41 }
  0x5a   : > { %4298 = vmatmul.mubr.msk.f32.gmra.mxu0 %vm474_vm1, %v4512_v14  ;;  %v1045_v14 = vld [vmem:[#allocation2 + $0x58] sm:$0xff] }
  0x5b   : > { %4300 = vmatprep.mubr.msk.f32.mxu0 %vm474_vm1, %v4518_v16  ;;  %v1648_v16 = vadd.f32 %v1520_v4, %v1371_v5  ;;  %v4883_v25 = vmul.f32 %v4868_v12, %v1045_v14  ;;  %v4901_v34 = vmul.f32 %v4852_v63, %v1045_v14  ;;  %v4967_v5 = vmul.f32 %v4852_v63, %v1057_v41 }
  0x5c   : > { %7120 = vst [vmem:[#allocation14_spill] sm:$0xff] %v4970_v6 }
  0x5d   : > { %v4898_v33 = vadd.f32 %v1700_v17, %v1648_v16  ;;  %7119 = vst [vmem:[#allocation13_spill] sm:$0xff] %v4967_v5  ;;  %v1061_v16 = vld [vmem:[#allocation2 + $0xd8] sm:$0xff] }
  0x5e   : > { %4301 = vmatmul.mubr.msk.f32.gmra.mxu0 %vm474_vm1, %v4532_v18  ;;  %v1049_v18 = vld [vmem:[#allocation2 + $0x78] sm:$0xff]  ;;  %v5006_v61 = vmul.f32 %v4852_v63, %v1061_v16  ;;  %v5009_v57 = vmul.f32 %v4868_v12, %v1061_v16 }
  0x5f   : > { %4303 = vmatprep.mubr.msk.f32.mxu0 %vm474_vm1, %v4538_v20  ;;  %v4875_v20 = vrot.slane %v1032_v55, %v4824_v40  ;;  %v4904_v35 = vmul.f32 %v4852_v63, %v1049_v18  ;;  %v4916_v39 = vmul.f32 %v4868_v12, %v1049_v18  ;;  %v4944_v55 = vld [vmem:[%s7053_s3] ss:$0 sm:$0xff] }
  0x60   : > { %7127 = vst [vmem:[#allocation21_spill] sm:$0xff] %v5006_v61  ;;  %7128 = vst [vmem:[#allocation22_spill] sm:$0xff] %v5009_v57 }
  0x61   : > { %7112 = vst [vmem:[#allocation6_spill] sm:$0xff] %v4904_v35 }
  0x62   : > { %4304 = vmatmul.mubr.msk.f32.gmra.mxu0 %vm474_vm1, %v4552_v22 }
  0x63   : > { %4306 = vmatprep.mubr.msk.f32.mxu0 %vm474_vm1, %v4558_v24  ;;  %v4880_v24 = vmul.f32 %v4838_v47, %v1045_v14  ;;  %v5003_v14 = vmul.f32 %v4859_v7, %v1058_v15 }
  0x65   : > { %7110 = vst [vmem:[#allocation4_spill] sm:$0xff] %v4880_v24  ;;  %7126 = vst [vmem:[#allocation20_spill] sm:$0xff] %v5003_v14 }
  0x66   : > { %4307 = vmatmul.mubr.msk.f32.gmra.mxu0 %vm474_vm1, %v4572_v26  ;;  %v4886_v26 = vmul.f32 %v4842_v51, %v1038_v8 }
  0x67   : > { %4309 = vmatprep.mubr.msk.f32.mxu0 %vm474_vm1, %v4578_v28  ;;  %v4890_v28 = vrot.slane %v1033_v2, %v1108_v45 }
  0x69   : > { %v4910_v37 = vmul.f32 %v4890_v28, %v1042_v21  ;;  %v4947_v56 = vmul.f32 %v4890_v28, %v1046_v29  ;;  %v4963_v3 = vmul.f32 %v4890_v28, %v1050_v48  ;;  %v4980_v29 = vmul.f32 %v4859_v7, %v1054_v1 }
  0x6a   : > { %4310 = vmatmul.mubr.msk.f32.gmra.mxu0 %vm474_vm1, %v4592_v30  ;;  %v4893_v30 = vmul.f32 %v4838_v47, %v1049_v18  ;;  %v5017_v22 = vmul.f32 %v4890_v28, %v1058_v15 }
  0x6b   : > { %4312 = vmatprep.mubr.msk.f32.mxu0 %vm474_vm1, %v4595_v31  ;;  %v1053_v31 = vld [vmem:[#allocation2 + $0x98] sm:$0xff]  ;;  %7118 = vst [vmem:[#allocation12_spill] sm:$0xff] %v4963_v3  ;;  %7122 = vst [vmem:[#allocation16_spill] sm:$0xff] %v4980_v29  ;;  %v7134_v29 = vrot.slane %v4866_v11, 2 }
  0x6c   : > { %7111 = vst [vmem:[#allocation5_spill] sm:$0xff] %v4893_v30  ;;  %v4929_v40 = vmul.f32 %v4838_v47, %v1053_v31  ;;  %v4936_v52 = vmul.f32 %v4852_v63, %v1053_v31  ;;  %v4939_v53 = vmul.f32 %v4868_v12, %v1053_v31  ;;  %v4983_v31 = vmul.f32 %v4890_v28, %v1054_v1 }
  0x6d   : > { %7129 = vst [vmem:[#allocation23_spill] sm:$0xff] %v5017_v22 }
  0x6e   : > { %4313 = vmatmul.mubr.msk.f32.gmra.mxu0 %vm474_vm1, %v4604_v32  ;;  %v4896_v32 = vmul.f32 %v4842_v51, %v1042_v21  ;;  %7113 = vst [vmem:[#allocation7_spill] sm:$0xff] %v4929_v40  ;;  %7114 = vst [vmem:[#allocation8_spill] sm:$0xff] %v4936_v52  ;;  %v4977_v21 = vmul.f32 %v4842_v51, %v1054_v1  ;;  %v4995_v1 = vmul.f32 %v4838_v47, %v1061_v16 }
  0x6f   : > { %7115 = vst [vmem:[#allocation9_spill] sm:$0xff] %v4939_v53  ;;  %7123 = vst [vmem:[#allocation17_spill] sm:$0xff] %v4983_v31 }
  0x70   : > { %7121 = vst [vmem:[#allocation15_spill] sm:$0xff] %v4977_v21  ;;  %7125 = vst [vmem:[#allocation19_spill] sm:$0xff] %v4995_v1 }
  0xd2   : > { %v4165_v54 = vpop.f32.mrf.mxu0 }
  0xd3   : > { %v808_v60 = vmul.f32 %v4165_v54, %v4921_v42 }
  0xd4   : > { %v641_v2 = vpop.f32.mrf.mxu0  ;;  %v4189_v18 = vpop.f32.mrf.mxu1 }
  0xd5   : > { %v847_v8 = vadd.f32 %v4944_v55, %v808_v60  ;;  %v807_v10 = vmul.f32 %v4921_v42, %v641_v2  ;;  %v824_v2 = vmul.f32 %v4189_v18, %v4921_v42 }
  0xd6   : > { %v4168_v17 = vpop.f32.mrf.mxu0  ;;  %v721_v13 = vpop.f32.mrf.mxu1 }
  0xd7   : > { %v879_v48 = vmax.f32 %v847_v8, 0.0  ;;  %v846_v54 = vadd.f32 %v4944_v55, %v807_v10  ;;  %v810_v60 = vmul.f32 %v4168_v17, %v4921_v42  ;;  %v863_v18 = vadd.f32 %v4944_v55, %v824_v2 }
  0xd8   : > { %v651_v4 = vpop.f32.mrf.mxu0  ;;  %v823_v50 = vmul.f32 %v4921_v42, %v721_v13  ;;  %v4192_v44 = vpop.f32.mrf.mxu1 }
  0xd9   : > { %985 = vst.msk [vmem:[#allocation2 + $0x30] sm:$0xff] %vm910_vm2, %v879_v48  ;;  %v878_v8 = vmax.f32 %v846_v54, 0.0  ;;  %v849_v10 = vadd.f32 %v4944_v55, %v810_v60  ;;  %v809_v17 = vmul.f32 %v4921_v42, %v651_v4  ;;  %v895_v60 = vmax.f32 %v863_v18, 0.0 }
  0xda   : > { %v4171_v41 = vpop.f32.mrf.mxu0  ;;  %v862_v13 = vadd.f32 %v4944_v55, %v823_v50  ;;  %v826_v45 = vmul.f32 %v4192_v44, %v4921_v42  ;;  %v731_v23 = vpop.f32.mrf.mxu1 }
  0xdb   : > { %984 = vst.msk [vmem:[#allocation2 + $0x28] sm:$0xff] %vm910_vm2, %v878_v8  ;;  %v881_v48 = vmax.f32 %v849_v10, 0.0  ;;  %v848_v4 = vadd.f32 %v4944_v55, %v809_v17  ;;  %v812_v54 = vmul.f32 %v4171_v41, %v4921_v42  ;;  %1009 = vst.msk [vmem:[#allocation2 + $0x130] sm:$0xff] %vm910_vm2, %v895_v60  ;;  %v825_v50 = vmul.f32 %v4921_v42, %v731_v23 }
  0xdc   : > { %v661_v2 = vpop.f32.mrf.mxu0  ;;  %v894_v44 = vmax.f32 %v862_v13, 0.0  ;;  %v865_v18 = vadd.f32 %v4944_v55, %v826_v45  ;;  %v5032_v60 = vmul.f32 %v4842_v51, %v1062_v59 }
  0xdd   : > { %988 = vst.msk [vmem:[#allocation2 + $0x50] sm:$0xff] %vm910_vm2, %v881_v48  ;;  %v880_v8 = vmax.f32 %v848_v4, 0.0  ;;  %v851_v10 = vadd.f32 %v4944_v55, %v812_v54  ;;  %v811_v41 = vmul.f32 %v4921_v42, %v661_v2  ;;  %v4195_v2 = vpop.f32.mrf.mxu1  ;;  %v5036_v13 = vadd.f32 %v4944_v55, %v825_v50 }
  0xde   : > { %v4174_v17 = vpop.f32.mrf.mxu0  ;;  %7130 = vst [vmem:[#allocation24_spill] sm:$0xff] %v5032_v60  ;;  %1008 = vst.msk [vmem:[#allocation2 + $0x128] sm:$0xff] %vm910_vm2, %v894_v44  ;;  %v897_v45 = vmax.f32 %v865_v18, 0.0  ;;  %v5039_v15 = vmul.f32 %v4195_v2, %v4921_v42 }
  0xdf   : > { %987 = vst.msk [vmem:[#allocation2 + $0x48] sm:$0xff] %vm910_vm2, %v880_v8  ;;  %v883_v48 = vmax.f32 %v851_v10, 0.0  ;;  %v850_v4 = vadd.f32 %v4944_v55, %v811_v41  ;;  %v814_v54 = vmul.f32 %v4174_v17, %v4921_v42  ;;  %v5042_v8 = vmul.f32 %v4859_v7, %v1062_v59 }
  0xe0   : > { %v1040_v23 = vld [vmem:[#allocation2 + $0x30] sm:$0xff]  ;;  %v671_v1 = vpop.f32.mrf.mxu0  ;;  %1012 = vst.msk [vmem:[#allocation2 + $0x150] sm:$0xff] %vm910_vm2, %v897_v45 }
  0xe1   : > { %7131 = vst [vmem:[#allocation25_spill] sm:$0xff] %v5042_v8  ;;  %v1115_v10 = vmul.f32 %v4842_v51, %v1040_v23  ;;  %v1213_v41 = vmul.f32 %v4834_v43, %v1040_v23  ;;  %v1427_v17 = vmul.f32 %v4838_v47, %v1040_v23  ;;  %v1702_v16 = vmul.f32 %v4859_v7, %v1040_v23 }
  0xe2   : > { %991 = vst.msk [vmem:[#allocation2 + $0x70] sm:$0xff] %vm910_vm2, %v883_v48  ;;  %v5050_v44 = vmul.f32 %v4875_v20, %v1040_v23  ;;  %v5053_v50 = vmul.f32 %v4852_v63, %v1040_v23  ;;  %v1039_v18 = vld [vmem:[#allocation2 + $0x28] sm:$0xff]  ;;  %v882_v2 = vmax.f32 %v850_v4, 0.0  ;;  %v853_v59 = vadd.f32 %v4944_v55, %v814_v54  ;;  %v4177_v8 = vpop.f32.mrf.mxu0  ;;  %v5059_v48 = vpop.f32.mrf.mxu1 }
  0xe3   : > { %v1279_v61 = vrot.slane %v1213_v41, 1  ;;  %v1526_v14 = vrot.slane %v1427_v17, 2  ;;  %v1750_v60 = vadd.f32 %v1702_v16, %v4872_v19  ;;  %v1114_v57 = vmul.f32 %v4842_v51, %v1039_v18 }
  0xe4   : > { %v1212_v40 = vmul.f32 %v4834_v43, %v1039_v18  ;;  %v1426_v4 = vmul.f32 %v4838_v47, %v1039_v18  ;;  %990 = vst.msk [vmem:[#allocation2 + $0x68] sm:$0xff] %vm910_vm2, %v882_v2  ;;  %v681_v54 = vpop.f32.mrf.mxu0  ;;  %v7132_v41 = vrot.slane %v4862_v9, 2  ;;  %v1701_v16 = vmul.f32 %v4859_v7, %v1039_v18  ;;  %v5073_v5 = vld [vmem:[#allocation2 + $0x50] sm:$0xff] }
  0xe5   : > { %v1376_v45 = vadd.f32 %v1279_v61, %v1115_v10  ;;  %v5071_v17 = vmul.f32 %v4875_v20, %v1039_v18  ;;  %v7133_v23 = vrot.slane %v5050_v44, 1  ;;  %v7135_v2 = vrot.slane %v5053_v50, 2 }
  0xe6   : > { %v1529_v19 = vsel %vm1519_vm4, %v1526_v14, %v7132_v41  ;;  %v1278_v9 = vrot.slane %v1212_v40, 1  ;;  %v1525_v41 = vrot.slane %v1426_v4, 2  ;;  %v4180_v58 = vpop.f32.mrf.mxu0  ;;  %v5089_v52 = vadd.f32 %v1701_v16, %v4888_v27 }
  0xe7   : > { %v5077_v22 = vadd.f32 %v7133_v23, %v1750_v60  ;;  %v5084_v10 = vsel %vm1519_vm4, %v7135_v2, %v7134_v29  ;;  %v5086_v6 = vadd.f32 %v1529_v19, %v1376_v45  ;;  %v5093_v60 = vmul.f32 %v4852_v63, %v1039_v18  ;;  %v5095_v23 = vpop.f32.mrf.mxu1 }
  0xe8   : > { %v1280_v11 = vsel %vm1274_vm3, %v1278_v9, %v1279_v61  ;;  %v1374_v29 = vadd.f32 %v1278_v9, %v4886_v26  ;;  %v1527_v40 = vsel %vm1519_vm4, %v1525_v41, %v1526_v14  ;;  %v5102_v4 = vmul.f32 %v4834_v43, %v5073_v5  ;;  %v691_v27 = vpop.f32.mrf.mxu0  ;;  %v1072_v26 = vld [vmem:[#allocation2 + $0x130] sm:$0xff] }
  0xe9   : > { %v5104_v45 = vld [vmem:[#allocation2 + $0x70] sm:$0xff]  ;;  %v1375_v19 = vadd.f32 %v1280_v11, %v1114_v57  ;;  %v5109_v18 = vmul.f32 %v4838_v47, %v5073_v5  ;;  %v885_v57 = vmax.f32 %v853_v59, 0.0  ;;  %v813_v31 = vmul.f32 %v4921_v42, %v671_v1  ;;  %v751_v21 = vpop.f32.mrf.mxu1 }
  0xea   : > { %v5113_v61 = vmul.f32 %v4834_v43, %v5104_v45  ;;  %v5115_v14 = vadd.f32 %v1525_v41, %v1374_v29  ;;  %v5120_v9 = vmul.f32 %v4838_v47, %v5104_v45  ;;  %v4183_v11 = vpop.f32.mrf.mxu0  ;;  %v816_v0 = vmul.f32 %v4177_v8, %v4921_v42 }
  0xeb   : > { %v5122_v16 = vadd.f32 %v1527_v40, %v1375_v19  ;;  %994 = vst.msk [vmem:[#allocation2 + $0x90] sm:$0xff] %vm910_vm2, %v885_v57  ;;  %v815_v41 = vmul.f32 %v4921_v42, %v681_v54  ;;  %v818_v29 = vmul.f32 %v4180_v58, %v4921_v42  ;;  %v817_v2 = vmul.f32 %v4921_v42, %v691_v27  ;;  %v1076_v57 = vld [vmem:[#allocation2 + $0x150] sm:$0xff] }
  0xec   : > { %7136 = vst [vmem:[#allocation26_spill] sm:$0xff] %v5113_v61  ;;  %7137 = vst [vmem:[#allocation27_spill] sm:$0xff] %v5120_v9  ;;  %v5132_v59 = vmul.f32 %v4834_v43, %v1072_v26  ;;  %v701_v40 = vpop.f32.mrf.mxu0  ;;  %v852_v19 = vadd.f32 %v4944_v55, %v813_v31  ;;  %v855_v30 = vadd.f32 %v4944_v55, %v816_v0 }
  0xed   : > { %v5137_v1 = vmul.f32 %v4838_v47, %v1072_v26  ;;  %v820_v8 = vmul.f32 %v4183_v11, %v4921_v42  ;;  %v854_v54 = vadd.f32 %v4944_v55, %v815_v41  ;;  %v857_v58 = vadd.f32 %v4944_v55, %v818_v29  ;;  %v4201_v26 = vpop.f32.mrf.mxu1 }
  0xee   : > { %7138 = vst [vmem:[#allocation28_spill] sm:$0xff] %v5132_v59  ;;  %v856_v27 = vadd.f32 %v4944_v55, %v817_v2  ;;  %v4186_v61 = vpop.f32.mrf.mxu0  ;;  %v884_v53 = vmax.f32 %v852_v19, 0.0  ;;  %v887_v35 = vmax.f32 %v855_v30, 0.0  ;;  %v819_v0 = vmul.f32 %v4921_v42, %v701_v40 }
  0xef   : > { %7139 = vst [vmem:[#allocation29_spill] sm:$0xff] %v5137_v1  ;;  %v859_v31 = vadd.f32 %v4944_v55, %v820_v8  ;;  %v886_v1 = vmax.f32 %v854_v54, 0.0  ;;  %v889_v24 = vmax.f32 %v857_v58, 0.0  ;;  %v5147_v3 = vmul.f32 %v4834_v43, %v1076_v57  ;;  %v761_v58 = vpop.f32.mrf.mxu1 }
  0xf0   : > { %v888_v11 = vmax.f32 %v856_v27, 0.0  ;;  %v711_v41 = vpop.f32.mrf.mxu0  ;;  %993 = vst.msk [vmem:[#allocation2 + $0x88] sm:$0xff] %vm910_vm2, %v884_v53  ;;  %997 = vst.msk [vmem:[#allocation2 + $0xb0] sm:$0xff] %vm910_vm2, %v887_v35  ;;  %v858_v29 = vadd.f32 %v4944_v55, %v819_v0  ;;  %v5153_v30 = vmul.f32 %v4838_v47, %v1076_v57  ;;  %v822_v40 = vmul.f32 %v4186_v61, %v4921_v42  ;;  %v5182_v0 = vld [vmem:[#allocation2 + $0x48] sm:$0xff] }
  0xf1   : > { %7140 = vst [vmem:[#allocation30_spill] sm:$0xff] %v5147_v3  ;;  %v891_v2 = vmax.f32 %v859_v31, 0.0  ;;  %996 = vst.msk [vmem:[#allocation2 + $0xa8] sm:$0xff] %vm910_vm2, %v886_v1  ;;  %v896_v53 = vmax.f32 %v5036_v13, 0.0  ;;  %v821_v35 = vmul.f32 %v4921_v42, %v711_v41  ;;  %v867_v8 = vadd.f32 %v4944_v55, %v5039_v15 }
  0xf2   : > { %7141 = vst [vmem:[#allocation31_spill] sm:$0xff] %v5153_v30  ;;  %1000 = vst.msk [vmem:[#allocation2 + $0xd0] sm:$0xff] %vm910_vm2, %v889_v24  ;;  %v5164_v54 = vld [vmem:[#allocation2 + $0x90] sm:$0xff]  ;;  %v890_v61 = vmax.f32 %v858_v29, 0.0  ;;  %v861_v1 = vadd.f32 %v4944_v55, %v822_v40  ;;  %v827_v24 = vmul.f32 %v4921_v42, %v5059_v48  ;;  %v830_v57 = vmul.f32 %v5095_v23, %v4921_v42 }
  0xf3   : > { %999 = vst.msk [vmem:[#allocation2 + $0xc8] sm:$0xff] %vm910_vm2, %v888_v11  ;;  %1003 = vst.msk [vmem:[#allocation2 + $0xf0] sm:$0xff] %vm910_vm2, %v891_v2  ;;  %v5174_v13 = vmul.f32 %v4834_v43, %v5164_v54  ;;  %v5178_v15 = vmul.f32 %v4838_v47, %v5164_v54  ;;  %v860_v27 = vadd.f32 %v4944_v55, %v821_v35  ;;  %v899_v31 = vmax.f32 %v867_v8, 0.0  ;;  %v4204_v35 = vpop.f32.mrf.mxu1 }
  0xf4   : > { %1011 = vst.msk [vmem:[#allocation2 + $0x148] sm:$0xff] %vm910_vm2, %v896_v53  ;;  %1002 = vst.msk [vmem:[#allocation2 + $0xe8] sm:$0xff] %vm910_vm2, %v890_v61  ;;  %v893_v48 = vmax.f32 %v861_v1, 0.0  ;;  %v866_v23 = vadd.f32 %v4944_v55, %v827_v24  ;;  %v869_v11 = vadd.f32 %v4944_v55, %v830_v57  ;;  %v829_v41 = vmul.f32 %v4921_v42, %v751_v21 }
  0xf5   : > { %v892_v29 = vmax.f32 %v860_v27, 0.0  ;;  %1015 = vst.msk [vmem:[#allocation2 + $0x170] sm:$0xff] %vm910_vm2, %v899_v31  ;;  %v832_v40 = vmul.f32 %v4201_v26, %v4921_v42  ;;  %v831_v53 = vmul.f32 %v4921_v42, %v761_v58  ;;  %v834_v24 = vmul.f32 %v4204_v35, %v4921_v42 }
  0xf6   : > { %1006 = vst.msk [vmem:[#allocation2 + $0x110] sm:$0xff] %vm910_vm2, %v893_v48  ;;  %v898_v8 = vmax.f32 %v866_v23, 0.0  ;;  %v901_v61 = vmax.f32 %v869_v11, 0.0  ;;  %v868_v1 = vadd.f32 %v4944_v55, %v829_v41  ;;  %v5202_v26 = vmul.f32 %v4834_v43, %v5182_v0 }
  0xf7   : > { %v5195_v57 = vld [vmem:[#allocation2 + $0xb0] sm:$0xff]  ;;  %1005 = vst.msk [vmem:[#allocation2 + $0x108] sm:$0xff] %vm910_vm2, %v892_v29  ;;  %v871_v21 = vadd.f32 %v4944_v55, %v832_v40  ;;  %v870_v27 = vadd.f32 %v4944_v55, %v831_v53  ;;  %v7142_v58 = vrot.slane %v5050_v44, 1  ;;  %v7143_v31 = vrot.slane %v5071_v17, 1 }
  0xf8   : > { %v5211_v23 = vmul.f32 %v4834_v43, %v5195_v57  ;;  %v5215_v11 = vmul.f32 %v4838_v47, %v5195_v57  ;;  %1014 = vst.msk [vmem:[#allocation2 + $0x168] sm:$0xff] %vm910_vm2, %v898_v8  ;;  %1018 = vst.msk [vmem:[#allocation2 + $0x190] sm:$0xff] %vm910_vm2, %v901_v61  ;;  %v900_v29 = vmax.f32 %v868_v1, 0.0  ;;  %v873_v44 = vadd.f32 %v4944_v55, %v834_v24 }
  0xf9   : > { %v1866_v48 = vsel %vm1274_vm3, %v7143_v31, %v7142_v58  ;;  %v5217_v41 = vld [vmem:[#allocation2 + $0xd0] sm:$0xff]  ;;  %v903_v58 = vmax.f32 %v871_v21, 0.0  ;;  %v902_v31 = vmax.f32 %v870_v27, 0.0  ;;  %v7080_v21 = vrot.slane %v5202_v26, 1 }
  0xfa   : > { %v5224_v40 = vmul.f32 %v4834_v43, %v5217_v41  ;;  %v5228_v53 = vmul.f32 %v4838_v47, %v5217_v41  ;;  %v5230_v35 = vld [vmem:[#allocation2 + $0xf0] sm:$0xff]  ;;  %1017 = vst.msk [vmem:[#allocation2 + $0x188] sm:$0xff] %vm910_vm2, %v900_v29  ;;  %v905_v1 = vmax.f32 %v873_v44, 0.0  ;;  %v7144_v27 = vrot.slane %v5071_v17, 1 }
  0xfb   : > { %v5235_v8 = vmul.f32 %v4834_v43, %v5230_v35  ;;  %v5239_v61 = vmul.f32 %v4838_v47, %v5230_v35  ;;  %1021 = vst.msk [vmem:[#allocation2 + $0x1b0] sm:$0xff] %vm910_vm2, %v903_v58  ;;  %1020 = vst.msk [vmem:[#allocation2 + $0x1a8] sm:$0xff] %vm910_vm2, %v902_v31  ;;  %v1961_v19 = vadd.f32 %v1866_v48, %v5089_v52  ;;  %v7145_v29 = vrot.slane %v5053_v50, 2 }
  0xfc   : > { %v1960_v9 = vadd.f32 %v7144_v27, %v4898_v33  ;;  %v1080_v30 = vld [vmem:[#allocation2 + $0x170] sm:$0xff]  ;;  %1024 = vst.msk [vmem:[#allocation2 + $0x1d0] sm:$0xff] %vm910_vm2, %v905_v1  ;;  %v7146_v44 = vrot.slane %v5093_v60, 2  ;;  %v2289_v31 = vmul.f32 %v4890_v28, %v5182_v0  ;;  %v2388_v17 = vmul.f32 %v4913_v38, %v5182_v0 }
  0xfd   : > { %v1068_v33 = vld [vmem:[#allocation2 + $0x110] sm:$0xff]  ;;  %v5262_v52 = vmul.f32 %v4834_v43, %v1080_v30  ;;  %v5265_v48 = vmul.f32 %v4838_v47, %v1080_v30  ;;  %v5270_v50 = vadd.f32 %v7080_v21, %v4896_v32  ;;  %v2389_v24 = vmul.f32 %v4913_v38, %v5073_v5 }
  0xfe   : > { %v2110_v58 = vsel %vm1519_vm4, %v7146_v44, %v7145_v29  ;;  %v7149_v1 = vmov %v7146_v44  ;;  %v5275_v29 = vmul.f32 %v4834_v43, %v1068_v33  ;;  %v5278_v44 = vmul.f32 %v4838_v47, %v1068_v33 }
  0xff   : > { %7147 = vst [vmem:[#allocation32_spill] sm:$0xff] %v5262_v52  ;;  %7148 = vst [vmem:[#allocation33_spill] sm:$0xff] %v5265_v48  ;;  %v2236_v27 = vadd.f32 %v7149_v1, %v1960_v9  ;;  %v2237_v2 = vadd.f32 %v2110_v58, %v1961_v19  ;;  %v1084_v48 = vld [vmem:[#allocation2 + $0x190] sm:$0xff]  ;;  %v2452_v32 = vrot.slane %v2388_v17, 1  ;;  %v2600_v60 = vmul.f32 %v4868_v12, %v5182_v0  ;;  %v771_v9 = vpop.f32.mrf.mxu1  ;;  %v5308_v17 = vld [vmem:[#allocation2 + $0x68] sm:$0xff] }
 0x100   : > { %7150 = vst [vmem:[#allocation34_spill] sm:$0xff] %v5275_v29  ;;  %7151 = vst [vmem:[#allocation35_spill] sm:$0xff] %v5278_v44  ;;  %v5288_v21 = vmul.f32 %v4834_v43, %v1084_v48  ;;  %v5291_v19 = vmul.f32 %v4838_v47, %v1084_v48  ;;  %v2453_v33 = vrot.slane %v2389_v24, 1  ;;  %v2601_v30 = vmul.f32 %v4868_v12, %v5073_v5 }
 0x101   : > { %v2336_v3 = vadd.f32 %v4910_v37, %v2236_v27  ;;  %v2337_v58 = vadd.f32 %v2289_v31, %v2237_v2  ;;  %v2696_v37 = vrot.slane %v2600_v60, 2  ;;  %v833_v52 = vmul.f32 %v4921_v42, %v771_v9 }
 0x102   : > { %7152 = vst [vmem:[#allocation36_spill] sm:$0xff] %v5288_v21  ;;  %7153 = vst [vmem:[#allocation37_spill] sm:$0xff] %v5291_v19  ;;  %v1088_v27 = vld [vmem:[#allocation2 + $0x1b0] sm:$0xff]  ;;  %v2238_v1 = vadd.f32 %v5084_v10, %v5077_v22  ;;  %v2290_v48 = vmul.f32 %v4890_v28, %v5073_v5  ;;  %v2454_v31 = vsel %vm1274_vm3, %v2452_v32, %v2453_v33  ;;  %v2697_v60 = vrot.slane %v2601_v30, 2 }
 0x103   : > { %v2548_v59 = vadd.f32 %v2452_v32, %v2336_v3  ;;  %v5302_v2 = vmul.f32 %v4834_v43, %v1088_v27  ;;  %v5305_v3 = vmul.f32 %v4838_v47, %v1088_v27  ;;  %v1092_v24 = vld [vmem:[#allocation2 + $0x1d0] sm:$0xff]  ;;  %v2549_v10 = vadd.f32 %v2454_v31, %v2337_v58  ;;  %v5321_v27 = vld [vmem:[%s7055_s5] ss:$0 sm:$0xff]  ;;  %v4207_v31 = vpop.f32.mrf.mxu1 }
 0x104   : > { %v5311_v9 = vmul.f32 %v4834_v43, %v1092_v24  ;;  %v5314_v22 = vmul.f32 %v4838_v47, %v1092_v24  ;;  %v2698_v44 = vsel %vm1519_vm4, %v2696_v37, %v2697_v60  ;;  %v872_v30 = vadd.f32 %v4944_v55, %v833_v52 }
 0x105   : > { %7154 = vst [vmem:[#allocation38_spill] sm:$0xff] %v5302_v2  ;;  %7155 = vst [vmem:[#allocation39_spill] sm:$0xff] %v5305_v3  ;;  %v2824_v19 = vadd.f32 %v2696_v37, %v2548_v59  ;;  %v2338_v32 = vadd.f32 %v2290_v48, %v2238_v1  ;;  %v2825_v29 = vadd.f32 %v2698_v44, %v2549_v10  ;;  %v7158_v58 = vrot.slane %v4883_v25, 2  ;;  %v5332_v37 = vld [vmem:[%s7056_s6] ss:$0 sm:$0xff] }
 0x106   : > { %7156 = vst [vmem:[#allocation40_spill] sm:$0xff] %v5311_v9  ;;  %7157 = vst [vmem:[#allocation41_spill] sm:$0xff] %v5314_v22  ;;  %v904_v21 = vmax.f32 %v872_v30, 0.0  ;;  %v836_v52 = vmul.f32 %v4207_v31, %v4921_v42  ;;  %v5337_v44 = vmul.f32 %v4834_v43, %v5308_v17  ;;  %v1751_v48 = vadd.f32 %v4907_v36, %v5115_v14 }
 0x107   : > { %v2879_v24 = vmul.f32 %v5321_v27, %v2824_v19  ;;  %v2700_v59 = vsel %vm1519_vm4, %v2697_v60, %v7158_v58  ;;  %v2550_v22 = vadd.f32 %v2453_v33, %v2338_v32  ;;  %v2880_v1 = vmul.f32 %v5321_v27, %v2825_v29 }
 0x108   : > { %v1704_v19 = vmul.f32 %v4859_v7, %v5182_v0  ;;  %1023 = vst.msk [vmem:[#allocation2 + $0x1c8] sm:$0xff] %vm910_vm2, %v904_v21  ;;  %v875_v33 = vadd.f32 %v4944_v55, %v836_v52  ;;  %v7091_v10 = vrot.slane %v5337_v44, 1  ;;  %v1802_v30 = vmul.f32 %v4875_v20, %v5182_v0 }
 0x109   : > { %v2934_v25 = vadd.f32 %v5332_v37, %v2879_v24  ;;  %v2826_v60 = vadd.f32 %v2700_v59, %v2550_v22  ;;  %v2935_v29 = vadd.f32 %v5332_v37, %v2880_v1  ;;  %v1803_v58 = vmul.f32 %v4875_v20, %v5073_v5 }
 0x10a   : > { %v1752_v24 = vadd.f32 %v1704_v19, %v5122_v16  ;;  %v907_v14 = vmax.f32 %v875_v33, 0.0  ;;  %v5358_v21 = vadd.f32 %v7091_v10, %v4926_v46  ;;  %v1867_v22 = vrot.slane %v1802_v30, 1 }
 0x10b   : > { %v2982_v32 = vmax.f32 %v2934_v25, 0.0  ;;  %v2881_v36 = vmul.f32 %v5321_v27, %v2826_v60  ;;  %v2983_v59 = vmax.f32 %v2935_v29, 0.0  ;;  %v1868_v31 = vrot.slane %v1803_v58, 1 }
 0x10c   : > { %v2015_v52 = vmul.f32 %v4852_v63, %v5182_v0  ;;  %v2016_v16 = vmul.f32 %v4852_v63, %v5073_v5  ;;  %1027 = vst.msk [vmem:[#allocation2 + $0x1f0] sm:$0xff] %vm910_vm2, %v907_v14  ;;  %v1963_v25 = vadd.f32 %v1867_v22, %v1751_v48  ;;  %v2292_v46 = vmul.f32 %v4890_v28, %v5308_v17 }
 0x10d   : > { %3031 = vst.msk [vmem:[#allocation3 - $0x7] sm:$0x80] %vm3030_vm5, %v2982_v32  ;;  %v2936_v1 = vadd.f32 %v5332_v37, %v2881_v36  ;;  %v2390_v19 = vmul.f32 %v4913_v38, %v5308_v17  ;;  %v1869_v60 = vsel %vm1274_vm3, %v1867_v22, %v1868_v31  ;;  %v2391_v29 = vmul.f32 %v4913_v38, %v5104_v45  ;;  %v781_v32 = vpop.f32.mrf.mxu1 }
 0x10e   : > { %3032 = vst.msk [vmem:[#allocation3 + $0x1] sm:$0xff] %vm910_vm2, %v2983_v59  ;;  %v2113_v33 = vrot.slane %v2015_v52, 2  ;;  %v2114_v30 = vrot.slane %v2016_v16, 2  ;;  %v1964_v36 = vadd.f32 %v1869_v60, %v1752_v24  ;;  %v2603_v48 = vmul.f32 %v4868_v12, %v5308_v17 }
 0x10f   : > { %v2984_v58 = vmax.f32 %v2936_v1, 0.0  ;;  %v2455_v14 = vrot.slane %v2390_v19, 1  ;;  %v2456_v9 = vrot.slane %v2391_v29, 1  ;;  %v2604_v59 = vmul.f32 %v4868_v12, %v5104_v45  ;;  %v5389_v29 = vld [vmem:[#allocation2 + $0x88] sm:$0xff] }
 0x110   : > { %v2115_v3 = vsel %vm1519_vm4, %v2113_v33, %v2114_v30  ;;  %v2239_v10 = vadd.f32 %v2113_v33, %v1963_v25  ;;  %v2701_v52 = vrot.slane %v2603_v48, 2  ;;  %v835_v16 = vmul.f32 %v4921_v42, %v781_v32 }
 0x111   : > { %3034 = vst.msk [vmem:[#allocation3 + $0x9] sm:$0x7f] %vm3033_vm6, %v2984_v58  ;;  %v2240_v22 = vadd.f32 %v2115_v3, %v1964_v36  ;;  %v1705_v24 = vmul.f32 %v4859_v7, %v5073_v5  ;;  %v2457_v19 = vsel %vm1274_vm3, %v2455_v14, %v2456_v9  ;;  %v2702_v60 = vrot.slane %v2604_v59, 2 }
 0x112   : > { %v2339_v1 = vadd.f32 %v4947_v56, %v2239_v10  ;;  %v7159_v25 = vrot.slane %v4901_v34, 2  ;;  %v874_v3 = vadd.f32 %v4944_v55, %v835_v16  ;;  %v2293_v32 = vmul.f32 %v4890_v28, %v5104_v45 }
 0x113   : > { %v2340_v2 = vadd.f32 %v2292_v46, %v2240_v22  ;;  %v1753_v58 = vadd.f32 %v1705_v24, %v5086_v6  ;;  %v5395_v36 = vld [vmem:[#allocation2 + $0x1f0] sm:$0xff]  ;;  %v2703_v10 = vsel %vm1519_vm4, %v2701_v52, %v2702_v60  ;;  %v7160_v48 = vrot.slane %v4916_v39, 2 }
 0x114   : > { %v2117_v33 = vsel %vm1519_vm4, %v2114_v30, %v7159_v25  ;;  %v2551_v56 = vadd.f32 %v2455_v14, %v2339_v1  ;;  %v1117_v30 = vmul.f32 %v4842_v51, %v5182_v0  ;;  %v5405_v59 = vmul.f32 %v4834_v43, %v5395_v36 }
 0x115   : > { %v2705_v34 = vsel %vm1519_vm4, %v2702_v60, %v7160_v48  ;;  %v3080_v46 = vld [vmem:[#allocation3] sm:$0xff]  ;;  %v2552_v6 = vadd.f32 %v2457_v19, %v2340_v2  ;;  %v906_v22 = vmax.f32 %v874_v3, 0.0  ;;  %v1965_v16 = vadd.f32 %v1868_v31, %v1753_v58 }
 0x116   : > { %7161 = vst [vmem:[#allocation42_spill] sm:$0xff] %v5405_v59  ;;  %4217 = vmatprep.mubr.msk.f32.mxu1 %vm910_vm2, %v3080_v46  ;;  %v2827_v14 = vadd.f32 %v2701_v52, %v2551_v56  ;;  %v5410_v24 = vmul.f32 %v4834_v43, %v5389_v29  ;;  %v7162_v39 = vrot.slane %v5102_v4, 1  ;;  %v7163_v1 = vrot.slane %v5202_v26, 1 }
 0x117   : > { %v1429_v25 = vmul.f32 %v4838_v47, %v5182_v0  ;;  %v2828_v48 = vadd.f32 %v2703_v10, %v2552_v6  ;;  %1026 = vst.msk [vmem:[#allocation2 + $0x1e8] sm:$0xff] %vm910_vm2, %v906_v22  ;;  %v2241_v2 = vadd.f32 %v2117_v33, %v1965_v16  ;;  %v7098_v52 = vrot.slane %v5109_v18, 2 }
 0x118   : > { %v1283_v60 = vsel %vm1274_vm3, %v7163_v1, %v7162_v39  ;;  %v3081_v19 = vld [vmem:[#allocation3 + $0x8] sm:$0xff]  ;;  %v2882_v3 = vmul.f32 %v5321_v27, %v2827_v14  ;;  %v7096_v58 = vrot.slane %v5410_v24, 1  ;;  %v1707_v26 = vmul.f32 %v4859_v7, %v5308_v17 }
 0x119   : > { %v1378_v31 = vadd.f32 %v1283_v60, %v1117_v30  ;;  %v1530_v56 = vrot.slane %v1429_v25, 2  ;;  %4218 = vmatmul.mubr.msk.f32.vlgmr.msra.gmra.mxu1 %vm910_vm2, %v3081_v19  ;;  %v2883_v0 = vmul.f32 %v5321_v27, %v2828_v48  ;;  %v2341_v10 = vadd.f32 %v2293_v32, %v2241_v2 }
 0x11a   : > { %v1804_v33 = vmul.f32 %v4875_v20, %v5308_v17  ;;  %v5431_v30 = vmul.f32 %v4875_v20, %v5104_v45  ;;  %v2937_v46 = vadd.f32 %v5332_v37, %v2882_v3  ;;  %v5437_v6 = vadd.f32 %v7096_v58, %v4957_v62 }
 0x11b   : > { %v1532_v22 = vsel %vm1519_vm4, %v1530_v56, %v7098_v52  ;;  %v1654_v32 = vadd.f32 %v1530_v56, %v5270_v50  ;;  %v2938_v16 = vadd.f32 %v5332_v37, %v2883_v0  ;;  %v2553_v14 = vadd.f32 %v2456_v9, %v2341_v10 }
 0x11c   : > { %v1655_v39 = vadd.f32 %v1532_v22, %v1378_v31  ;;  %v1870_v1 = vrot.slane %v1804_v33, 1  ;;  %v2985_v60 = vmax.f32 %v2937_v46, 0.0  ;;  %v7097_v48 = vrot.slane %v5431_v30, 1 }
 0x11d   : > { %v1754_v25 = vadd.f32 %v4932_v49, %v1654_v32  ;;  %v2018_v62 = vmul.f32 %v4852_v63, %v5308_v17  ;;  %v2986_v2 = vmax.f32 %v2938_v16, 0.0  ;;  %v2829_v19 = vadd.f32 %v2705_v34, %v2553_v14  ;;  %v4210_v16 = vpop.f32.mrf.mxu1 }
 0x11e   : > { %v1755_v3 = vadd.f32 %v1707_v26, %v1655_v39  ;;  %v2019_v58 = vmul.f32 %v4852_v63, %v5104_v45  ;;  %3035 = vst.msk [vmem:[#allocation3 + $0x9] sm:$0x80] %vm3030_vm5, %v2985_v60  ;;  %v1095_v50 = vld [vmem:[#allocation2 + $0x1e8] sm:$0xff]  ;;  %v1872_v9 = vsel %vm1274_vm3, %v1870_v1, %v7097_v48  ;;  %v2295_v56 = vmul.f32 %v4890_v28, %v5389_v29 }
 0x11f   : > { %v1966_v31 = vadd.f32 %v1870_v1, %v1754_v25  ;;  %v2118_v49 = vrot.slane %v2018_v62, 2  ;;  %3036 = vst.msk [vmem:[#allocation3 + $0x11] sm:$0xff] %vm910_vm2, %v2986_v2  ;;  %v5458_v34 = vmul.f32 %v4834_v43, %v1095_v50  ;;  %v2884_v26 = vmul.f32 %v5321_v27, %v2829_v19  ;;  %v7164_v25 = vld [vmem:[#allocation12_spill] sm:$0xff] }
 0x120   : > { %v1967_v0 = vadd.f32 %v1872_v9, %v1755_v3  ;;  %v2119_v10 = vrot.slane %v2019_v58, 2  ;;  %v2392_v46 = vmul.f32 %v4913_v38, %v5389_v29  ;;  %v5465_v22 = vmul.f32 %v4913_v38, %v5164_v54 }
 0x121   : > { %v2242_v33 = vadd.f32 %v2118_v49, %v1966_v31  ;;  %v2606_v32 = vmul.f32 %v4868_v12, %v5389_v29  ;;  %v2939_v14 = vadd.f32 %v5332_v37, %v2884_v26  ;;  %v2607_v1 = vmul.f32 %v4868_v12, %v5164_v54 }
 0x122   : > { %v2120_v39 = vsel %vm1519_vm4, %v2118_v49, %v2119_v10  ;;  %v838_v58 = vmul.f32 %v4210_v16, %v4921_v42  ;;  %v2458_v2 = vrot.slane %v2392_v46, 1  ;;  %v7099_v19 = vrot.slane %v5465_v22, 1 }
 0x123   : > { %v2243_v60 = vadd.f32 %v2120_v39, %v1967_v0  ;;  %v2342_v62 = vadd.f32 %v7164_v25, %v2242_v33  ;;  %v2987_v3 = vmax.f32 %v2939_v14, 0.0  ;;  %v2706_v9 = vrot.slane %v2606_v32, 2  ;;  %v791_v0 = vpop.f32.mrf.mxu1  ;;  %v7165_v14 = vld [vmem:[#allocation4_spill] sm:$0xff] }
 0x124   : > { %v2707_v31 = vrot.slane %v2607_v1, 2  ;;  %v877_v48 = vadd.f32 %v4944_v55, %v838_v58  ;;  %v2460_v49 = vsel %vm1274_vm3, %v2458_v2, %v7099_v19  ;;  %v1118_v16 = vmul.f32 %v4842_v51, %v5073_v5 }
 0x125   : > { %v2343_v52 = vadd.f32 %v2295_v56, %v2243_v60  ;;  %v2554_v26 = vadd.f32 %v2458_v2, %v2342_v62  ;;  %3037 = vst.msk [vmem:[#allocation3 + $0x19] sm:$0x7f] %vm3033_vm6, %v2987_v3  ;;  %v7166_v32 = vrot.slane %v7165_v14, 2  ;;  %v7167_v39 = vrot.slane %v5109_v18, 2  ;;  %v7169_v2 = vld [vmem:[#allocation6_spill] sm:$0xff] }
 0x126   : > { %v2708_v33 = vsel %vm1519_vm4, %v2706_v9, %v2707_v31  ;;  %v909_v46 = vmax.f32 %v877_v48, 0.0  ;;  %v1708_v1 = vmul.f32 %v4859_v7, %v5104_v45  ;;  %v3082_v58 = vld [vmem:[#allocation3 + $0x10] sm:$0xff]  ;;  %v7168_v5 = vrot.slane %v5102_v4, 1  ;;  %v7171_v48 = vld [vmem:[#allocation9_spill] sm:$0xff] }
 0x127   : > { %v1534_v56 = vsel %vm1519_vm4, %v7167_v39, %v7166_v32  ;;  %v2555_v60 = vadd.f32 %v2460_v49, %v2343_v52  ;;  %v2830_v25 = vadd.f32 %v2706_v9, %v2554_v26  ;;  %v7170_v3 = vrot.slane %v7169_v2, 2  ;;  %4220 = vmatprep.mubr.msk.f32.mxu1 %vm910_vm2, %v3082_v58 }
 0x128   : > { %v1379_v62 = vadd.f32 %v7168_v5, %v1118_v16  ;;  %1030 = vst.msk [vmem:[#allocation2 + $0x210] sm:$0xff] %vm910_vm2, %v909_v46  ;;  %v2296_v18 = vmul.f32 %v4890_v28, %v5164_v54  ;;  %v7172_v14 = vrot.slane %v7171_v48, 2  ;;  %v837_v52 = vmul.f32 %v4921_v42, %v791_v0  ;;  %v5516_v42 = vld [vmem:[#allocation2 + $0xa8] sm:$0xff] }
 0x129   : > { %v2122_v19 = vsel %vm1519_vm4, %v2119_v10, %v7170_v3  ;;  %v1156_v4 = vmul.f32 %v4842_v51, %v1095_v50  ;;  %v2831_v9 = vadd.f32 %v2708_v33, %v2555_v60  ;;  %v2885_v49 = vmul.f32 %v5321_v27, %v2830_v25 }
 0x12a   : > { %v2710_v32 = vsel %vm1519_vm4, %v2707_v31, %v7172_v14  ;;  %v1656_v26 = vadd.f32 %v1534_v56, %v1379_v62  ;;  %v7103_v10 = vrot.slane %v5458_v34, 1  ;;  %v876_v16 = vadd.f32 %v4944_v55, %v837_v52  ;;  %v7175_v52 = vld [vmem:[#allocation26_spill] sm:$0xff] }
 0x12b   : > { %v7100_v46 = vrot.slane %v5405_v59, 1  ;;  %v5510_v39 = vmul.f32 %v4838_v47, %v1095_v50  ;;  %v5514_v31 = vmul.f32 %v4838_v47, %v5395_v36  ;;  %v2886_v0 = vmul.f32 %v5321_v27, %v2831_v9 }
 0x12c   : > { %v2940_v33 = vadd.f32 %v5332_v37, %v2885_v49  ;;  %v1756_v56 = vadd.f32 %v1708_v1, %v1656_v26  ;;  %v1120_v58 = vmul.f32 %v4842_v51, %v5308_v17  ;;  %v908_v55 = vmax.f32 %v876_v16, 0.0  ;;  %v3083_v25 = vld [vmem:[#allocation3 + $0x18] sm:$0xff] }
 0x12d   : > { %7173 = vst [vmem:[#allocation12_spill] sm:$0xff] %v5514_v31  ;;  %v1322_v50 = vsel %vm1274_vm3, %v7103_v10, %v7100_v46  ;;  %v7102_v36 = vrot.slane %v5510_v39, 2  ;;  %v7101_v60 = vrot.slane %v5514_v31, 2  ;;  %v2941_v5 = vadd.f32 %v5332_v37, %v2886_v0  ;;  %4221 = vmatmul.mubr.msk.f32.gmra.mxu1 %vm910_vm2, %v3083_v25  ;;  %v7182_v46 = vld [vmem:[#allocation11_spill] sm:$0xff] }
 0x12e   : > { %v2988_v62 = vmax.f32 %v2940_v33, 0.0  ;;  %v7174_v1 = vrot.slane %v5431_v30, 1  ;;  %v1417_v3 = vadd.f32 %v1322_v50, %v1156_v4  ;;  %1029 = vst.msk [vmem:[#allocation2 + $0x208] sm:$0xff] %vm910_vm2, %v908_v55  ;;  %v5541_v14 = vmul.f32 %v4834_v43, %v5516_v42 }
 0x12f   : > { %v1597_v48 = vsel %vm1519_vm4, %v7102_v36, %v7101_v60  ;;  %v7176_v9 = vrot.slane %v7175_v52, 1  ;;  %v7177_v30 = vrot.slane %v5337_v44, 1  ;;  %v1432_v49 = vmul.f32 %v4838_v47, %v5308_v17  ;;  %v1100_v16 = vld [vmem:[#allocation2 + $0x210] sm:$0xff] }
 0x130   : > { %v1968_v2 = vadd.f32 %v7174_v1, %v1756_v56  ;;  %v2989_v26 = vmax.f32 %v2941_v5, 0.0  ;;  %3038 = vst.msk [vmem:[#allocation3 + $0x19] sm:$0x80] %vm3030_vm5, %v2988_v62  ;;  %v1694_v33 = vadd.f32 %v1597_v48, %v1417_v3  ;;  %v5552_v55 = vmul.f32 %v4859_v7, %v1100_v16  ;;  %v7179_v62 = vld [vmem:[#allocation27_spill] sm:$0xff]  ;;  %v7184_v3 = vld [vmem:[#allocation17_spill] sm:$0xff] }
 0x131   : > { %v1286_v4 = vsel %vm1274_vm3, %v7177_v30, %v7176_v9  ;;  %v5555_v50 = vmul.f32 %v4875_v20, %v1100_v16  ;;  %v5558_v44 = vmul.f32 %v4852_v63, %v1100_v16  ;;  %v5561_v25 = vmul.f32 %v4913_v38, %v1100_v16 }
 0x132   : > { %v2244_v0 = vadd.f32 %v2122_v19, %v1968_v2  ;;  %v1381_v56 = vadd.f32 %v1286_v4, %v1120_v58  ;;  %7178 = vst [vmem:[#allocation4_spill] sm:$0xff] %v5552_v55  ;;  %3039 = vst.msk [vmem:[#allocation3 + $0x21] sm:$0xff] %vm910_vm2, %v2989_v26  ;;  %v7104_v5 = vrot.slane %v5541_v14, 1  ;;  %v1535_v19 = vrot.slane %v1432_v49, 2  ;;  %v7181_v4 = vld [vmem:[#allocation15_spill] sm:$0xff] }
 0x133   : > { %v1536_v58 = vrot.slane %v7179_v62, 2  ;;  %v1710_v48 = vmul.f32 %v4859_v7, %v5389_v29  ;;  %v7180_v9 = vrot.slane %v5465_v22, 1  ;;  %v5584_v62 = vmul.f32 %v4875_v20, %v5164_v54 }
 0x134   : > { %v2344_v17 = vadd.f32 %v2296_v18, %v2244_v0  ;;  %v5576_v18 = vadd.f32 %v7104_v5, %v7181_v4  ;;  %v1657_v26 = vadd.f32 %v1535_v19, %v5358_v21  ;;  %v1806_v0 = vmul.f32 %v4875_v20, %v5389_v29 }
 0x135   : > { %v1537_v49 = vsel %vm1519_vm4, %v1535_v19, %v1536_v58  ;;  %v2021_v22 = vmul.f32 %v4852_v63, %v5389_v29  ;;  %v2022_v60 = vmul.f32 %v4852_v63, %v5164_v54  ;;  %v2298_v21 = vmul.f32 %v4890_v28, %v5516_v42 }
 0x136   : > { %v2556_v30 = vadd.f32 %v7180_v9, %v2344_v17  ;;  %v1658_v16 = vadd.f32 %v1537_v49, %v1381_v56  ;;  %v1099_v9 = vld [vmem:[#allocation2 + $0x208] sm:$0xff]  ;;  %v1757_v4 = vadd.f32 %v7182_v46, %v1657_v26  ;;  %v1874_v46 = vrot.slane %v5584_v62, 1 }
 0x137   : > { %v1746_v56 = vmul.f32 %v4859_v7, %v1099_v9  ;;  %v5595_v19 = vmul.f32 %v4875_v20, %v1099_v9  ;;  %v5598_v49 = vmul.f32 %v4852_v63, %v1099_v9  ;;  %v2123_v26 = vrot.slane %v2021_v22, 2 }
 0x138   : > { %v2832_v17 = vadd.f32 %v2710_v32, %v2556_v30  ;;  %v1758_v2 = vadd.f32 %v1710_v48, %v1658_v16  ;;  %v1873_v30 = vrot.slane %v1806_v0, 1  ;;  %v2124_v5 = vrot.slane %v2022_v60, 2 }
 0x139   : > { %v3084_v1 = vld [vmem:[#allocation3 + $0x20] sm:$0xff]  ;;  %v5602_v36 = vadd.f32 %v1746_v56, %v1694_v33  ;;  %v2394_v0 = vmul.f32 %v4913_v38, %v5516_v42  ;;  %v5614_v33 = vmul.f32 %v4913_v38, %v5195_v57  ;;  %v2609_v60 = vmul.f32 %v4868_v12, %v5516_v42 }
 0x13a   : > { %v2887_v32 = vmul.f32 %v5321_v27, %v2832_v17  ;;  %4223 = vmatprep.mubr.msk.f32.mxu1 %vm910_vm2, %v3084_v1  ;;  %v1875_v48 = vsel %vm1274_vm3, %v1873_v30, %v1874_v46  ;;  %v1969_v16 = vadd.f32 %v1873_v30, %v1757_v4  ;;  %v2125_v22 = vsel %vm1519_vm4, %v2123_v26, %v2124_v5 }
 0x13b   : > { %7183 = vst [vmem:[#allocation6_spill] sm:$0xff] %v5602_v36  ;;  %v1970_v62 = vadd.f32 %v1875_v48, %v1758_v2  ;;  %v2461_v56 = vrot.slane %v2394_v0, 1  ;;  %v2462_v30 = vrot.slane %v5614_v33, 1  ;;  %v2711_v10 = vrot.slane %v2609_v60, 2  ;;  %v5623_v48 = vld [vmem:[#allocation2 + $0xc8] sm:$0xff]  ;;  %v7188_v60 = vld [vmem:[#allocation8_spill] sm:$0xff] }
 0x13c   : > { %v2942_v9 = vadd.f32 %v5332_v37, %v2887_v32  ;;  %v2245_v1 = vadd.f32 %v2123_v26, %v1969_v16  ;;  %v2610_v32 = vmul.f32 %v4868_v12, %v5195_v57  ;;  %v1121_v2 = vmul.f32 %v4842_v51, %v5104_v45 }
 0x13d   : > { %v2246_v4 = vadd.f32 %v2125_v22, %v1970_v62  ;;  %v1711_v0 = vmul.f32 %v4859_v7, %v5164_v54  ;;  %v2463_v22 = vsel %vm1274_vm3, %v2461_v56, %v2462_v30  ;;  %v7187_v33 = vrot.slane %v7175_v52, 1 }
 0x13e   : > { %v2990_v17 = vmax.f32 %v2942_v9, 0.0  ;;  %v2345_v55 = vadd.f32 %v7184_v3, %v2245_v1  ;;  %v2712_v59 = vrot.slane %v2610_v32, 2  ;;  %v7185_v9 = vld [vmem:[#allocation5_spill] sm:$0xff]  ;;  %v7189_v31 = vrot.slane %v7188_v60, 2 }
 0x13f   : > { %v7186_v26 = vrot.slane %v7185_v9, 2  ;;  %v2346_v62 = vadd.f32 %v2298_v21, %v2246_v4  ;;  %v1382_v45 = vadd.f32 %v7187_v33, %v1121_v2  ;;  %v2299_v1 = vmul.f32 %v4890_v28, %v5195_v57 }
 0x140   : > { %3040 = vst.msk [vmem:[#allocation3 + $0x29] sm:$0x7f] %vm3033_vm6, %v2990_v17  ;;  %v2127_v17 = vsel %vm1519_vm4, %v2124_v5, %v7189_v31  ;;  %v2557_v36 = vadd.f32 %v2461_v56, %v2345_v55  ;;  %v2713_v3 = vsel %vm1519_vm4, %v2711_v10, %v2712_v59  ;;  %v1123_v52 = vmul.f32 %v4842_v51, %v5389_v29 }
 0x141   : > { %v1539_v16 = vsel %vm1519_vm4, %v1536_v58, %v7186_v26  ;;  %v7190_v58 = vld [vmem:[#allocation14_spill] sm:$0xff]  ;;  %v2558_v21 = vadd.f32 %v2463_v22, %v2346_v62  ;;  %v5648_v2 = vmul.f32 %v4834_v43, %v5623_v48  ;;  %v7192_v55 = vrot.slane %v5174_v13, 1 }
 0x142   : > { %v7191_v32 = vrot.slane %v7190_v58, 2  ;;  %v1659_v4 = vadd.f32 %v1539_v16, %v1382_v45  ;;  %v2833_v31 = vadd.f32 %v2711_v10, %v2557_v36  ;;  %v7193_v5 = vrot.slane %v5410_v24, 1 }
 0x143   : > { %v1435_v26 = vmul.f32 %v4838_v47, %v5389_v29  ;;  %v2834_v16 = vadd.f32 %v2713_v3, %v2558_v21  ;;  %v7107_v22 = vrot.slane %v5648_v2, 1  ;;  %v1713_v10 = vmul.f32 %v4859_v7, %v5516_v42 }
 0x144   : > { %v2715_v9 = vsel %vm1519_vm4, %v2712_v59, %v7191_v32  ;;  %v1289_v56 = vsel %vm1274_vm3, %v7193_v5, %v7192_v55  ;;  %v1541_v59 = vrot.slane %v5178_v15, 2  ;;  %v1759_v62 = vadd.f32 %v1711_v0, %v1659_v4  ;;  %v7194_v32 = vld [vmem:[#allocation18_spill] sm:$0xff] }
 0x145   : > { %v1384_v33 = vadd.f32 %v1289_v56, %v1123_v52  ;;  %v2888_v45 = vmul.f32 %v5321_v27, %v2833_v31  ;;  %v1540_v60 = vrot.slane %v1435_v26, 2  ;;  %v1808_v24 = vmul.f32 %v4875_v20, %v5516_v42  ;;  %v7195_v26 = vld [vmem:[#allocation16_spill] sm:$0xff] }
 0x146   : > { %v2889_v58 = vmul.f32 %v5321_v27, %v2834_v16  ;;  %v1971_v29 = vadd.f32 %v1874_v46, %v1759_v62  ;;  %v5668_v15 = vadd.f32 %v7107_v22, %v7194_v32  ;;  %v5672_v0 = vmul.f32 %v4875_v20, %v5195_v57 }
 0x147   : > { %v3085_v36 = vld [vmem:[#allocation3 + $0x28] sm:$0xff]  ;;  %v2943_v3 = vadd.f32 %v5332_v37, %v2888_v45  ;;  %v1542_v21 = vsel %vm1519_vm4, %v1540_v60, %v1541_v59  ;;  %v1660_v4 = vadd.f32 %v1540_v60, %v5437_v6  ;;  %v1876_v52 = vrot.slane %v1808_v24, 1 }
 0x148   : > { %4224 = vmatmul.mubr.msk.f32.gmra.mxu1 %vm910_vm2, %v3085_v36  ;;  %v2944_v46 = vadd.f32 %v5332_v37, %v2889_v58  ;;  %v2247_v31 = vadd.f32 %v2127_v17, %v1971_v29  ;;  %v1661_v55 = vadd.f32 %v1542_v21, %v1384_v33  ;;  %v1877_v5 = vrot.slane %v5672_v0, 1 }
 0x149   : > { %v2991_v56 = vmax.f32 %v2943_v3, 0.0  ;;  %v1760_v16 = vadd.f32 %v7195_v26, %v1660_v4  ;;  %v2024_v62 = vmul.f32 %v4852_v63, %v5516_v42  ;;  %v2025_v45 = vmul.f32 %v4852_v63, %v5195_v57 }
 0x14a   : > { %v2992_v36 = vmax.f32 %v2944_v46, 0.0  ;;  %v2347_v32 = vadd.f32 %v2299_v1, %v2247_v31  ;;  %v1761_v22 = vadd.f32 %v1713_v10, %v1661_v55  ;;  %v1878_v6 = vsel %vm1274_vm3, %v1876_v52, %v1877_v5  ;;  %v7196_v55 = vld [vmem:[#allocation23_spill] sm:$0xff] }
 0x14b   : > { %3041 = vst.msk [vmem:[#allocation3 + $0x29] sm:$0x80] %vm3030_vm5, %v2991_v56  ;;  %v1972_v17 = vadd.f32 %v1876_v52, %v1760_v16  ;;  %v2128_v33 = vrot.slane %v2024_v62, 2  ;;  %v2129_v60 = vrot.slane %v2025_v45, 2  ;;  %v2301_v24 = vmul.f32 %v4890_v28, %v5623_v48 }
 0x14c   : > { %3042 = vst.msk [vmem:[#allocation3 + $0x31] sm:$0xff] %vm910_vm2, %v2992_v36  ;;  %v2559_v58 = vadd.f32 %v2462_v30, %v2347_v32  ;;  %v1973_v29 = vadd.f32 %v1878_v6, %v1761_v22  ;;  %v2396_v1 = vmul.f32 %v4913_v38, %v5623_v48  ;;  %v5696_v10 = vmul.f32 %v4913_v38, %v5217_v41  ;;  %v7197_v6 = vld [vmem:[#allocation7_spill] sm:$0xff] }
 0x14d   : > { %v2130_v3 = vsel %vm1519_vm4, %v2128_v33, %v2129_v60  ;;  %v2248_v21 = vadd.f32 %v2128_v33, %v1972_v17  ;;  %v2612_v4 = vmul.f32 %v4868_v12, %v5623_v48  ;;  %v2613_v52 = vmul.f32 %v4868_v12, %v5217_v41  ;;  %v5714_v33 = vld [vmem:[#allocation2 + $0xe8] sm:$0xff] }
 0x14e   : > { %v2835_v46 = vadd.f32 %v2715_v9, %v2559_v58  ;;  %v2249_v31 = vadd.f32 %v2130_v3, %v1973_v29  ;;  %v2464_v30 = vrot.slane %v2396_v1, 1  ;;  %v2465_v22 = vrot.slane %v5696_v10, 1  ;;  %v1065_v10 = vld [vmem:[#allocation2 + $0xf8] sm:$0xff] }
 0x14f   : > { %v2348_v56 = vadd.f32 %v7196_v55, %v2248_v21  ;;  %v2716_v26 = vrot.slane %v2612_v4, 2  ;;  %v2717_v16 = vrot.slane %v2613_v52, 2  ;;  %v1124_v62 = vmul.f32 %v4842_v51, %v5164_v54  ;;  %v7200_v4 = vld [vmem:[#allocation13_spill] sm:$0xff] }
 0x150   : > { %v2890_v45 = vmul.f32 %v5321_v27, %v2835_v46  ;;  %v2349_v36 = vadd.f32 %v2301_v24, %v2249_v31  ;;  %v2466_v32 = vsel %vm1274_vm3, %v2464_v30, %v2465_v22  ;;  %v7198_v9 = vrot.slane %v7197_v6, 2 }
 0x151   : > { %v2560_v58 = vadd.f32 %v2464_v30, %v2348_v56  ;;  %v2718_v29 = vsel %vm1519_vm4, %v2716_v26, %v2717_v16  ;;  %v7199_v1 = vrot.slane %v5174_v13, 1  ;;  %v1714_v54 = vmul.f32 %v4859_v7, %v5195_v57  ;;  %v7202_v56 = vld [vmem:[#allocation22_spill] sm:$0xff] }
 0x152   : > { %v1544_v17 = vsel %vm1519_vm4, %v1541_v59, %v7198_v9  ;;  %v2945_v24 = vadd.f32 %v5332_v37, %v2890_v45  ;;  %v2561_v21 = vadd.f32 %v2466_v32, %v2349_v36  ;;  %v7201_v52 = vrot.slane %v7200_v4, 2 }
 0x153   : > { %v1385_v3 = vadd.f32 %v7199_v1, %v1124_v62  ;;  %v2302_v59 = vmul.f32 %v4890_v28, %v5217_v41  ;;  %v3086_v31 = vld [vmem:[#allocation3 + $0x30] sm:$0xff]  ;;  %v2836_v30 = vadd.f32 %v2716_v26, %v2560_v58  ;;  %v7203_v6 = vrot.slane %v7202_v56, 2 }
 0x154   : > { %v2132_v46 = vsel %vm1519_vm4, %v2129_v60, %v7201_v52  ;;  %v1126_v62 = vmul.f32 %v4842_v51, %v5516_v42  ;;  %4226 = vmatprep.mubr.msk.f32.mxu1 %vm910_vm2, %v3086_v31  ;;  %v2993_v45 = vmax.f32 %v2945_v24, 0.0  ;;  %v2837_v36 = vadd.f32 %v2718_v29, %v2561_v21  ;;  %v7206_v31 = vld [vmem:[#allocation24_spill] sm:$0xff] }
 0x155   : > { %v1662_v55 = vadd.f32 %v1544_v17, %v1385_v3  ;;  %v2720_v13 = vsel %vm1519_vm4, %v2717_v16, %v7203_v6  ;;  %v5735_v60 = vmul.f32 %v4834_v43, %v5714_v33  ;;  %v7204_v32 = vrot.slane %v5211_v23, 1 }
 0x156   : > { %v7205_v26 = vrot.slane %v5541_v14, 1  ;;  %v2891_v17 = vmul.f32 %v5321_v27, %v2836_v30  ;;  %v1438_v1 = vmul.f32 %v4838_v47, %v5516_v42  ;;  %3043 = vst.msk [vmem:[#allocation3 + $0x39] sm:$0x7f] %vm3033_vm6, %v2993_v45  ;;  %v2892_v29 = vmul.f32 %v5321_v27, %v2837_v36 }
 0x157   : > { %v1762_v16 = vadd.f32 %v1714_v54, %v1662_v55  ;;  %v1296_v3 = vrot.slane %v5735_v60, 1  ;;  %v1546_v24 = vrot.slane %v5215_v11, 2  ;;  %v1716_v14 = vmul.f32 %v4859_v7, %v5623_v48 }
 0x158   : > { %v1292_v9 = vsel %vm1274_vm3, %v7205_v26, %v7204_v32  ;;  %v2946_v21 = vadd.f32 %v5332_v37, %v2891_v17  ;;  %v1545_v4 = vrot.slane %v1438_v1, 2  ;;  %v1810_v42 = vmul.f32 %v4875_v20, %v5623_v48 }
 0x159   : > { %v1387_v58 = vadd.f32 %v1292_v9, %v1126_v62  ;;  %v1974_v54 = vadd.f32 %v1877_v5, %v1762_v16  ;;  %v2947_v52 = vadd.f32 %v5332_v37, %v2892_v29  ;;  %v5760_v30 = vadd.f32 %v1296_v3, %v7206_v31  ;;  %v7207_v9 = vld [vmem:[#allocation20_spill] sm:$0xff] }
 0x15a   : > { %v5764_v11 = vmul.f32 %v4875_v20, %v5217_v41  ;;  %v2027_v55 = vmul.f32 %v4852_v63, %v5623_v48  ;;  %v2994_v0 = vmax.f32 %v2946_v21, 0.0  ;;  %v1547_v56 = vsel %vm1519_vm4, %v1545_v4, %v1546_v24 }
 0x15b   : > { %v2250_v5 = vadd.f32 %v2132_v46, %v1974_v54  ;;  %v1663_v6 = vadd.f32 %v1545_v4, %v5576_v18  ;;  %v2995_v62 = vmax.f32 %v2947_v52, 0.0  ;;  %v1664_v45 = vadd.f32 %v1547_v56, %v1387_v58  ;;  %v4326_v58 = vld [vmem:[#allocation2 + $0xe0] sm:$0xff] }
 0x15c   : > { %v1879_v36 = vrot.slane %v1810_v42, 1  ;;  %v1880_v32 = vrot.slane %v5764_v11, 1  ;;  %3044 = vst.msk [vmem:[#allocation3 + $0x39] sm:$0x80] %vm3030_vm5, %v2994_v0  ;;  %v2028_v16 = vmul.f32 %v4852_v63, %v5217_v41  ;;  %v2133_v1 = vrot.slane %v2027_v55, 2 }
 0x15d   : > { %v2350_v26 = vadd.f32 %v2302_v59, %v2250_v5  ;;  %v1763_v17 = vadd.f32 %v7207_v9, %v1663_v6  ;;  %3045 = vst.msk [vmem:[#allocation3 + $0x41] sm:$0xff] %vm910_vm2, %v2995_v62  ;;  %v1764_v46 = vadd.f32 %v1716_v14, %v1664_v45  ;;  %v2303_v29 = vmul.f32 %v4326_v58, %v4890_v28  ;;  %v3087_v59 = vld [vmem:[#allocation3 + $0x38] sm:$0xff]  ;;  %v7208_v58 = vld [vmem:[#allocation10_spill] sm:$0xff] }
 0x15e   : > { %v1881_v18 = vsel %vm1274_vm3, %v1879_v36, %v1880_v32  ;;  %v2304_v21 = vmul.f32 %v4890_v28, %v5714_v33  ;;  %v2134_v42 = vrot.slane %v2028_v16, 2  ;;  %v2398_v52 = vmul.f32 %v4913_v38, %v5714_v33  ;;  %4227 = vmatmul.mubr.msk.f32.gmra.mxu1 %vm910_vm2, %v3087_v59 }
 0x15f   : > { %v2562_v54 = vadd.f32 %v2465_v22, %v2350_v26  ;;  %v1975_v4 = vadd.f32 %v1879_v36, %v1763_v17  ;;  %v1976_v14 = vadd.f32 %v1881_v18, %v1764_v46  ;;  %v5789_v31 = vmul.f32 %v4913_v38, %v5230_v35 }
 0x160   : > { %v2615_v55 = vmul.f32 %v4868_v12, %v5714_v33  ;;  %v2616_v0 = vmul.f32 %v4868_v12, %v5230_v35  ;;  %v2135_v5 = vsel %vm1519_vm4, %v2133_v1, %v2134_v42  ;;  %v2467_v6 = vrot.slane %v2398_v52, 1 }
 0x161   : > { %v2838_v22 = vadd.f32 %v2720_v13, %v2562_v54  ;;  %v2251_v56 = vadd.f32 %v2133_v1, %v1975_v4  ;;  %v2252_v62 = vadd.f32 %v2135_v5, %v1976_v14  ;;  %v2468_v45 = vrot.slane %v5789_v31, 1 }
 0x162   : > { %v2721_v36 = vrot.slane %v2615_v55, 2  ;;  %v2722_v26 = vrot.slane %v2616_v0, 2  ;;  %v1127_v16 = vmul.f32 %v4842_v51, %v5195_v57  ;;  %v5801_v46 = vmul.f32 %v4838_v47, %v1065_v10 }
 0x163   : > { %v2893_v9 = vmul.f32 %v5321_v27, %v2838_v22  ;;  %v2351_v17 = vadd.f32 %v2303_v29, %v2251_v56  ;;  %v2352_v18 = vadd.f32 %v2304_v21, %v2252_v62  ;;  %v2469_v13 = vsel %vm1274_vm3, %v2467_v6, %v2468_v45  ;;  %v5814_v21 = vld [vmem:[#allocation2 + $0x108] sm:$0xff]  ;;  %v1066_v62 = vld [vmem:[#allocation2 + $0x100] sm:$0xff] }
 0x164   : > { %v2723_v1 = vsel %vm1519_vm4, %v2721_v36, %v2722_v26  ;;  %v7209_v59 = vrot.slane %v7208_v58, 2  ;;  %v3088_v4 = vld [vmem:[#allocation3 + $0x40] sm:$0xff]  ;;  %v7210_v57 = vrot.slane %v5211_v23, 1  ;;  %v1558_v55 = vrot.slane %v5801_v46, 2 }
 0x165   : > { %v2948_v29 = vadd.f32 %v5332_v37, %v2893_v9  ;;  %v2563_v52 = vadd.f32 %v2467_v6, %v2351_v17  ;;  %4229 = vmatprep.mubr.msk.f32.mxu1 %vm910_vm2, %v3088_v4  ;;  %v2564_v0 = vadd.f32 %v2469_v13, %v2352_v18  ;;  %v1717_v22 = vmul.f32 %v4859_v7, %v5217_v41 }
 0x166   : > { %v1549_v54 = vsel %vm1519_vm4, %v1546_v24, %v7209_v59  ;;  %v1388_v14 = vadd.f32 %v7210_v57, %v1127_v16  ;;  %v5820_v5 = vmul.f32 %v4852_v63, %v1065_v10  ;;  %v7211_v24 = vld [vmem:[#allocation21_spill] sm:$0xff]  ;;  %v2305_v16 = vmul.f32 %v4890_v28, %v5230_v35 }
 0x167   : > { %v7212_v56 = vrot.slane %v7211_v24, 2  ;;  %v2996_v23 = vmax.f32 %v2948_v29, 0.0  ;;  %v2839_v9 = vadd.f32 %v2721_v36, %v2563_v52  ;;  %v2840_v58 = vadd.f32 %v2723_v1, %v2564_v0 }
 0x168   : > { %v1665_v17 = vadd.f32 %v1549_v54, %v1388_v14  ;;  %v2141_v18 = vrot.slane %v5820_v5, 2  ;;  %v2617_v13 = vmul.f32 %v4868_v12, %v1065_v10  ;;  %v1129_v41 = vmul.f32 %v4842_v51, %v5623_v48  ;;  %v5939_v5 = vld [vmem:[%s7055_s5] ss:$0 sm:$0xff] }
 0x169   : > { %v2137_v6 = vsel %vm1519_vm4, %v2134_v42, %v7212_v56  ;;  %3046 = vst.msk [vmem:[#allocation3 + $0x49] sm:$0x7f] %vm3033_vm6, %v2996_v23  ;;  %v2894_v59 = vmul.f32 %v5321_v27, %v2839_v9  ;;  %v1134_v4 = vmul.f32 %v4842_v51, %v1066_v62  ;;  %v5836_v36 = vmul.f32 %v4834_v43, %v5814_v21 }
 0x16a   : > { %v1765_v42 = vadd.f32 %v1717_v22, %v1665_v17  ;;  %v2895_v35 = vmul.f32 %v5321_v27, %v2840_v58  ;;  %v2724_v1 = vrot.slane %v2617_v13, 2  ;;  %v7213_v54 = vrot.slane %v5224_v40, 1 }
 0x16b   : > { %v7214_v10 = vrot.slane %v5648_v2, 1  ;;  %v1441_v52 = vmul.f32 %v4838_v47, %v5623_v48  ;;  %v2949_v57 = vadd.f32 %v5332_v37, %v2894_v59  ;;  %v1299_v0 = vrot.slane %v5836_v36, 1  ;;  %v5867_v59 = vld [vmem:[#allocation2 + $0xf0] sm:$0xff] }
 0x16c   : > { %v1977_v14 = vadd.f32 %v1880_v32, %v1765_v42  ;;  %v2950_v24 = vadd.f32 %v5332_v37, %v2895_v35  ;;  %v2725_v56 = vsel %vm1519_vm4, %v2722_v26, %v2724_v1  ;;  %v1551_v2 = vrot.slane %v5228_v53, 2 }
 0x16d   : > { %v1295_v29 = vsel %vm1274_vm3, %v7214_v10, %v7213_v54  ;;  %v1550_v23 = vrot.slane %v1441_v52, 2  ;;  %v2997_v9 = vmax.f32 %v2949_v57, 0.0  ;;  %v5855_v48 = vadd.f32 %v1299_v0, %v1134_v4 }
 0x16e   : > { %v1390_v22 = vadd.f32 %v1295_v29, %v1129_v41  ;;  %v2253_v17 = vadd.f32 %v2137_v6, %v1977_v14  ;;  %v1719_v11 = vmul.f32 %v4859_v7, %v5714_v33  ;;  %v2998_v32 = vmax.f32 %v2950_v24, 0.0 }
 0x16f   : > { %v1552_v58 = vsel %vm1519_vm4, %v1550_v23, %v1551_v2  ;;  %v1666_v13 = vadd.f32 %v1550_v23, %v5668_v15  ;;  %v5862_v41 = vmul.f32 %v4859_v7, %v1066_v62  ;;  %3047 = vst.msk [vmem:[#allocation3 + $0x49] sm:$0x80] %vm3030_vm5, %v2997_v9  ;;  %v1812_v6 = vmul.f32 %v4875_v20, %v5714_v33  ;;  %v7215_v15 = vld [vmem:[#allocation25_spill] sm:$0xff] }
 0x170   : > { %v2353_v53 = vadd.f32 %v2305_v16, %v2253_v17  ;;  %v1667_v26 = vadd.f32 %v1552_v58, %v1390_v22  ;;  %v5871_v42 = vmul.f32 %v5867_v59, %v4875_v20  ;;  %v3089_v4 = vld [vmem:[#allocation3 + $0x48] sm:$0xff]  ;;  %3048 = vst.msk [vmem:[#allocation3 + $0x51] sm:$0xff] %vm910_vm2, %v2998_v32  ;;  %v2030_v1 = vmul.f32 %v4852_v63, %v5714_v33  ;;  %v5889_v32 = vld [vmem:[#allocation2 + $0x110] sm:$0xff] }
 0x171   : > { %v1766_v35 = vadd.f32 %v7215_v15, %v1666_v13  ;;  %v2031_v16 = vmul.f32 %v5867_v59, %v4852_v63  ;;  %v2306_v54 = vmul.f32 %v4890_v28, %v1066_v62  ;;  %4230 = vmatmul.mubr.msk.f32.gmra.mxu1 %vm910_vm2, %v3089_v4  ;;  %v1882_v52 = vrot.slane %v1812_v6, 1 }
 0x172   : > { %v2565_v10 = vadd.f32 %v2468_v45, %v2353_v53  ;;  %v1767_v29 = vadd.f32 %v1719_v11, %v1667_v26  ;;  %v1883_v57 = vrot.slane %v5871_v42, 1  ;;  %v2138_v14 = vrot.slane %v2030_v1, 2  ;;  %v1069_v45 = vld [vmem:[#allocation2 + $0x118] sm:$0xff] }
 0x173   : > { %v2139_v22 = vrot.slane %v2031_v16, 2  ;;  %v2307_v24 = vmul.f32 %v4890_v28, %v5814_v21  ;;  %v2400_v23 = vmul.f32 %v4913_v38, %v5814_v21  ;;  %v1978_v17 = vadd.f32 %v1882_v52, %v1766_v35  ;;  %v4329_v35 = vld [vmem:[#allocation2 + $0xd0] sm:$0xff] }
 0x174   : > { %v2841_v9 = vadd.f32 %v2725_v56, %v2565_v10  ;;  %v1884_v62 = vsel %vm1274_vm3, %v1882_v52, %v1883_v57  ;;  %v5893_v31 = vmul.f32 %v5889_v32, %v4913_v38  ;;  %v2618_v53 = vmul.f32 %v4868_v12, %v5814_v21 }
 0x175   : > { %v1979_v11 = vadd.f32 %v1884_v62, %v1767_v29  ;;  %v2140_v58 = vsel %vm1519_vm4, %v2138_v14, %v2139_v22  ;;  %v2470_v13 = vrot.slane %v2400_v23, 1  ;;  %v2254_v56 = vadd.f32 %v2138_v14, %v1978_v17  ;;  %v7217_v17 = vld [vmem:[#allocation19_spill] sm:$0xff] }
 0x176   : > { %v2896_v26 = vmul.f32 %v5321_v27, %v2841_v9  ;;  %v2471_v6 = vrot.slane %v5893_v31, 1  ;;  %v2619_v42 = vmul.f32 %v5889_v32, %v4868_v12  ;;  %v2726_v15 = vrot.slane %v2618_v53, 2 }
 0x177   : > { %v2255_v4 = vadd.f32 %v2140_v58, %v1979_v11  ;;  %v1130_v1 = vmul.f32 %v4329_v35, %v4842_v51  ;;  %v5904_v16 = vmul.f32 %v4838_v47, %v1069_v45  ;;  %v3090_v10 = vld [vmem:[#allocation3 + $0x50] sm:$0xff]  ;;  %v2354_v52 = vadd.f32 %v2306_v54, %v2254_v56  ;;  %v1070_v56 = vld [vmem:[#allocation2 + $0x120] sm:$0xff] }
 0x178   : > { %v2951_v29 = vadd.f32 %v5332_v37, %v2896_v26  ;;  %v2472_v27 = vsel %vm1274_vm3, %v2470_v13, %v2471_v6  ;;  %v2727_v14 = vrot.slane %v2619_v42, 2  ;;  %4232 = vmatprep.mubr.msk.f32.mxu1 %vm910_vm2, %v3090_v10  ;;  %v7216_v9 = vrot.slane %v5224_v40, 1  ;;  %v5920_v42 = vld [vmem:[#allocation2 + $0x128] sm:$0xff] }
 0x179   : > { %v2355_v23 = vadd.f32 %v2307_v24, %v2255_v4  ;;  %v7218_v11 = vrot.slane %v7217_v17, 2  ;;  %v1563_v53 = vrot.slane %v5904_v16, 2  ;;  %v2566_v37 = vadd.f32 %v2470_v13, %v2354_v52 }
 0x17a   : > { %v1391_v62 = vadd.f32 %v7216_v9, %v1130_v1  ;;  %v2999_v35 = vmax.f32 %v2951_v29, 0.0  ;;  %v2728_v54 = vsel %vm1519_vm4, %v2726_v15, %v2727_v14  ;;  %v1720_v26 = vmul.f32 %v5867_v59, %v4859_v7 }
 0x17b   : > { %v1554_v58 = vsel %vm1519_vm4, %v1551_v2, %v7218_v11  ;;  %v2567_v24 = vadd.f32 %v2472_v27, %v2355_v23  ;;  %v5923_v40 = vmul.f32 %v4852_v63, %v1069_v45  ;;  %v2142_v2 = vsel %vm1519_vm4, %v2139_v22, %v2141_v18 }
 0x17c   : > { %v1668_v4 = vadd.f32 %v1554_v58, %v1391_v62  ;;  %3049 = vst.msk [vmem:[#allocation3 + $0x59] sm:$0x7f] %vm3033_vm6, %v2999_v35  ;;  %v2842_v13 = vadd.f32 %v2726_v15, %v2566_v37  ;;  %v2308_v1 = vmul.f32 %v5889_v32, %v4890_v28  ;;  %v2620_v10 = vmul.f32 %v4868_v12, %v1069_v45  ;;  %v5957_v37 = vld [vmem:[%s7056_s6] ss:$0 sm:$0xff] }
 0x17d   : > { %v1132_v29 = vmul.f32 %v4842_v51, %v5714_v33  ;;  %v2843_v52 = vadd.f32 %v2728_v54, %v2567_v24  ;;  %v2146_v23 = vrot.slane %v5923_v40, 2  ;;  %v1137_v9 = vmul.f32 %v4842_v51, %v1070_v56 }
 0x17e   : > { %v1768_v27 = vadd.f32 %v1720_v26, %v1668_v4  ;;  %v2897_v18 = vmul.f32 %v5939_v5, %v2842_v13  ;;  %v2729_v22 = vrot.slane %v2620_v10, 2  ;;  %v5944_v45 = vmul.f32 %v4834_v43, %v5920_v42 }
 0x17f   : > { %v7219_v15 = vrot.slane %v5235_v8, 1  ;;  %v2898_v17 = vmul.f32 %v5939_v5, %v2843_v52  ;;  %v1444_v35 = vmul.f32 %v4838_v47, %v5714_v33  ;;  %v1722_v33 = vmul.f32 %v4859_v7, %v5814_v21 }
 0x180   : > { %v1980_v11 = vadd.f32 %v1883_v57, %v1768_v27  ;;  %v2952_v54 = vadd.f32 %v5957_v37, %v2897_v18  ;;  %v2730_v26 = vsel %vm1519_vm4, %v2727_v14, %v2729_v22  ;;  %v7108_v60 = vrot.slane %v5944_v45, 1 }
 0x181   : > { %v1298_v62 = vsel %vm1274_vm3, %v1296_v3, %v7219_v15  ;;  %v1556_v3 = vrot.slane %v5239_v61, 2  ;;  %v2953_v24 = vadd.f32 %v5957_v37, %v2898_v17  ;;  %v1555_v4 = vrot.slane %v1444_v35, 2 }
 0x182   : > { %v1393_v58 = vadd.f32 %v1298_v62, %v1132_v29  ;;  %v2256_v57 = vadd.f32 %v2142_v2, %v1980_v11  ;;  %v3000_v13 = vmax.f32 %v2952_v54, 0.0  ;;  %v5968_v10 = vadd.f32 %v7108_v60, %v1137_v9 }
 0x183   : > { %v5971_v29 = vmul.f32 %v4859_v7, %v1070_v56  ;;  %v1814_v14 = vmul.f32 %v4875_v20, %v5814_v21  ;;  %v3091_v52 = vld [vmem:[#allocation3 + $0x58] sm:$0xff]  ;;  %v3001_v61 = vmax.f32 %v2953_v24, 0.0  ;;  %v1557_v2 = vsel %vm1519_vm4, %v1555_v4, %v1556_v3 }
 0x184   : > { %v2356_v27 = vadd.f32 %v2308_v1, %v2256_v57  ;;  %v1669_v18 = vadd.f32 %v1555_v4, %v5760_v30  ;;  %4233 = vmatmul.mubr.msk.f32.gmra.mxu1 %vm910_vm2, %v3091_v52  ;;  %3050 = vst.msk [vmem:[#allocation3 + $0x59] sm:$0x80] %vm3030_vm5, %v3000_v13  ;;  %v1670_v22 = vadd.f32 %v1557_v2, %v1393_v58  ;;  %v1073_v2 = vld [vmem:[#allocation2 + $0x138] sm:$0xff] }
 0x185   : > { %v5981_v9 = vmul.f32 %v5889_v32, %v4875_v20  ;;  %v1885_v15 = vrot.slane %v1814_v14, 1  ;;  %v2033_v62 = vmul.f32 %v4852_v63, %v5814_v21  ;;  %3051 = vst.msk [vmem:[#allocation3 + $0x61] sm:$0xff] %vm910_vm2, %v3001_v61  ;;  %v2034_v17 = vmul.f32 %v5889_v32, %v4852_v63 }
 0x186   : > { %v2568_v1 = vadd.f32 %v2471_v6, %v2356_v27  ;;  %v1769_v30 = vadd.f32 %v5862_v41, %v1669_v18  ;;  %v2309_v11 = vmul.f32 %v4890_v28, %v1070_v56  ;;  %v1770_v58 = vadd.f32 %v1722_v33, %v1670_v22  ;;  %v5998_v6 = vld [vmem:[#allocation2 + $0x130] sm:$0xff] }
 0x187   : > { %v1886_v35 = vrot.slane %v5981_v9, 1  ;;  %v2143_v54 = vrot.slane %v2033_v62, 2  ;;  %v2310_v24 = vmul.f32 %v4890_v28, %v5920_v42  ;;  %v2144_v13 = vrot.slane %v2034_v17, 2 }
 0x188   : > { %v2844_v57 = vadd.f32 %v2730_v26, %v2568_v1  ;;  %v1981_v4 = vadd.f32 %v1885_v15, %v1769_v30  ;;  %v2402_v31 = vmul.f32 %v4913_v38, %v5920_v42  ;;  %v6002_v56 = vmul.f32 %v5998_v6, %v4913_v38 }
 0x189   : > { %v1887_v41 = vsel %vm1274_vm3, %v1885_v15, %v1886_v35  ;;  %v2621_v33 = vmul.f32 %v4868_v12, %v5920_v42  ;;  %v2622_v14 = vmul.f32 %v5998_v6, %v4868_v12  ;;  %v2145_v61 = vsel %vm1519_vm4, %v2143_v54, %v2144_v13 }
 0x18a   : > { %v2899_v26 = vmul.f32 %v5939_v5, %v2844_v57  ;;  %v1982_v52 = vadd.f32 %v1887_v41, %v1770_v58  ;;  %v2257_v27 = vadd.f32 %v2143_v54, %v1981_v4  ;;  %v2473_v18 = vrot.slane %v2402_v31, 1 }
 0x18b   : > { %v2474_v22 = vrot.slane %v6002_v56, 1  ;;  %v2731_v9 = vrot.slane %v2621_v33, 2  ;;  %v2732_v15 = vrot.slane %v2622_v14, 2  ;;  %v1133_v17 = vmul.f32 %v5867_v59, %v4842_v51  ;;  %v1074_v14 = vld [vmem:[#allocation2 + $0x140] sm:$0xff] }
 0x18c   : > { %v2954_v62 = vadd.f32 %v5957_v37, %v2899_v26  ;;  %v2258_v1 = vadd.f32 %v2145_v61, %v1982_v52  ;;  %v2357_v30 = vadd.f32 %v2309_v11, %v2257_v27  ;;  %v3092_v60 = vld [vmem:[#allocation3 + $0x60] sm:$0xff]  ;;  %v6019_v57 = vmul.f32 %v4838_v47, %v1073_v2  ;;  %v6027_v26 = vld [vmem:[#allocation2 + $0x148] sm:$0xff] }
 0x18d   : > { %v2475_v58 = vsel %vm1274_vm3, %v2473_v18, %v2474_v22  ;;  %v2733_v54 = vsel %vm1519_vm4, %v2731_v9, %v2732_v15  ;;  %v1559_v4 = vsel %vm1519_vm4, %v1556_v3, %v1558_v55  ;;  %4235 = vmatprep.mubr.msk.f32.mxu1 %vm910_vm2, %v3092_v60  ;;  %v7220_v59 = vrot.slane %v5235_v8, 1 }
 0x18e   : > { %v3002_v11 = vmax.f32 %v2954_v62, 0.0  ;;  %v2358_v31 = vadd.f32 %v2310_v24, %v2258_v1  ;;  %v2569_v41 = vadd.f32 %v2473_v18, %v2357_v30  ;;  %v1568_v52 = vrot.slane %v6019_v57, 2  ;;  %v1082_v57 = vld [vmem:[#allocation2 + $0x180] sm:$0xff] }
 0x18f   : > { %v1394_v33 = vadd.f32 %v7220_v59, %v1133_v17  ;;  %v1723_v61 = vmul.f32 %v5889_v32, %v4859_v7  ;;  %v6033_v46 = vmul.f32 %v4852_v63, %v1073_v2  ;;  %v2147_v55 = vsel %vm1519_vm4, %v2144_v13, %v2146_v23  ;;  %v7221_v17 = vld [vmem:[#allocation34_spill] sm:$0xff] }
 0x190   : > { %3052 = vst.msk [vmem:[#allocation3 + $0x69] sm:$0x7f] %vm3033_vm6, %v3002_v11  ;;  %v2570_v60 = vadd.f32 %v2475_v58, %v2358_v31  ;;  %v2845_v8 = vadd.f32 %v2731_v9, %v2569_v41  ;;  %v2311_v24 = vmul.f32 %v5998_v6, %v4890_v28  ;;  %v2623_v18 = vmul.f32 %v4868_v12, %v1073_v2  ;;  %v7223_v11 = vld [vmem:[#allocation35_spill] sm:$0xff] }
 0x191   : > { %v1671_v3 = vadd.f32 %v1559_v4, %v1394_v33  ;;  %v2151_v27 = vrot.slane %v6033_v46, 2  ;;  %v1135_v62 = vmul.f32 %v4842_v51, %v5814_v21  ;;  %v1140_v1 = vmul.f32 %v4842_v51, %v1074_v14 }
 0x192   : > { %v2846_v40 = vadd.f32 %v2733_v54, %v2570_v60  ;;  %v2900_v23 = vmul.f32 %v5939_v5, %v2845_v8  ;;  %v6049_v9 = vmul.f32 %v4834_v43, %v6027_v26  ;;  %v2734_v30 = vrot.slane %v2623_v18, 2 }
 0x193   : > { %v1771_v13 = vadd.f32 %v1723_v61, %v1671_v3  ;;  %v7222_v58 = vrot.slane %v7221_v17, 1  ;;  %v1447_v4 = vmul.f32 %v4838_v47, %v5814_v21  ;;  %v1561_v31 = vrot.slane %v7223_v11, 2  ;;  %v1078_v11 = vld [vmem:[#allocation2 + $0x160] sm:$0xff] }
 0x194   : > { %v2901_v54 = vmul.f32 %v5939_v5, %v2846_v40  ;;  %v2955_v41 = vadd.f32 %v5957_v37, %v2900_v23  ;;  %v1305_v33 = vrot.slane %v6049_v9, 1  ;;  %v2735_v61 = vsel %vm1519_vm4, %v2732_v15, %v2734_v30 }
 0x195   : > { %v1301_v2 = vsel %vm1274_vm3, %v1299_v0, %v7222_v58  ;;  %v1983_v59 = vadd.f32 %v1886_v35, %v1771_v13  ;;  %v1560_v8 = vrot.slane %v1447_v4, 2  ;;  %v1725_v36 = vmul.f32 %v4859_v7, %v5920_v42 }
 0x196   : > { %v1396_v60 = vadd.f32 %v1301_v2, %v1135_v62  ;;  %v2956_v0 = vadd.f32 %v5957_v37, %v2901_v54  ;;  %v3003_v3 = vmax.f32 %v2955_v41, 0.0  ;;  %v6068_v18 = vadd.f32 %v1305_v33, %v1140_v1 }
 0x197   : > { %v2259_v21 = vadd.f32 %v2147_v55, %v1983_v59  ;;  %v3093_v40 = vld [vmem:[#allocation3 + $0x68] sm:$0xff]  ;;  %v1562_v35 = vsel %vm1519_vm4, %v1560_v8, %v1561_v31  ;;  %v1672_v15 = vadd.f32 %v1560_v8, %v5855_v48  ;;  %v6075_v62 = vmul.f32 %v4859_v7, %v1074_v14 }
 0x198   : > { %v1816_v23 = vmul.f32 %v4875_v20, %v5920_v42  ;;  %4236 = vmatmul.mubr.msk.f32.gmra.mxu1 %vm910_vm2, %v3093_v40  ;;  %v3004_v55 = vmax.f32 %v2956_v0, 0.0  ;;  %3053 = vst.msk [vmem:[#allocation3 + $0x69] sm:$0x80] %vm3030_vm5, %v3003_v3  ;;  %v1673_v13 = vadd.f32 %v1562_v35, %v1396_v60  ;;  %v6083_v30 = vmul.f32 %v5998_v6, %v4875_v20  ;;  %v6100_v35 = vld [vmem:[#allocation2 + $0x150] sm:$0xff] }
 0x199   : > { %v2359_v1 = vadd.f32 %v2311_v24, %v2259_v21  ;;  %v1772_v58 = vadd.f32 %v5971_v29, %v1672_v15  ;;  %v2036_v2 = vmul.f32 %v4852_v63, %v5920_v42  ;;  %v2037_v4 = vmul.f32 %v5998_v6, %v4852_v63 }
 0x19a   : > { %v1888_v48 = vrot.slane %v1816_v23, 1  ;;  %3054 = vst.msk [vmem:[#allocation3 + $0x71] sm:$0xff] %vm910_vm2, %v3004_v55  ;;  %v1773_v24 = vadd.f32 %v1725_v36, %v1673_v13  ;;  %v1889_v41 = vrot.slane %v6083_v30, 1  ;;  %v2312_v59 = vmul.f32 %v4890_v28, %v1074_v14  ;;  %v1077_v23 = vld [vmem:[#allocation2 + $0x158] sm:$0xff] }
 0x19b   : > { %v2571_v54 = vadd.f32 %v2474_v22, %v2359_v1  ;;  %v2148_v8 = vrot.slane %v2036_v2, 2  ;;  %v2149_v29 = vrot.slane %v2037_v4, 2  ;;  %v2313_v0 = vmul.f32 %v4890_v28, %v6027_v26 }
 0x19c   : > { %v1984_v60 = vadd.f32 %v1888_v48, %v1772_v58  ;;  %v1890_v21 = vsel %vm1274_vm3, %v1888_v48, %v1889_v41  ;;  %v2404_v40 = vmul.f32 %v4913_v38, %v6027_v26  ;;  %v6104_v56 = vmul.f32 %v6100_v35, %v4913_v38 }
 0x19d   : > { %v2847_v3 = vadd.f32 %v2735_v61, %v2571_v54  ;;  %v1985_v22 = vadd.f32 %v1890_v21, %v1773_v24  ;;  %v2150_v14 = vsel %vm1519_vm4, %v2148_v8, %v2149_v29  ;;  %v2624_v15 = vmul.f32 %v4868_v12, %v6027_v26 }
 0x19e   : > { %v2260_v36 = vadd.f32 %v2148_v8, %v1984_v60  ;;  %v2476_v55 = vrot.slane %v2404_v40, 1  ;;  %v2477_v1 = vrot.slane %v6104_v56, 1  ;;  %v2625_v13 = vmul.f32 %v6100_v35, %v4868_v12 }
 0x19f   : > { %v2902_v61 = vmul.f32 %v5939_v5, %v2847_v3  ;;  %v2261_v30 = vadd.f32 %v2150_v14, %v1985_v22  ;;  %v2736_v48 = vrot.slane %v2624_v15, 2  ;;  %v1136_v2 = vmul.f32 %v5889_v32, %v4842_v51  ;;  %v6134_v15 = vld [vmem:[#allocation2 + $0x168] sm:$0xff] }
 0x1a0   : > { %v2360_v58 = vadd.f32 %v2312_v59, %v2260_v36  ;;  %v2478_v54 = vsel %vm1274_vm3, %v2476_v55, %v2477_v1  ;;  %v2737_v24 = vrot.slane %v2625_v13, 2  ;;  %v6120_v60 = vmul.f32 %v4838_v47, %v1077_v23 }
 0x1a1   : > { %v2957_v4 = vadd.f32 %v5957_v37, %v2902_v61  ;;  %v3094_v8 = vld [vmem:[#allocation3 + $0x70] sm:$0xff]  ;;  %v2361_v3 = vadd.f32 %v2313_v0, %v2261_v30  ;;  %v7224_v40 = vrot.slane %v7221_v17, 1  ;;  %v1564_v32 = vsel %vm1519_vm4, %v1561_v31, %v1563_v53 }
 0x1a2   : > { %v2572_v21 = vadd.f32 %v2476_v55, %v2360_v58  ;;  %4238 = vmatprep.mubr.msk.f32.mxu1 %vm910_vm2, %v3094_v8  ;;  %v2738_v14 = vsel %vm1519_vm4, %v2736_v48, %v2737_v24  ;;  %v1573_v36 = vrot.slane %v6120_v60, 2  ;;  %v1726_v0 = vmul.f32 %v5998_v6, %v4859_v7 }
 0x1a3   : > { %v1397_v59 = vadd.f32 %v7224_v40, %v1136_v2  ;;  %v3005_v22 = vmax.f32 %v2957_v4, 0.0  ;;  %v2573_v17 = vadd.f32 %v2478_v54, %v2361_v3  ;;  %v6137_v16 = vmul.f32 %v4852_v63, %v1077_v23 }
 0x1a4   : > { %v2848_v61 = vadd.f32 %v2736_v48, %v2572_v21  ;;  %v2152_v53 = vsel %vm1519_vm4, %v2149_v29, %v2151_v27  ;;  %v2314_v31 = vmul.f32 %v6100_v35, %v4890_v28  ;;  %v2626_v13 = vmul.f32 %v4868_v12, %v1077_v23  ;;  %v7225_v27 = vld [vmem:[#allocation28_spill] sm:$0xff] }
 0x1a5   : > { %v1674_v55 = vadd.f32 %v1564_v32, %v1397_v59  ;;  %3055 = vst.msk [vmem:[#allocation3 + $0x79] sm:$0x7f] %vm3033_vm6, %v3005_v22  ;;  %v1138_v30 = vmul.f32 %v4842_v51, %v5920_v42  ;;  %v2849_v58 = vadd.f32 %v2738_v14, %v2573_v17  ;;  %v2156_v4 = vrot.slane %v6137_v16, 2  ;;  %v7228_v17 = vld [vmem:[#allocation29_spill] sm:$0xff] }
 0x1a6   : > { %v2903_v48 = vmul.f32 %v5939_v5, %v2848_v61  ;;  %v2739_v54 = vrot.slane %v2626_v13, 2  ;;  %v1143_v8 = vmul.f32 %v4842_v51, %v1078_v11  ;;  %v6153_v46 = vmul.f32 %v4834_v43, %v6134_v15 }
 0x1a7   : > { %v1774_v2 = vadd.f32 %v1726_v0, %v1674_v55  ;;  %v7226_v29 = vrot.slane %v7225_v27, 1  ;;  %v7227_v23 = vrot.slane %v5944_v45, 1  ;;  %v2904_v21 = vmul.f32 %v5939_v5, %v2849_v58 }
 0x1a8   : > { %v2958_v40 = vadd.f32 %v5957_v37, %v2903_v48  ;;  %v2740_v22 = vsel %vm1519_vm4, %v2737_v24, %v2739_v54  ;;  %v1308_v14 = vrot.slane %v6153_v46, 1  ;;  %v1450_v0 = vmul.f32 %v4838_v47, %v5920_v42 }
 0x1a9   : > { %v1304_v3 = vsel %vm1274_vm3, %v7227_v23, %v7226_v29  ;;  %v1986_v59 = vadd.f32 %v1889_v41, %v1774_v2  ;;  %v1566_v61 = vrot.slane %v7228_v17, 2  ;;  %v2959_v55 = vadd.f32 %v5957_v37, %v2904_v21 }
 0x1aa   : > { %v1399_v32 = vadd.f32 %v1304_v3, %v1138_v30  ;;  %v3006_v45 = vmax.f32 %v2958_v40, 0.0  ;;  %v1728_v58 = vmul.f32 %v4859_v7, %v6027_v26  ;;  %v6172_v41 = vadd.f32 %v1308_v14, %v1143_v8 }
 0x1ab   : > { %v2262_v13 = vadd.f32 %v2152_v53, %v1986_v59  ;;  %v1565_v30 = vrot.slane %v1450_v0, 2  ;;  %v6175_v24 = vmul.f32 %v4859_v7, %v1078_v11  ;;  %v1818_v42 = vmul.f32 %v4875_v20, %v6027_v26 }
 0x1ac   : > { %v3095_v48 = vld [vmem:[#allocation3 + $0x78] sm:$0xff]  ;;  %v3007_v2 = vmax.f32 %v2959_v55, 0.0  ;;  %3056 = vst.msk [vmem:[#allocation3 + $0x79] sm:$0x80] %vm3030_vm5, %v3006_v45  ;;  %v6182_v53 = vmul.f32 %v6100_v35, %v4875_v20  ;;  %v2039_v8 = vmul.f32 %v4852_v63, %v6027_v26  ;;  %v2040_v21 = vmul.f32 %v6100_v35, %v4852_v63 }
 0x1ad   : > { %v2362_v54 = vadd.f32 %v2314_v31, %v2262_v13  ;;  %4239 = vmatmul.mubr.msk.f32.gmra.mxu1 %vm910_vm2, %v3095_v48  ;;  %v1567_v29 = vsel %vm1519_vm4, %v1565_v30, %v1566_v61  ;;  %v1675_v23 = vadd.f32 %v1565_v30, %v5968_v10  ;;  %v1891_v3 = vrot.slane %v1818_v42, 1  ;;  %v6203_v48 = vld [vmem:[#allocation2 + $0x170] sm:$0xff] }
 0x1ae   : > { %3057 = vst.msk [vmem:[#allocation3 + $0x81] sm:$0xff] %vm910_vm2, %v3007_v2  ;;  %v1676_v40 = vadd.f32 %v1567_v29, %v1399_v32  ;;  %v1892_v59 = vrot.slane %v6182_v53, 1  ;;  %v2153_v0 = vrot.slane %v2039_v8, 2  ;;  %v2154_v55 = vrot.slane %v2040_v21, 2  ;;  %v1081_v2 = vld [vmem:[#allocation2 + $0x178] sm:$0xff] }
 0x1af   : > { %v2574_v31 = vadd.f32 %v2477_v1, %v2362_v54  ;;  %v1775_v17 = vadd.f32 %v6075_v62, %v1675_v23  ;;  %v2315_v45 = vmul.f32 %v4890_v28, %v1078_v11  ;;  %v2316_v10 = vmul.f32 %v4890_v28, %v6134_v15 }
 0x1b0   : > { %v1776_v30 = vadd.f32 %v1728_v58, %v1676_v40  ;;  %v1893_v42 = vsel %vm1274_vm3, %v1891_v3, %v1892_v59  ;;  %v2406_v56 = vmul.f32 %v4913_v38, %v6134_v15  ;;  %v2155_v32 = vsel %vm1519_vm4, %v2153_v0, %v2154_v55 }
 0x1b1   : > { %v2850_v13 = vadd.f32 %v2740_v22, %v2574_v31  ;;  %v1987_v1 = vadd.f32 %v1891_v3, %v1775_v17  ;;  %v6207_v62 = vmul.f32 %v6203_v48, %v4913_v38  ;;  %v2627_v11 = vmul.f32 %v4868_v12, %v6134_v15 }
 0x1b2   : > { %v1988_v58 = vadd.f32 %v1893_v42, %v1776_v30  ;;  %v2479_v54 = vrot.slane %v2406_v56, 1  ;;  %v2628_v53 = vmul.f32 %v6203_v48, %v4868_v12  ;;  %v1139_v3 = vmul.f32 %v5998_v6, %v4842_v51 }
 0x1b3   : > { %v2905_v22 = vmul.f32 %v5939_v5, %v2850_v13  ;;  %v2263_v8 = vadd.f32 %v2153_v0, %v1987_v1  ;;  %v2480_v29 = vrot.slane %v6207_v62, 1  ;;  %v2741_v23 = vrot.slane %v2627_v11, 2 }
 0x1b4   : > { %v2264_v31 = vadd.f32 %v2155_v32, %v1988_v58  ;;  %v2742_v40 = vrot.slane %v2628_v53, 2  ;;  %v6219_v17 = vmul.f32 %v4838_v47, %v1081_v2  ;;  %v7229_v0 = vrot.slane %v7225_v27, 1 }
 0x1b5   : > { %v2960_v21 = vadd.f32 %v5957_v37, %v2905_v22  ;;  %v3096_v13 = vld [vmem:[#allocation3 + $0x80] sm:$0xff]  ;;  %v2363_v30 = vadd.f32 %v2315_v45, %v2263_v8  ;;  %v2481_v42 = vsel %vm1274_vm3, %v2479_v54, %v2480_v29  ;;  %v1569_v6 = vsel %vm1519_vm4, %v1566_v61, %v1568_v52  ;;  %v6232_v45 = vld [vmem:[#allocation2 + $0x188] sm:$0xff] }
 0x1b6   : > { %v1400_v56 = vadd.f32 %v7229_v0, %v1139_v3  ;;  %4241 = vmatprep.mubr.msk.f32.mxu1 %vm910_vm2, %v3096_v13  ;;  %v2364_v32 = vadd.f32 %v2316_v10, %v2264_v31  ;;  %v2743_v11 = vsel %vm1519_vm4, %v2741_v23, %v2742_v40  ;;  %v1578_v22 = vrot.slane %v6219_v17, 2 }
 0x1b7   : > { %v3008_v1 = vmax.f32 %v2960_v21, 0.0  ;;  %v2575_v58 = vadd.f32 %v2479_v54, %v2363_v30  ;;  %v1729_v27 = vmul.f32 %v6100_v35, %v4859_v7  ;;  %v6237_v8 = vmul.f32 %v4852_v63, %v1081_v2 }
 0x1b8   : > { %v1677_v53 = vadd.f32 %v1569_v6, %v1400_v56  ;;  %v2576_v52 = vadd.f32 %v2481_v42, %v2364_v32  ;;  %v2157_v61 = vsel %vm1519_vm4, %v2154_v55, %v2156_v4  ;;  %v2317_v10 = vmul.f32 %v6203_v48, %v4890_v28  ;;  %v7230_v56 = vld [vmem:[#allocation30_spill] sm:$0xff] }
 0x1b9   : > { %3058 = vst.msk [vmem:[#allocation3 + $0x89] sm:$0x7f] %vm3033_vm6, %v3008_v1  ;;  %v2629_v54 = vmul.f32 %v4868_v12, %v1081_v2  ;;  %v2851_v3 = vadd.f32 %v2741_v23, %v2575_v58  ;;  %v2161_v31 = vrot.slane %v6237_v8, 2  ;;  %v1141_v13 = vmul.f32 %v4842_v51, %v6027_v26 }
 0x1ba   : > { %v1777_v21 = vadd.f32 %v1729_v27, %v1677_v53  ;;  %v2852_v30 = vadd.f32 %v2743_v11, %v2576_v52  ;;  %v1146_v42 = vmul.f32 %v4842_v51, %v1082_v57  ;;  %v6252_v16 = vmul.f32 %v4834_v43, %v6232_v45  ;;  %v7232_v52 = vld [vmem:[#allocation31_spill] sm:$0xff] }
 0x1bb   : > { %v2744_v0 = vrot.slane %v2629_v54, 2  ;;  %v2906_v4 = vmul.f32 %v5939_v5, %v2851_v3  ;;  %v7231_v2 = vrot.slane %v7230_v56, 1  ;;  %v1453_v6 = vmul.f32 %v4838_v47, %v6027_v26 }
 0x1bc   : > { %v1989_v55 = vadd.f32 %v1892_v59, %v1777_v21  ;;  %v2907_v1 = vmul.f32 %v5939_v5, %v2852_v30  ;;  %v1311_v11 = vrot.slane %v6252_v16, 1  ;;  %v1571_v54 = vrot.slane %v7232_v52, 2 }
 0x1bd   : > { %v1307_v23 = vsel %vm1274_vm3, %v1305_v33, %v7231_v2  ;;  %v2745_v32 = vsel %vm1519_vm4, %v2742_v40, %v2744_v0  ;;  %v2961_v53 = vadd.f32 %v5957_v37, %v2906_v4  ;;  %v1570_v59 = vrot.slane %v1453_v6, 2 }
 0x1be   : > { %v1402_v58 = vadd.f32 %v1307_v23, %v1141_v13  ;;  %v2265_v27 = vadd.f32 %v2157_v61, %v1989_v55  ;;  %v2962_v9 = vadd.f32 %v5957_v37, %v2907_v1  ;;  %v6270_v33 = vadd.f32 %v1311_v11, %v1146_v42 }
 0x1bf   : > { %v1731_v26 = vmul.f32 %v4859_v7, %v6134_v15  ;;  %v6275_v40 = vmul.f32 %v4859_v7, %v1082_v57  ;;  %v3009_v21 = vmax.f32 %v2961_v53, 0.0  ;;  %v1572_v61 = vsel %vm1519_vm4, %v1570_v59, %v1571_v54 }
 0x1c0   : > { %v3097_v3 = vld [vmem:[#allocation3 + $0x88] sm:$0xff]  ;;  %v2365_v13 = vadd.f32 %v2317_v10, %v2265_v27  ;;  %v1678_v30 = vadd.f32 %v1570_v59, %v6068_v18  ;;  %v3010_v0 = vmax.f32 %v2962_v9, 0.0  ;;  %v1679_v4 = vadd.f32 %v1572_v61, %v1402_v58  ;;  %v1085_v61 = vld [vmem:[#allocation2 + $0x198] sm:$0xff] }
 0x1c1   : > { %4242 = vmatmul.mubr.msk.f32.gmra.mxu1 %vm910_vm2, %v3097_v3  ;;  %v1820_v42 = vmul.f32 %v4875_v20, %v6134_v15  ;;  %v6284_v55 = vmul.f32 %v6203_v48, %v4875_v20  ;;  %3059 = vst.msk [vmem:[#allocation3 + $0x89] sm:$0x80] %vm3030_vm5, %v3009_v21  ;;  %v2042_v18 = vmul.f32 %v4852_v63, %v6134_v15  ;;  %v6302_v3 = vld [vmem:[#allocation2 + $0x190] sm:$0xff] }
 0x1c2   : > { %v2577_v10 = vadd.f32 %v2480_v29, %v2365_v13  ;;  %v1778_v2 = vadd.f32 %v6175_v24, %v1678_v30  ;;  %v2043_v23 = vmul.f32 %v6203_v48, %v4852_v63  ;;  %3060 = vst.msk [vmem:[#allocation3 + $0x91] sm:$0xff] %vm910_vm2, %v3010_v0  ;;  %v1779_v6 = vadd.f32 %v1731_v26, %v1679_v4 }
 0x1c3   : > { %v1894_v1 = vrot.slane %v1820_v42, 1  ;;  %v1895_v58 = vrot.slane %v6284_v55, 1  ;;  %v2318_v53 = vmul.f32 %v4890_v28, %v1082_v57  ;;  %v2158_v59 = vrot.slane %v2042_v18, 2 }
 0x1c4   : > { %v2853_v27 = vadd.f32 %v2745_v32, %v2577_v10  ;;  %v2159_v62 = vrot.slane %v2043_v23, 2  ;;  %v2319_v24 = vmul.f32 %v4890_v28, %v6232_v45  ;;  %v2408_v9 = vmul.f32 %v4913_v38, %v6232_v45 }
 0x1c5   : > { %v1896_v29 = vsel %vm1274_vm3, %v1894_v1, %v1895_v58  ;;  %v1990_v52 = vadd.f32 %v1894_v1, %v1778_v2  ;;  %v6306_v26 = vmul.f32 %v6302_v3, %v4913_v38  ;;  %v2630_v13 = vmul.f32 %v4868_v12, %v6232_v45 }
 0x1c6   : > { %v2908_v57 = vmul.f32 %v5939_v5, %v2853_v27  ;;  %v1991_v32 = vadd.f32 %v1896_v29, %v1779_v6  ;;  %v2160_v21 = vsel %vm1519_vm4, %v2158_v59, %v2159_v62  ;;  %v2482_v0 = vrot.slane %v2408_v9, 1 }
 0x1c7   : > { %v2266_v30 = vadd.f32 %v2158_v59, %v1990_v52  ;;  %v2483_v4 = vrot.slane %v6306_v26, 1  ;;  %v2631_v42 = vmul.f32 %v6302_v3, %v4868_v12  ;;  %v2746_v2 = vrot.slane %v2630_v13, 2 }
 0x1c8   : > { %v2963_v55 = vadd.f32 %v5957_v37, %v2908_v57  ;;  %v2267_v10 = vadd.f32 %v2160_v21, %v1991_v32  ;;  %v1142_v18 = vmul.f32 %v6100_v35, %v4842_v51  ;;  %v6322_v27 = vmul.f32 %v4838_v47, %v1085_v61 }
 0x1c9   : > { %v2366_v23 = vadd.f32 %v2318_v53, %v2266_v30  ;;  %v2484_v6 = vsel %vm1274_vm3, %v2482_v0, %v2483_v4  ;;  %v2747_v1 = vrot.slane %v2631_v42, 2  ;;  %v3098_v59 = vld [vmem:[#allocation3 + $0x90] sm:$0xff]  ;;  %v7233_v9 = vrot.slane %v7230_v56, 1  ;;  %v1086_v30 = vld [vmem:[#allocation2 + $0x1a0] sm:$0xff]  ;;  %v6334_v42 = vld [vmem:[#allocation2 + $0x1a8] sm:$0xff] }
 0x1ca   : > { %v3011_v29 = vmax.f32 %v2963_v55, 0.0  ;;  %v2367_v52 = vadd.f32 %v2319_v24, %v2267_v10  ;;  %v1574_v32 = vsel %vm1519_vm4, %v1571_v54, %v1573_v36  ;;  %4244 = vmatprep.mubr.msk.f32.mxu1 %vm910_vm2, %v3098_v59  ;;  %v1583_v21 = vrot.slane %v6322_v27, 2 }
 0x1cb   : > { %v1403_v57 = vadd.f32 %v7233_v9, %v1142_v18  ;;  %v2578_v35 = vadd.f32 %v2482_v0, %v2366_v23  ;;  %v2748_v53 = vsel %vm1519_vm4, %v2746_v2, %v2747_v1  ;;  %v1732_v13 = vmul.f32 %v6203_v48, %v4859_v7 }
 0x1cc   : > { %3061 = vst.msk [vmem:[#allocation3 + $0x99] sm:$0x7f] %vm3033_vm6, %v3011_v29  ;;  %v2579_v56 = vadd.f32 %v2484_v6, %v2367_v52  ;;  %v6338_v60 = vmul.f32 %v4852_v63, %v1085_v61  ;;  %v2162_v36 = vsel %vm1519_vm4, %v2159_v62, %v2161_v31  ;;  %v2320_v0 = vmul.f32 %v6302_v3, %v4890_v28  ;;  %v7234_v62 = vld [vmem:[#allocation32_spill] sm:$0xff] }
 0x1cd   : > { %v1680_v24 = vadd.f32 %v1574_v32, %v1403_v57  ;;  %v2854_v54 = vadd.f32 %v2746_v2, %v2578_v35  ;;  %v2632_v55 = vmul.f32 %v4868_v12, %v1085_v61  ;;  %v1144_v10 = vmul.f32 %v4842_v51, %v6134_v15 }
 0x1ce   : > { %v2855_v18 = vadd.f32 %v2748_v53, %v2579_v56  ;;  %v2166_v6 = vrot.slane %v6338_v60, 2  ;;  %v1149_v59 = vmul.f32 %v4842_v51, %v1086_v30  ;;  %v6353_v31 = vmul.f32 %v4834_v43, %v6334_v42  ;;  %v7236_v56 = vld [vmem:[#allocation33_spill] sm:$0xff] }
 0x1cf   : > { %v1780_v23 = vadd.f32 %v1732_v13, %v1680_v24  ;;  %v2909_v29 = vmul.f32 %v5939_v5, %v2854_v54  ;;  %v2749_v8 = vrot.slane %v2632_v55, 2  ;;  %v7235_v2 = vrot.slane %v7234_v62, 1 }
 0x1d0   : > { %v2910_v52 = vmul.f32 %v5939_v5, %v2855_v18  ;;  %v1456_v32 = vmul.f32 %v4838_v47, %v6134_v15  ;;  %v7109_v13 = vrot.slane %v6353_v31, 1  ;;  %v1576_v24 = vrot.slane %v7236_v56, 2 }
 0x1d1   : > { %v1310_v61 = vsel %vm1274_vm3, %v1308_v14, %v7235_v2  ;;  %v1992_v9 = vadd.f32 %v1895_v58, %v1780_v23  ;;  %v2964_v35 = vadd.f32 %v5957_v37, %v2909_v29  ;;  %v2750_v53 = vsel %vm1519_vm4, %v2747_v1, %v2749_v8 }
 0x1d2   : > { %v1405_v57 = vadd.f32 %v1310_v61, %v1144_v10  ;;  %v2965_v54 = vadd.f32 %v5957_v37, %v2910_v52  ;;  %v1575_v55 = vrot.slane %v1456_v32, 2  ;;  %v1734_v14 = vmul.f32 %v4859_v7, %v6232_v45 }
 0x1d3   : > { %v2268_v46 = vadd.f32 %v2162_v36, %v1992_v9  ;;  %v3099_v58 = vld [vmem:[#allocation3 + $0x98] sm:$0xff]  ;;  %v3012_v10 = vmax.f32 %v2964_v35, 0.0  ;;  %v6372_v15 = vadd.f32 %v7109_v13, %v1149_v59  ;;  %v6375_v18 = vmul.f32 %v4859_v7, %v1086_v30 }
 0x1d4   : > { %v1822_v1 = vmul.f32 %v4875_v20, %v6232_v45  ;;  %4245 = vmatmul.mubr.msk.f32.gmra.mxu1 %vm910_vm2, %v3099_v58  ;;  %v3013_v23 = vmax.f32 %v2965_v54, 0.0  ;;  %v1577_v29 = vsel %vm1519_vm4, %v1575_v55, %v1576_v24  ;;  %v1681_v8 = vadd.f32 %v1575_v55, %v6172_v41 }
 0x1d5   : > { %v2368_v36 = vadd.f32 %v2320_v0, %v2268_v46  ;;  %3062 = vst.msk [vmem:[#allocation3 + $0x99] sm:$0x80] %vm3030_vm5, %v3012_v10  ;;  %v1682_v2 = vadd.f32 %v1577_v29, %v1405_v57  ;;  %v6385_v59 = vmul.f32 %v6302_v3, %v4875_v20  ;;  %v2045_v52 = vmul.f32 %v4852_v63, %v6232_v45  ;;  %v1089_v29 = vld [vmem:[#allocation2 + $0x1b8] sm:$0xff] }
 0x1d6   : > { %v1897_v61 = vrot.slane %v1822_v1, 1  ;;  %3063 = vst.msk [vmem:[#allocation3 + $0xa1] sm:$0xff] %vm910_vm2, %v3013_v23  ;;  %v1781_v9 = vadd.f32 %v6275_v40, %v1681_v8  ;;  %v2046_v41 = vmul.f32 %v6302_v3, %v4852_v63  ;;  %v2321_v57 = vmul.f32 %v4890_v28, %v1086_v30 }
 0x1d7   : > { %v2580_v0 = vadd.f32 %v2483_v4, %v2368_v36  ;;  %v1782_v32 = vadd.f32 %v1734_v14, %v1682_v2  ;;  %v1898_v35 = vrot.slane %v6385_v59, 1  ;;  %v2163_v56 = vrot.slane %v2045_v52, 2  ;;  %v6402_v4 = vld [vmem:[#allocation2 + $0x1b0] sm:$0xff] }
 0x1d8   : > { %v2322_v54 = vmul.f32 %v4890_v28, %v6334_v42  ;;  %v1993_v55 = vadd.f32 %v1897_v61, %v1781_v9  ;;  %v2164_v58 = vrot.slane %v2046_v41, 2  ;;  %v2410_v26 = vmul.f32 %v4913_v38, %v6334_v42 }
 0x1d9   : > { %v2856_v46 = vadd.f32 %v2750_v53, %v2580_v0  ;;  %v1899_v40 = vsel %vm1274_vm3, %v1897_v61, %v1898_v35  ;;  %v6406_v30 = vmul.f32 %v6402_v4, %v4913_v38  ;;  %v2633_v14 = vmul.f32 %v4868_v12, %v6334_v42 }
 0x1da   : > { %v2634_v10 = vmul.f32 %v6402_v4, %v4868_v12  ;;  %v1994_v1 = vadd.f32 %v1899_v40, %v1782_v32  ;;  %v2165_v23 = vsel %vm1519_vm4, %v2163_v56, %v2164_v58  ;;  %v2269_v36 = vadd.f32 %v2163_v56, %v1993_v55 }
 0x1db   : > { %v2911_v53 = vmul.f32 %v5939_v5, %v2856_v46  ;;  %v2485_v8 = vrot.slane %v2410_v26, 1  ;;  %v2486_v2 = vrot.slane %v6406_v30, 1  ;;  %v2751_v59 = vrot.slane %v2633_v14, 2 }
 0x1dc   : > { %v2752_v61 = vrot.slane %v2634_v10, 2  ;;  %v2270_v0 = vadd.f32 %v2165_v23, %v1994_v1  ;;  %v2369_v9 = vadd.f32 %v2321_v57, %v2269_v36  ;;  %v1145_v41 = vmul.f32 %v6203_v48, %v4842_v51  ;;  %v6431_v10 = vld [vmem:[#allocation2 + $0x1c8] sm:$0xff] }
 0x1dd   : > { %v2966_v52 = vadd.f32 %v5957_v37, %v2911_v53  ;;  %v3100_v13 = vld [vmem:[#allocation3 + $0xa0] sm:$0xff]  ;;  %v2487_v32 = vsel %vm1274_vm3, %v2485_v8, %v2486_v2  ;;  %v6423_v46 = vmul.f32 %v4838_v47, %v1089_v29  ;;  %v1579_v55 = vsel %vm1519_vm4, %v1576_v24, %v1578_v22 }
 0x1de   : > { %v2753_v56 = vsel %vm1519_vm4, %v2751_v59, %v2752_v61  ;;  %4247 = vmatprep.mubr.msk.f32.mxu1 %vm910_vm2, %v3100_v13  ;;  %v2370_v26 = vadd.f32 %v2322_v54, %v2270_v0  ;;  %v2581_v40 = vadd.f32 %v2485_v8, %v2369_v9  ;;  %v7237_v48 = vrot.slane %v7234_v62, 1  ;;  %v1090_v54 = vld [vmem:[#allocation2 + $0x1c0] sm:$0xff] }
 0x1df   : > { %v3014_v57 = vmax.f32 %v2966_v52, 0.0  ;;  %v1588_v53 = vrot.slane %v6423_v46, 2  ;;  %v1735_v1 = vmul.f32 %v6302_v3, %v4859_v7  ;;  %v6437_v23 = vmul.f32 %v4852_v63, %v1089_v29 }
 0x1e0   : > { %v1406_v14 = vadd.f32 %v7237_v48, %v1145_v41  ;;  %v2167_v17 = vsel %vm1519_vm4, %v2164_v58, %v2166_v6  ;;  %v2582_v22 = vadd.f32 %v2487_v32, %v2370_v26  ;;  %v2857_v13 = vadd.f32 %v2751_v59, %v2581_v40  ;;  %v7238_v41 = vld [vmem:[#allocation36_spill] sm:$0xff] }
 0x1e1   : > { %3064 = vst.msk [vmem:[#allocation3 + $0xa9] sm:$0x7f] %vm3033_vm6, %v3014_v57  ;;  %v2323_v24 = vmul.f32 %v6402_v4, %v4890_v28  ;;  %v2171_v36 = vrot.slane %v6437_v23, 2  ;;  %v2635_v8 = vmul.f32 %v4868_v12, %v1089_v29  ;;  %v1147_v52 = vmul.f32 %v4842_v51, %v6232_v45  ;;  %v7240_v57 = vld [vmem:[#allocation37_spill] sm:$0xff] }
 0x1e2   : > { %v1683_v62 = vadd.f32 %v1579_v55, %v1406_v14  ;;  %v1152_v60 = vmul.f32 %v4842_v51, %v1090_v54  ;;  %v2858_v0 = vadd.f32 %v2753_v56, %v2582_v22  ;;  %v2912_v6 = vmul.f32 %v5939_v5, %v2857_v13 }
 0x1e3   : > { %v6453_v59 = vmul.f32 %v4834_v43, %v6431_v10  ;;  %v2754_v9 = vrot.slane %v2635_v8, 2  ;;  %v7239_v32 = vrot.slane %v7238_v41, 1  ;;  %v1459_v55 = vmul.f32 %v4838_v47, %v6232_v45 }
 0x1e4   : > { %v1783_v58 = vadd.f32 %v1735_v1, %v1683_v62  ;;  %v1581_v26 = vrot.slane %v7240_v57, 2  ;;  %v2913_v56 = vmul.f32 %v5939_v5, %v2858_v0  ;;  %v2967_v40 = vadd.f32 %v5957_v37, %v2912_v6 }
 0x1e5   : > { %v1313_v29 = vsel %vm1274_vm3, %v1311_v11, %v7239_v32  ;;  %v1317_v43 = vrot.slane %v6453_v59, 1  ;;  %v2755_v14 = vsel %vm1519_vm4, %v2752_v61, %v2754_v9  ;;  %v1580_v22 = vrot.slane %v1459_v55, 2 }
 0x1e6   : > { %v1995_v48 = vadd.f32 %v1898_v35, %v1783_v58  ;;  %v1408_v1 = vadd.f32 %v1313_v29, %v1147_v52  ;;  %v1737_v16 = vmul.f32 %v4859_v7, %v6334_v42  ;;  %v2968_v11 = vadd.f32 %v5957_v37, %v2913_v56 }
 0x1e7   : > { %v3015_v13 = vmax.f32 %v2967_v40, 0.0  ;;  %v6472_v62 = vadd.f32 %v1317_v43, %v1152_v60  ;;  %v1582_v35 = vsel %vm1519_vm4, %v1580_v22, %v1581_v26  ;;  %v1684_v61 = vadd.f32 %v1580_v22, %v6270_v33 }
 0x1e8   : > { %v2271_v45 = vadd.f32 %v2167_v17, %v1995_v48  ;;  %v3101_v8 = vld [vmem:[#allocation3 + $0xa8] sm:$0xff]  ;;  %v6479_v52 = vmul.f32 %v4859_v7, %v1090_v54  ;;  %v1824_v0 = vmul.f32 %v4875_v20, %v6334_v42  ;;  %v3016_v17 = vmax.f32 %v2968_v11, 0.0 }
 0x1e9   : > { %4248 = vmatmul.mubr.msk.f32.gmra.mxu1 %vm910_vm2, %v3101_v8  ;;  %3065 = vst.msk [vmem:[#allocation3 + $0xa9] sm:$0x80] %vm3030_vm5, %v3015_v13  ;;  %v1685_v6 = vadd.f32 %v1582_v35, %v1408_v1  ;;  %v6487_v58 = vmul.f32 %v6402_v4, %v4875_v20  ;;  %v1784_v9 = vadd.f32 %v6375_v18, %v1684_v61  ;;  %v6504_v8 = vld [vmem:[#allocation2 + $0x1d0] sm:$0xff]  ;;  %v1093_v61 = vld [vmem:[#allocation2 + $0x1d8] sm:$0xff] }
 0x1ea   : > { %v2371_v60 = vadd.f32 %v2323_v24, %v2271_v45  ;;  %v1900_v33 = vrot.slane %v1824_v0, 1  ;;  %v2048_v32 = vmul.f32 %v4852_v63, %v6334_v42  ;;  %v2049_v29 = vmul.f32 %v6402_v4, %v4852_v63  ;;  %3066 = vst.msk [vmem:[#allocation3 + $0xb1] sm:$0xff] %vm910_vm2, %v3016_v17 }
 0x1eb   : > { %v1785_v24 = vadd.f32 %v1737_v16, %v1685_v6  ;;  %v1901_v56 = vrot.slane %v6487_v58, 1  ;;  %v2324_v40 = vmul.f32 %v4890_v28, %v1090_v54  ;;  %v2325_v22 = vmul.f32 %v4890_v28, %v6431_v10 }
 0x1ec   : > { %v2583_v55 = vadd.f32 %v2486_v2, %v2371_v60  ;;  %v1996_v48 = vadd.f32 %v1900_v33, %v1784_v9  ;;  %v2168_v1 = vrot.slane %v2048_v32, 2  ;;  %v2169_v18 = vrot.slane %v2049_v29, 2 }
 0x1ed   : > { %v1902_v13 = vsel %vm1274_vm3, %v1900_v33, %v1901_v56  ;;  %v2412_v45 = vmul.f32 %v4913_v38, %v6431_v10  ;;  %v6508_v30 = vmul.f32 %v6504_v8, %v4913_v38  ;;  %v2636_v35 = vmul.f32 %v4868_v12, %v6431_v10 }
 0x1ee   : > { %v2859_v11 = vadd.f32 %v2755_v14, %v2583_v55  ;;  %v1997_v2 = vadd.f32 %v1902_v13, %v1785_v24  ;;  %v2170_v54 = vsel %vm1519_vm4, %v2168_v1, %v2169_v18  ;;  %v2272_v16 = vadd.f32 %v2168_v1, %v1996_v48 }
 0x1ef   : > { %v2488_v0 = vrot.slane %v2412_v45, 1  ;;  %v2489_v17 = vrot.slane %v6508_v30, 1  ;;  %v2637_v60 = vmul.f32 %v6504_v8, %v4868_v12  ;;  %v2756_v9 = vrot.slane %v2636_v35, 2 }
 0x1f0   : > { %v2914_v14 = vmul.f32 %v5939_v5, %v2859_v11  ;;  %v2273_v6 = vadd.f32 %v2170_v54, %v1997_v2  ;;  %v2372_v58 = vadd.f32 %v2324_v40, %v2272_v16  ;;  %v1148_v33 = vmul.f32 %v6302_v3, %v4842_v51 }
 0x1f1   : > { %v2490_v29 = vsel %vm1274_vm3, %v2488_v0, %v2489_v17  ;;  %v2757_v55 = vrot.slane %v2637_v60, 2  ;;  %v6524_v5 = vmul.f32 %v4838_v47, %v1093_v61  ;;  %v3102_v24 = vld [vmem:[#allocation3 + $0xb0] sm:$0xff]  ;;  %v7241_v11 = vrot.slane %v7238_v41, 1 }
 0x1f2   : > { %v2969_v32 = vadd.f32 %v5957_v37, %v2914_v14  ;;  %v2373_v48 = vadd.f32 %v2325_v22, %v2273_v6  ;;  %v2584_v1 = vadd.f32 %v2488_v0, %v2372_v58  ;;  %v1584_v37 = vsel %vm1519_vm4, %v1581_v26, %v1583_v21  ;;  %4250 = vmatprep.mubr.msk.f32.mxu1 %vm910_vm2, %v3102_v24  ;;  %v6553_v14 = vld [vmem:[%s7055_s5] ss:$0 sm:$0xff]  ;;  %v7242_v58 = vld [vmem:[#allocation38_spill] sm:$0xff] }
 0x1f3   : > { %v1409_v40 = vadd.f32 %v7241_v11, %v1148_v33  ;;  %v2758_v13 = vsel %vm1519_vm4, %v2756_v9, %v2757_v55  ;;  %v1593_v45 = vrot.slane %v6524_v5, 2  ;;  %v1738_v22 = vmul.f32 %v6402_v4, %v4859_v7  ;;  %v6569_v24 = vld [vmem:[%s7056_s6] ss:$0 sm:$0xff] }
 0x1f4   : > { %v3017_v3 = vmax.f32 %v2969_v32, 0.0  ;;  %v2585_v2 = vadd.f32 %v2490_v29, %v2373_v48  ;;  %v2860_v54 = vadd.f32 %v2756_v9, %v2584_v1  ;;  %v6539_v16 = vmul.f32 %v4852_v63, %v1093_v61 }
 0x1f5   : > { %v1686_v41 = vadd.f32 %v1584_v37, %v1409_v40  ;;  %v2172_v27 = vsel %vm1519_vm4, %v2169_v18, %v2171_v36  ;;  %v2326_v21 = vmul.f32 %v6504_v8, %v4890_v28  ;;  %v2638_v57 = vmul.f32 %v4868_v12, %v1093_v61  ;;  %v1094_v36 = vld [vmem:[#allocation2 + $0x1e0] sm:$0xff] }
 0x1f6   : > { %3067 = vst.msk [vmem:[#allocation3 + $0xb9] sm:$0x7f] %vm3033_vm6, %v3017_v3  ;;  %v1150_v26 = vmul.f32 %v4842_v51, %v6334_v42  ;;  %v2861_v35 = vadd.f32 %v2758_v13, %v2585_v2  ;;  %v2915_v0 = vmul.f32 %v6553_v14, %v2860_v54  ;;  %v2176_v23 = vrot.slane %v6539_v16, 2  ;;  %v7246_v13 = vld [vmem:[#allocation39_spill] sm:$0xff] }
 0x1f7   : > { %v1786_v60 = vadd.f32 %v1738_v22, %v1686_v41  ;;  %v2759_v18 = vrot.slane %v2638_v57, 2  ;;  %v1155_v6 = vmul.f32 %v4842_v51, %v1094_v36  ;;  %v7243_v61 = vrot.slane %v7242_v58, 1 }
 0x1f8   : > { %v7244_v9 = vrot.slane %v6353_v31, 1  ;;  %v1462_v32 = vmul.f32 %v4838_v47, %v6334_v42  ;;  %v2916_v29 = vmul.f32 %v6553_v14, %v2861_v35  ;;  %v2970_v48 = vadd.f32 %v6569_v24, %v2915_v0 }
 0x1f9   : > { %v1998_v1 = vadd.f32 %v1901_v56, %v1786_v60  ;;  %v2760_v40 = vsel %vm1519_vm4, %v2757_v55, %v2759_v18  ;;  %v7245_v31 = vrot.slane %v5458_v34, 1  ;;  %v1586_v42 = vrot.slane %v7246_v13, 2 }
 0x1fa   : > { %v1316_v33 = vsel %vm1274_vm3, %v7244_v9, %v7243_v61  ;;  %v1585_v3 = vrot.slane %v1462_v32, 2  ;;  %v2971_v22 = vadd.f32 %v6569_v24, %v2916_v29  ;;  %v3018_v2 = vmax.f32 %v2970_v48, 0.0 }
 0x1fb   : > { %v1411_v11 = vadd.f32 %v1316_v33, %v1150_v26  ;;  %v6575_v37 = vadd.f32 %v7245_v31, %v1155_v6  ;;  %v2274_v54 = vadd.f32 %v2172_v27, %v1998_v1  ;;  %v1740_v41 = vmul.f32 %v4859_v7, %v6431_v10  ;;  %v6604_v1 = vld [vmem:[#allocation2 + $0x1e8] sm:$0xff] }
 0x1fc   : > { %v1587_v57 = vsel %vm1519_vm4, %v1585_v3, %v1586_v42  ;;  %v1687_v56 = vadd.f32 %v1585_v3, %v6372_v15  ;;  %v6584_v55 = vmul.f32 %v4859_v7, %v1094_v36  ;;  %v1826_v34 = vmul.f32 %v4875_v20, %v6431_v10  ;;  %3068 = vst.msk [vmem:[#allocation3 + $0xb9] sm:$0x80] %vm3030_vm5, %v3018_v2 }
 0x1fd   : > { %v3103_v26 = vld [vmem:[#allocation3 + $0xb8] sm:$0xff]  ;;  %v3019_v35 = vmax.f32 %v2971_v22, 0.0  ;;  %v2374_v0 = vadd.f32 %v2326_v21, %v2274_v54  ;;  %v1688_v60 = vadd.f32 %v1587_v57, %v1411_v11  ;;  %v6591_v27 = vmul.f32 %v6504_v8, %v4875_v20 }
 0x1fe   : > { %4251 = vmatmul.mubr.msk.f32.gmra.mxu1 %vm910_vm2, %v3103_v26  ;;  %v1787_v15 = vadd.f32 %v6479_v52, %v1687_v56  ;;  %v1903_v18 = vrot.slane %v1826_v34, 1  ;;  %v2051_v6 = vmul.f32 %v4852_v63, %v6431_v10  ;;  %v2052_v61 = vmul.f32 %v6504_v8, %v4852_v63 }
 0x1ff   : > { %3069 = vst.msk [vmem:[#allocation3 + $0xc1] sm:$0xff] %vm910_vm2, %v3019_v35  ;;  %v2586_v21 = vadd.f32 %v2489_v17, %v2374_v0  ;;  %v1788_v9 = vadd.f32 %v1740_v41, %v1688_v60  ;;  %v1904_v33 = vrot.slane %v6591_v27, 1  ;;  %v2327_v32 = vmul.f32 %v4890_v28, %v1094_v36  ;;  %v6611_v17 = vld [vmem:[#allocation2 + $0x1f0] sm:$0xff]  ;;  %v1097_v41 = vld [vmem:[#allocation2 + $0x1f8] sm:$0xff] }
 0x200   : > { %v1999_v29 = vadd.f32 %v1903_v18, %v1787_v15  ;;  %v2173_v48 = vrot.slane %v2051_v6, 2  ;;  %v2174_v52 = vrot.slane %v2052_v61, 2  ;;  %v2328_v11 = vmul.f32 %v6604_v1, %v4890_v28 }
 0x201   : > { %v2862_v31 = vadd.f32 %v2760_v40, %v2586_v21  ;;  %v1905_v3 = vsel %vm1274_vm3, %v1903_v18, %v1904_v33  ;;  %v2414_v30 = vmul.f32 %v6604_v1, %v4913_v38  ;;  %v6615_v13 = vmul.f32 %v6611_v17, %v4913_v38 }
 0x202   : > { %v2000_v36 = vadd.f32 %v1905_v3, %v1788_v9  ;;  %v2175_v22 = vsel %vm1519_vm4, %v2173_v48, %v2174_v52  ;;  %v2275_v2 = vadd.f32 %v2173_v48, %v1999_v29  ;;  %v2639_v54 = vmul.f32 %v6604_v1, %v4868_v12 }
 0x203   : > { %v2917_v40 = vmul.f32 %v6553_v14, %v2862_v31  ;;  %v2491_v57 = vrot.slane %v2414_v30, 1  ;;  %v2492_v56 = vrot.slane %v6615_v13, 1  ;;  %v2640_v34 = vmul.f32 %v6611_v17, %v4868_v12 }
 0x204   : > { %v2276_v26 = vadd.f32 %v2175_v22, %v2000_v36  ;;  %v2375_v35 = vadd.f32 %v2327_v32, %v2275_v2  ;;  %v2761_v0 = vrot.slane %v2639_v54, 2  ;;  %v1151_v60 = vmul.f32 %v6402_v4, %v4842_v51 }
 0x205   : > { %v2972_v27 = vadd.f32 %v6569_v24, %v2917_v40  ;;  %v2493_v15 = vsel %vm1274_vm3, %v2491_v57, %v2492_v56  ;;  %v2762_v18 = vrot.slane %v2640_v34, 2  ;;  %v6631_v6 = vmul.f32 %v4838_v47, %v1097_v41 }
 0x206   : > { %v3104_v61 = vld [vmem:[#allocation3 + $0xc0] sm:$0xff]  ;;  %v2376_v21 = vadd.f32 %v2328_v11, %v2276_v26  ;;  %v2587_v9 = vadd.f32 %v2491_v57, %v2375_v35  ;;  %v7247_v29 = vrot.slane %v7242_v58, 1  ;;  %v1589_v4 = vsel %vm1519_vm4, %v1586_v42, %v1588_v53 }
 0x207   : > { %4253 = vmatprep.mubr.msk.f32.mxu1 %vm910_vm2, %v3104_v61  ;;  %v3020_v48 = vmax.f32 %v2972_v27, 0.0  ;;  %v2763_v31 = vsel %vm1519_vm4, %v2761_v0, %v2762_v18  ;;  %v1598_v3 = vrot.slane %v6631_v6, 2  ;;  %v1741_v30 = vmul.f32 %v6504_v8, %v4859_v7  ;;  %v1098_v26 = vld [vmem:[#allocation2 + $0x200] sm:$0xff] }
 0x208   : > { %v1412_v32 = vadd.f32 %v7247_v29, %v1151_v60  ;;  %v2588_v36 = vadd.f32 %v2493_v15, %v2376_v21  ;;  %v2863_v11 = vadd.f32 %v2761_v0, %v2587_v9  ;;  %v6644_v58 = vmul.f32 %v4852_v63, %v1097_v41  ;;  %v7248_v0 = vld [vmem:[#allocation40_spill] sm:$0xff] }
 0x209   : > { %3070 = vst.msk [vmem:[#allocation3 + $0xc9] sm:$0x7f] %vm3033_vm6, %v3020_v48  ;;  %v2177_v46 = vsel %vm1519_vm4, %v2174_v52, %v2176_v23  ;;  %v2329_v53 = vmul.f32 %v6611_v17, %v4890_v28  ;;  %v2641_v42 = vmul.f32 %v4868_v12, %v1097_v41  ;;  %v1153_v2 = vmul.f32 %v4842_v51, %v6431_v10  ;;  %v7250_v41 = vld [vmem:[#allocation41_spill] sm:$0xff]  ;;  %v6808_v6 = vld [vmem:[%s7061_s11] ss:$0 sm:$0xff] }
 0x20a   : > { %v1689_v22 = vadd.f32 %v1589_v4, %v1412_v32  ;;  %v2864_v54 = vadd.f32 %v2763_v31, %v2588_v36  ;;  %v2918_v40 = vmul.f32 %v6553_v14, %v2863_v11  ;;  %v2181_v34 = vrot.slane %v6644_v58, 2  ;;  %v1103_v58 = vld [vmem:[#allocation2 + $0x228] sm:$0xff] }
 0x20b   : > { %v2764_v35 = vrot.slane %v2641_v42, 2  ;;  %v7249_v16 = vrot.slane %v7248_v0, 1  ;;  %v1465_v52 = vmul.f32 %v4838_v47, %v6431_v10  ;;  %v1591_v60 = vrot.slane %v7250_v41, 2 }
 0x20c   : > { %v1789_v57 = vadd.f32 %v1741_v30, %v1689_v22  ;;  %v2919_v27 = vmul.f32 %v6553_v14, %v2864_v54  ;;  %v2973_v15 = vadd.f32 %v6569_v24, %v2918_v40  ;;  %v1743_v32 = vmul.f32 %v6604_v1, %v4859_v7  ;;  %v4342_v40 = vld [vmem:[#allocation2 + $0x208] sm:$0xff] }
 0x20d   : > { %v1319_v23 = vsel %vm1274_vm3, %v1317_v43, %v7249_v16  ;;  %v2765_v9 = vsel %vm1519_vm4, %v2762_v18, %v2764_v35  ;;  %v1590_v29 = vrot.slane %v1465_v52, 2  ;;  %v6671_v59 = vmul.f32 %v4859_v7, %v1098_v26 }
 0x20e   : > { %v2001_v61 = vadd.f32 %v1904_v33, %v1789_v57  ;;  %v1414_v21 = vadd.f32 %v1319_v23, %v1153_v2  ;;  %v2974_v43 = vadd.f32 %v6569_v24, %v2919_v27  ;;  %v3021_v47 = vmax.f32 %v2973_v15, 0.0  ;;  %v4343_v15 = vld [vmem:[#allocation2 + $0x210] sm:$0xff] }
 0x20f   : > { %v1828_v4 = vmul.f32 %v6604_v1, %v4875_v20  ;;  %v1592_v48 = vsel %vm1519_vm4, %v1590_v29, %v1591_v60  ;;  %v1690_v33 = vadd.f32 %v1590_v29, %v6472_v62  ;;  %v6680_v18 = vmul.f32 %v6611_v17, %v4875_v20  ;;  %v6702_v29 = vpop.f32.mrf.mxu1 }
 0x210   : > { %v2277_v10 = vadd.f32 %v2177_v46, %v2001_v61  ;;  %v2054_v31 = vmul.f32 %v6604_v1, %v4852_v63  ;;  %v3105_v30 = vld [vmem:[#allocation3 + $0xc8] sm:$0xff]  ;;  %v3022_v36 = vmax.f32 %v2974_v43, 0.0  ;;  %3071 = vst.msk [vmem:[#allocation3 + $0xc9] sm:$0x80] %vm3030_vm5, %v3021_v47  ;;  %v1691_v22 = vadd.f32 %v1592_v48, %v1414_v21 }
 0x211   : > { %v1906_v46 = vrot.slane %v1828_v4, 1  ;;  %4254 = vmatmul.mubr.msk.f32.gmra.mxu1 %vm910_vm2, %v3105_v30  ;;  %v1790_v42 = vadd.f32 %v6584_v55, %v1690_v33  ;;  %v1907_v62 = vrot.slane %v6680_v18, 1  ;;  %v2055_v20 = vmul.f32 %v6611_v17, %v4852_v63  ;;  %v1101_v4 = vld [vmem:[#allocation2 + $0x218] sm:$0xff] }
 0x212   : > { %v2377_v11 = vadd.f32 %v2329_v53, %v2277_v10  ;;  %v2178_v2 = vrot.slane %v2054_v31, 2  ;;  %3072 = vst.msk [vmem:[#allocation3 + $0xd1] sm:$0xff] %vm910_vm2, %v3022_v36  ;;  %v1791_v54 = vadd.f32 %v1743_v32, %v1691_v22  ;;  %v2330_v53 = vmul.f32 %v4890_v28, %v1098_v26  ;;  %v6704_v32 = vpop.f32.mrf.mxu0 }
 0x213   : > { %v2331_v57 = vmul.f32 %v4342_v40, %v4890_v28  ;;  %v1908_v35 = vsel %vm1274_vm3, %v1906_v46, %v1907_v62  ;;  %v2002_v55 = vadd.f32 %v1906_v46, %v1790_v42  ;;  %v2179_v16 = vrot.slane %v2055_v20, 2 }
 0x214   : > { %v2589_v1 = vadd.f32 %v2492_v56, %v2377_v11  ;;  %v2416_v23 = vmul.f32 %v4342_v40, %v4913_v38  ;;  %v2003_v41 = vadd.f32 %v1908_v35, %v1791_v54  ;;  %v2642_v27 = vmul.f32 %v4342_v40, %v4868_v12  ;;  %v1102_v35 = vld [vmem:[#allocation2 + $0x220] sm:$0xff] }
 0x215   : > { %v2643_v13 = vmul.f32 %v4343_v15, %v4868_v12  ;;  %v2180_v56 = vsel %vm1519_vm4, %v2178_v2, %v2179_v16  ;;  %v2278_v61 = vadd.f32 %v2178_v2, %v2002_v55  ;;  %v1154_v21 = vmul.f32 %v6504_v8, %v4842_v51 }
 0x216   : > { %v2865_v52 = vadd.f32 %v2765_v9, %v2589_v1  ;;  %v2494_v26 = vrot.slane %v2416_v23, 1  ;;  %v2279_v9 = vadd.f32 %v2180_v56, %v2003_v41  ;;  %v2766_v47 = vrot.slane %v2642_v27, 2 }
 0x217   : > { %v2767_v10 = vrot.slane %v2643_v13, 2  ;;  %v2378_v48 = vadd.f32 %v2330_v53, %v2278_v61  ;;  %v7251_v33 = vrot.slane %v5561_v25, 1  ;;  %v7252_v31 = vrot.slane %v7248_v0, 1  ;;  %v6725_v0 = vpop.f32.mrf.mxu1 }
 0x218   : > { %v2920_v43 = vmul.f32 %v6553_v14, %v2865_v52  ;;  %v1594_v8 = vsel %vm1519_vm4, %v1591_v60, %v1593_v45  ;;  %v2379_v11 = vadd.f32 %v2331_v57, %v2279_v9  ;;  %v1744_v46 = vmul.f32 %v6611_v17, %v4859_v7  ;;  %v6727_v45 = vpop.f32.mrf.mxu0 }
 0x219   : > { %v2496_v18 = vsel %vm1274_vm3, %v2494_v26, %v7251_v33  ;;  %v1415_v30 = vadd.f32 %v7252_v31, %v1154_v21  ;;  %v2768_v22 = vsel %vm1519_vm4, %v2766_v47, %v2767_v10  ;;  %v3106_v42 = vld [vmem:[#allocation3 + $0xd0] sm:$0xff]  ;;  %v2590_v20 = vadd.f32 %v2494_v26, %v2378_v48 }
 0x21a   : > { %v2975_v36 = vadd.f32 %v6569_v24, %v2920_v43  ;;  %v6720_v1 = vmul.f32 %v4852_v63, %v1101_v4  ;;  %v2182_v5 = vsel %vm1519_vm4, %v2179_v16, %v2181_v34  ;;  %4256 = vmatprep.mubr.msk.f32.mxu1 %vm910_vm2, %v3106_v42  ;;  %v2591_v54 = vadd.f32 %v2496_v18, %v2379_v11  ;;  %v6736_v16 = vpop.f32.mrf.mxu1  ;;  %v1104_v26 = vld [vmem:[#allocation2 + $0x230] sm:$0xff] }
 0x21b   : > { %v1692_v2 = vadd.f32 %v1594_v8, %v1415_v30  ;;  %v2332_v7 = vmul.f32 %v4343_v15, %v4890_v28  ;;  %v2644_v53 = vmul.f32 %v4868_v12, %v1101_v4  ;;  %v2866_v40 = vadd.f32 %v2766_v47, %v2590_v20  ;;  %v7258_v43 = vld [vmem:[#allocation6_spill] sm:$0xff]  ;;  %v6752_v47 = vpop.f32.mrf.mxu0 }
 0x21c   : > { %v3023_v60 = vmax.f32 %v2975_v36, 0.0  ;;  %v2186_v63 = vrot.slane %v6720_v1, 2  ;;  %v7253_v34 = vrot.slane %v5510_v39, 2  ;;  %v2867_v23 = vadd.f32 %v2768_v22, %v2591_v54 }
 0x21d   : > { %v1792_v57 = vadd.f32 %v1744_v46, %v1692_v2  ;;  %v2769_v52 = vrot.slane %v2644_v53, 2  ;;  %v7254_v41 = vrot.slane %v5555_v50, 1  ;;  %v7255_v27 = vrot.slane %v5595_v19, 1  ;;  %v6771_v19 = vpop.f32.mrf.mxu0 }
 0x21e   : > { %v1693_v55 = vadd.f32 %v7253_v34, %v6575_v37  ;;  %3073 = vst.msk [vmem:[#allocation3 + $0xd9] sm:$0x7f] %vm3033_vm6, %v3023_v60  ;;  %v7256_v13 = vrot.slane %v5558_v44, 2  ;;  %v7257_v56 = vrot.slane %v5598_v49, 2  ;;  %v2921_v39 = vmul.f32 %v6553_v14, %v2866_v40  ;;  %v1105_v34 = vld [vmem:[#allocation2 + $0x238] sm:$0xff] }
 0x21f   : > { %v1911_v15 = vsel %vm1274_vm3, %v7255_v27, %v7254_v41  ;;  %v2004_v37 = vadd.f32 %v1907_v62, %v1792_v57  ;;  %v2922_v4 = vmul.f32 %v6553_v14, %v2867_v23  ;;  %v2770_v48 = vsel %vm1519_vm4, %v2767_v10, %v2769_v52  ;;  %v7262_v41 = vld [vmem:[#allocation12_spill] sm:$0xff] }
 0x220   : > { %v2185_v61 = vsel %vm1519_vm4, %v7257_v56, %v7256_v13  ;;  %v1793_v21 = vadd.f32 %v6671_v59, %v1693_v55  ;;  %v2006_v9 = vadd.f32 %v1911_v15, %v7258_v43  ;;  %v2333_v33 = vmul.f32 %v4890_v28, %v1102_v35  ;;  %v6761_v59 = vpop.f32.mrf.mxu1  ;;  %v6783_v55 = vld [vmem:[%s7058_s8] ss:$0 sm:$0xff] }
 0x221   : > { %v2334_v18 = vmul.f32 %v4890_v28, %v1103_v58  ;;  %v2976_v31 = vadd.f32 %v6569_v24, %v2921_v39  ;;  %v2280_v30 = vadd.f32 %v2182_v5, %v2004_v37  ;;  %v7259_v62 = vmov %v7255_v27  ;;  %v7265_v39 = vld [vmem:[#allocation42_spill] sm:$0xff]  ;;  %v6803_v43 = vld [vmem:[%s7059_s9] ss:$0 sm:$0xff] }
 0x222   : > { %v2005_v8 = vadd.f32 %v7259_v62, %v1793_v21  ;;  %v2282_v36 = vadd.f32 %v2185_v61, %v2006_v9  ;;  %v2977_v11 = vadd.f32 %v6569_v24, %v2922_v4  ;;  %v2418_v22 = vmul.f32 %v4913_v38, %v1103_v58  ;;  %v4225_v23 = vpop.f32.mrf.mxu1 }
 0x223   : > { %v6766_v46 = vmul.f32 %v4913_v38, %v1104_v26  ;;  %v2645_v10 = vmul.f32 %v4868_v12, %v1103_v58  ;;  %v3024_v42 = vmax.f32 %v2976_v31, 0.0  ;;  %v2380_v20 = vadd.f32 %v2332_v7, %v2280_v30 }
 0x224   : > { %v7260_v2 = vmov %v7257_v56  ;;  %v2382_v5 = vadd.f32 %v2334_v18, %v2282_v36  ;;  %v3025_v60 = vmax.f32 %v2977_v11, 0.0  ;;  %v2497_v54 = vrot.slane %v2418_v22, 1  ;;  %v3297_v30 = vpop.f32.mrf.mxu1  ;;  %v7267_v11 = vld [vmem:[#allocation4_spill] sm:$0xff] }
 0x225   : > { %v2281_v1 = vadd.f32 %v7260_v2, %v2005_v8  ;;  %v2498_v53 = vrot.slane %v6766_v46, 1  ;;  %v2646_v40 = vmul.f32 %v4868_v12, %v1104_v26  ;;  %v3107_v57 = vld [vmem:[#allocation3 + $0xd8] sm:$0xff]  ;;  %3074 = vst.msk [vmem:[#allocation3 + $0xd9] sm:$0x80] %vm3030_vm5, %v3024_v42  ;;  %v7261_v38 = vrot.slane %v5561_v25, 1 }
 0x226   : > { %v2771_v7 = vrot.slane %v2645_v10, 2  ;;  %v1157_v49 = vmul.f32 %v6611_v17, %v4842_v51  ;;  %4257 = vmatmul.mubr.msk.f32.gmra.mxu1 %vm910_vm2, %v3107_v57  ;;  %3075 = vst.msk [vmem:[#allocation3 + $0xe1] sm:$0xff] %vm910_vm2, %v3025_v60  ;;  %v7263_v27 = vrot.slane %v7262_v41, 2  ;;  %v7264_v17 = vmov %v7256_v13  ;;  %v6828_v10 = vld [vmem:[%s7062_s12] ss:$0 sm:$0xff]  ;;  %v4228_v57 = vpop.f32.mrf.mxu1 }
 0x227   : > { %v2592_v35 = vadd.f32 %v7261_v38, %v2380_v20  ;;  %v2381_v58 = vadd.f32 %v2333_v33, %v2281_v1  ;;  %v2499_v25 = vsel %vm1274_vm3, %v2497_v54, %v2498_v53  ;;  %v2772_v52 = vrot.slane %v2646_v40, 2 }
 0x228   : > { %v1599_v51 = vsel %vm1519_vm4, %v7263_v27, %v1598_v3  ;;  %v2187_v15 = vsel %vm1519_vm4, %v7264_v17, %v2186_v63  ;;  %v2594_v61 = vadd.f32 %v2499_v25, %v2382_v5  ;;  %v7266_v37 = vrot.slane %v7265_v39, 1  ;;  %v4275_v3 = vpop.f32.mrf.mxu0 }
 0x229   : > { %v2868_v13 = vadd.f32 %v2770_v48, %v2592_v35  ;;  %v2593_v56 = vadd.f32 %v2497_v54, %v2381_v58  ;;  %v2773_v44 = vsel %vm1519_vm4, %v2771_v7, %v2772_v52  ;;  %v2335_v63 = vmul.f32 %v4890_v28, %v1104_v26 }
 0x22a   : > { %v1418_v21 = vadd.f32 %v7266_v37, %v1157_v49  ;;  %v2647_v9 = vmul.f32 %v4868_v12, %v1105_v34  ;;  %v3444_v4 = vmul.f32 %v6702_v29, %v6783_v55  ;;  %v2870_v18 = vadd.f32 %v2773_v44, %v2594_v61  ;;  %v3604_v42 = vpop.f32.mrf.mxu0 }
 0x22b   : > { %v2923_v48 = vmul.f32 %v6553_v14, %v2868_v13  ;;  %v2869_v33 = vadd.f32 %v2771_v7, %v2593_v56  ;;  %v3443_v36 = vmul.f32 %v6783_v55, %v6725_v0  ;;  %v3751_v28 = vmul.f32 %v6704_v32, %v6808_v6 }
 0x22c   : > { %v1695_v31 = vadd.f32 %v1599_v51, %v1418_v21  ;;  %v2774_v62 = vrot.slane %v2647_v9, 2  ;;  %v3483_v8 = vadd.f32 %v6803_v43, %v3444_v4  ;;  %v2925_v26 = vmul.f32 %v6553_v14, %v2870_v18 }
 0x22d   : > { %v2978_v12 = vadd.f32 %v6569_v24, %v2923_v48  ;;  %v2924_v29 = vmul.f32 %v6553_v14, %v2869_v33  ;;  %v3482_v0 = vadd.f32 %v6803_v43, %v3443_v36  ;;  %v3108_v32 = vld [vmem:[#allocation3 + $0xe0] sm:$0xff]  ;;  %v7268_v54 = vrot.slane %v5555_v50, 1 }
 0x22e   : > { %v1795_v22 = vadd.f32 %v7267_v11, %v1695_v31  ;;  %v2775_v20 = vsel %vm1519_vm4, %v2772_v52, %v2774_v62  ;;  %v3783_v2 = vadd.f32 %v3751_v28, %v3483_v8  ;;  %v2980_v60 = vadd.f32 %v6569_v24, %v2925_v26  ;;  %4259 = vmatprep.mubr.msk.f32.mxu1 %vm910_vm2, %v3108_v32  ;;  %v4278_v52 = vpop.f32.mrf.mxu0 }
 0x22f   : > { %v3026_v1 = vmax.f32 %v2978_v12, 0.0  ;;  %v2979_v5 = vadd.f32 %v6569_v24, %v2924_v29  ;;  %v3750_v35 = vmul.f32 %v6808_v6, %v6727_v45  ;;  %v3446_v58 = vmul.f32 %v6736_v16, %v6783_v55 }
 0x230   : > { %v2007_v40 = vadd.f32 %v7268_v54, %v1795_v22  ;;  %v3822_v38 = vadd.f32 %v6828_v10, %v3783_v2  ;;  %v3753_v7 = vmul.f32 %v6752_v47, %v6808_v6  ;;  %v3028_v49 = vmax.f32 %v2980_v60, 0.0 }
 0x231   : > { %3076 = vst.msk [vmem:[#allocation3 + $0xe9] sm:$0x7f] %vm3033_vm6, %v3026_v1  ;;  %v3027_v34 = vmax.f32 %v2979_v5, 0.0  ;;  %v3445_v25 = vmul.f32 %v6783_v55, %v6761_v59  ;;  %v3782_v41 = vadd.f32 %v3750_v35, %v3482_v0  ;;  %v3485_v45 = vadd.f32 %v6803_v43, %v3446_v58 }
 0x232   : > { %v2283_v50 = vadd.f32 %v2187_v15, %v2007_v40  ;;  %3855 = vst.msk [vmem:[%s6837_s14 + $0x8] sm:$0xff] %vm3853_vm7, %v3822_v38  ;;  %v3752_v16 = vmul.f32 %v6808_v6, %v6771_v19  ;;  %v3448_v27 = vmul.f32 %v4225_v23, %v6783_v55  ;;  %v3755_v59 = vmul.f32 %v4275_v3, %v6808_v6  ;;  %v3307_v15 = vpop.f32.mrf.mxu1  ;;  %v3614_v3 = vpop.f32.mrf.mxu0 }
 0x233   : > { %3077 = vst.msk [vmem:[#allocation3 + $0xe9] sm:$0x80] %vm3030_vm5, %v3027_v34  ;;  %v3484_v51 = vadd.f32 %v6803_v43, %v3445_v25  ;;  %v3447_v17 = vmul.f32 %v6783_v55, %v3297_v30  ;;  %v3821_v13 = vadd.f32 %v6828_v10, %v3782_v41  ;;  %v3785_v56 = vadd.f32 %v3753_v7, %v3485_v45 }
 0x234   : > { %3078 = vst.msk [vmem:[#allocation3 + $0xf1] sm:$0xff] %vm910_vm2, %v3028_v49  ;;  %v2383_v47 = vadd.f32 %v2335_v63, %v2283_v50  ;;  %v3487_v19 = vadd.f32 %v6803_v43, %v3448_v27  ;;  %v3754_v23 = vmul.f32 %v6808_v6, %v3604_v42  ;;  %v3450_v21 = vmul.f32 %v4228_v57, %v6783_v55  ;;  %v4281_v12 = vpop.f32.mrf.mxu0  ;;  %v4231_v22 = vpop.f32.mrf.mxu1 }
 0x235   : > { %v3784_v39 = vadd.f32 %v3752_v16, %v3484_v51  ;;  %v3486_v37 = vadd.f32 %v6803_v43, %v3447_v17  ;;  %3854 = vst.msk [vmem:[%s6837_s14] sm:$0xff] %vm3853_vm7, %v3821_v13  ;;  %v3824_v44 = vadd.f32 %v6828_v10, %v3785_v56  ;;  %v3757_v9 = vmul.f32 %v4278_v52, %v6808_v6 }
 0x236   : > { %v2595_v61 = vadd.f32 %v2498_v53, %v2383_v47  ;;  %v3787_v63 = vadd.f32 %v3755_v59, %v3487_v19  ;;  %v3449_v4 = vmul.f32 %v6783_v55, %v3307_v15  ;;  %v3489_v33 = vadd.f32 %v6803_v43, %v3450_v21  ;;  %v3317_v32 = vpop.f32.mrf.mxu1  ;;  %v3624_v1 = vpop.f32.mrf.mxu0 }
 0x237   : > { %v3823_v46 = vadd.f32 %v6828_v10, %v3784_v39  ;;  %v3786_v53 = vadd.f32 %v3754_v23, %v3486_v37  ;;  %3857 = vst.msk [vmem:[%s6837_s14 + $0x18] sm:$0xff] %vm3853_vm7, %v3824_v44  ;;  %v3756_v62 = vmul.f32 %v6808_v6, %v3614_v3  ;;  %v3759_v0 = vmul.f32 %v4281_v12, %v6808_v6 }
 0x238   : > { %v2871_v48 = vadd.f32 %v2775_v20, %v2595_v61  ;;  %v3109_v18 = vld [vmem:[#allocation3 + $0xe8] sm:$0xff]  ;;  %v3826_v31 = vadd.f32 %v6828_v10, %v3787_v63  ;;  %v3488_v30 = vadd.f32 %v6803_v43, %v3449_v4  ;;  %v3789_v28 = vadd.f32 %v3757_v9, %v3489_v33  ;;  %v4284_v7 = vpop.f32.mrf.mxu0 }
 0x239   : > { %4260 = vmatmul.mubr.msk.f32.gmra.mxu1 %vm910_vm2, %v3109_v18  ;;  %3856 = vst.msk [vmem:[%s6837_s14 + $0x10] sm:$0xff] %vm3853_vm7, %v3823_v46  ;;  %v3825_v36 = vadd.f32 %v6828_v10, %v3786_v53  ;;  %v3452_v20 = vmul.f32 %v4231_v22, %v6783_v55  ;;  %v3451_v5 = vmul.f32 %v6783_v55, %v3317_v32 }
 0x23a   : > { %v2926_v8 = vmul.f32 %v6553_v14, %v2871_v48  ;;  %3859 = vst.msk [vmem:[%s6837_s14 + $0x28] sm:$0xff] %vm3853_vm7, %v3826_v31  ;;  %v3788_v26 = vadd.f32 %v3756_v62, %v3488_v30  ;;  %v3828_v14 = vadd.f32 %v6828_v10, %v3789_v28  ;;  %v3758_v40 = vmul.f32 %v6808_v6, %v3624_v1  ;;  %v3634_v52 = vpop.f32.mrf.mxu0 }
 0x23b   : > { %v3110_v29 = vld [vmem:[#allocation3 + $0xf0] sm:$0xff]  ;;  %3858 = vst.msk [vmem:[%s6837_s14 + $0x20] sm:$0xff] %vm3853_vm7, %v3825_v36  ;;  %v3490_v54 = vadd.f32 %v6803_v43, %v3451_v5  ;;  %v3761_v50 = vmul.f32 %v4284_v7, %v6808_v6  ;;  %v3760_v47 = vmul.f32 %v6808_v6, %v3634_v52 }
 0x23c   : > { %4262 = vmatprep.mubr.msk.f32.mxu1 %vm910_vm2, %v3110_v29  ;;  %v2981_v11 = vadd.f32 %v6569_v24, %v2926_v8  ;;  %v3827_v42 = vadd.f32 %v6828_v10, %v3788_v26  ;;  %3861 = vst.msk [vmem:[%s6837_s14 + $0x38] sm:$0xff] %vm3853_vm7, %v3828_v14  ;;  %v3491_v24 = vadd.f32 %v6803_v43, %v3452_v20  ;;  %v4287_v15 = vpop.f32.mrf.mxu0 }
 0x23d   : > { %v3790_v38 = vadd.f32 %v3758_v40, %v3490_v54  ;;  %v3763_v19 = vmul.f32 %v4287_v15, %v6808_v6 }
 0x23e   : > { %v3029_v2 = vmax.f32 %v2981_v11, 0.0  ;;  %3860 = vst.msk [vmem:[%s6837_s14 + $0x30] sm:$0xff] %vm3853_vm7, %v3827_v42  ;;  %v3791_v60 = vadd.f32 %v3759_v0, %v3491_v24  ;;  %v3644_v61 = vpop.f32.mrf.mxu0 }
 0x23f   : > { %v3829_v35 = vadd.f32 %v6828_v10, %v3790_v38  ;;  %v3762_v44 = vmul.f32 %v6808_v6, %v3644_v61 }
 0x240   : > { %3079 = vst.msk [vmem:[#allocation3 + $0xf9] sm:$0x7f] %vm3033_vm6, %v3029_v2  ;;  %v3830_v57 = vadd.f32 %v6828_v10, %v3791_v60  ;;  %v4290_v48 = vpop.f32.mrf.mxu0 }
 0x241   : > { %3862 = vst.msk [vmem:[%s6837_s14 + $0x40] sm:$0xff] %vm3853_vm7, %v3829_v35  ;;  %v3765_v33 = vmul.f32 %v4290_v48, %v6808_v6 }
 0x242   : > { %3863 = vst.msk [vmem:[%s6837_s14 + $0x48] sm:$0xff] %vm3853_vm7, %v3830_v57  ;;  %v3654_v31 = vpop.f32.mrf.mxu0 }
 0x243   : > { %v3764_v28 = vmul.f32 %v6808_v6, %v3654_v31 }
 0x244   : > { %v4234_v34 = vpop.f32.mrf.mxu1  ;;  %v4293_v11 = vpop.f32.mrf.mxu0 }
 0x245   : > { %v3454_v49 = vmul.f32 %v4234_v34, %v6783_v55  ;;  %v3767_v42 = vmul.f32 %v4293_v11, %v6808_v6 }
 0x246   : > { %v3327_v25 = vpop.f32.mrf.mxu1  ;;  %v3664_v0 = vpop.f32.mrf.mxu0 }
 0x247   : > { %v3111_v58 = vld [vmem:[#allocation3 + $0xf8] sm:$0xff]  ;;  %v3493_v41 = vadd.f32 %v6803_v43, %v3454_v49  ;;  %v3453_v45 = vmul.f32 %v6783_v55, %v3327_v25  ;;  %v3766_v5 = vmul.f32 %v6808_v6, %v3664_v0 }
 0x248   : > { %4263 = vmatmul.mubr.msk.f32.gmra.mxu1 %vm910_vm2, %v3111_v58  ;;  %v4296_v57 = vpop.f32.mrf.mxu0 }
 0x249   : > { %v3793_v16 = vadd.f32 %v3761_v50, %v3493_v41  ;;  %v3492_v27 = vadd.f32 %v6803_v43, %v3453_v45  ;;  %v3769_v58 = vmul.f32 %v4296_v57, %v6808_v6 }
 0x24a   : > { %v3674_v34 = vpop.f32.mrf.mxu0 }
 0x24b   : > { %v3832_v51 = vadd.f32 %v6828_v10, %v3793_v16  ;;  %v3792_v59 = vadd.f32 %v3760_v47, %v3492_v27  ;;  %v3768_v41 = vmul.f32 %v6808_v6, %v3674_v34 }
 0x24c   : > { %v4299_v47 = vpop.f32.mrf.mxu0 }
 0x24d   : > { %3865 = vst.msk [vmem:[%s6837_s14 + $0x58] sm:$0xff] %vm3853_vm7, %v3832_v51  ;;  %v3831_v17 = vadd.f32 %v6828_v10, %v3792_v59 }
 0x24f   : > { %3864 = vst.msk [vmem:[%s6837_s14 + $0x50] sm:$0xff] %vm3853_vm7, %v3831_v17  ;;  %v3771_v17 = vmul.f32 %v4299_v47, %v6808_v6 }
 0x258   : > { %v4237_v13 = vpop.f32.mrf.mxu1 }
 0x259   : > { %v3456_v56 = vmul.f32 %v4237_v13, %v6783_v55  ;;  %v3684_v13 = vpop.f32.mrf.mxu0 }
 0x25a   : > { %v3337_v23 = vpop.f32.mrf.mxu1 }
 0x25b   : > { %v3495_v39 = vadd.f32 %v6803_v43, %v3456_v56  ;;  %v3455_v37 = vmul.f32 %v6783_v55, %v3337_v23 }
 0x25d   : > { %v3795_v21 = vadd.f32 %v3763_v19, %v3495_v39  ;;  %v3494_v3 = vadd.f32 %v6803_v43, %v3455_v37  ;;  %v3770_v39 = vmul.f32 %v6808_v6, %v3684_v13 }
 0x25f   : > { %v3834_v63 = vadd.f32 %v6828_v10, %v3795_v21  ;;  %v3794_v9 = vadd.f32 %v3762_v44, %v3494_v3  ;;  %v4302_v44 = vpop.f32.mrf.mxu0 }
 0x261   : > { %3867 = vst.msk [vmem:[%s6837_s14 + $0x68] sm:$0xff] %vm3853_vm7, %v3834_v63  ;;  %v3833_v4 = vadd.f32 %v6828_v10, %v3794_v9 }
 0x263   : > { %3866 = vst.msk [vmem:[%s6837_s14 + $0x60] sm:$0xff] %vm3853_vm7, %v3833_v4  ;;  %v3773_v4 = vmul.f32 %v4302_v44, %v6808_v6 }
 0x26d   : > { %v4240_v46 = vpop.f32.mrf.mxu1 }
 0x26e   : > { %v3458_v53 = vmul.f32 %v4240_v46, %v6783_v55  ;;  %v3694_v46 = vpop.f32.mrf.mxu0 }
 0x26f   : > { %v3347_v18 = vpop.f32.mrf.mxu1 }
 0x270   : > { %v3497_v30 = vadd.f32 %v6803_v43, %v3458_v53  ;;  %v3457_v62 = vmul.f32 %v6783_v55, %v3347_v18 }
 0x272   : > { %v3797_v8 = vadd.f32 %v3765_v33, %v3497_v30  ;;  %v3496_v36 = vadd.f32 %v6803_v43, %v3457_v62  ;;  %v3772_v30 = vmul.f32 %v6808_v6, %v3694_v46 }
 0x274   : > { %v3836_v12 = vadd.f32 %v6828_v10, %v3797_v8  ;;  %v3796_v29 = vadd.f32 %v3764_v28, %v3496_v36  ;;  %v4305_v28 = vpop.f32.mrf.mxu0 }
 0x276   : > { %3869 = vst.msk [vmem:[%s6837_s14 + $0x78] sm:$0xff] %vm3853_vm7, %v3836_v12  ;;  %v3835_v26 = vadd.f32 %v6828_v10, %v3796_v29 }
 0x278   : > { %3868 = vst.msk [vmem:[%s6837_s14 + $0x70] sm:$0xff] %vm3853_vm7, %v3835_v26  ;;  %v3775_v26 = vmul.f32 %v4305_v28, %v6808_v6 }
 0x281   : > { %v4243_v14 = vpop.f32.mrf.mxu1 }
 0x282   : > { %v3460_v22 = vmul.f32 %v4243_v14, %v6783_v55  ;;  %v3704_v14 = vpop.f32.mrf.mxu0 }
 0x283   : > { %v3357_v20 = vpop.f32.mrf.mxu1 }
 0x284   : > { %v3499_v2 = vadd.f32 %v6803_v43, %v3460_v22  ;;  %v3459_v32 = vmul.f32 %v6783_v55, %v3357_v20 }
 0x286   : > { %v3799_v1 = vadd.f32 %v3767_v42, %v3499_v2  ;;  %v3498_v24 = vadd.f32 %v6803_v43, %v3459_v32  ;;  %v3774_v2 = vmul.f32 %v6808_v6, %v3704_v14 }
 0x288   : > { %v3838_v60 = vadd.f32 %v6828_v10, %v3799_v1  ;;  %v3798_v54 = vadd.f32 %v3766_v5, %v3498_v24  ;;  %v4308_v5 = vpop.f32.mrf.mxu0 }
 0x28a   : > { %3871 = vst.msk [vmem:[%s6837_s14 + $0x88] sm:$0xff] %vm3853_vm7, %v3838_v60  ;;  %v3837_v40 = vadd.f32 %v6828_v10, %v3798_v54 }
 0x28c   : > { %3870 = vst.msk [vmem:[%s6837_s14 + $0x80] sm:$0xff] %vm3853_vm7, %v3837_v40  ;;  %v3777_v40 = vmul.f32 %v4308_v5, %v6808_v6 }
 0x294   : > { %v4246_v38 = vpop.f32.mrf.mxu1 }
 0x295   : > { %v3462_v35 = vmul.f32 %v4246_v38, %v6783_v55  ;;  %v3714_v38 = vpop.f32.mrf.mxu0 }
 0x296   : > { %v3367_v7 = vpop.f32.mrf.mxu1 }
 0x297   : > { %v3501_v49 = vadd.f32 %v6803_v43, %v3462_v35  ;;  %v3461_v50 = vmul.f32 %v6783_v55, %v3367_v7 }
 0x299   : > { %v3801_v25 = vadd.f32 %v3769_v58, %v3501_v49  ;;  %v3500_v52 = vadd.f32 %v6803_v43, %v3461_v50  ;;  %v3776_v49 = vmul.f32 %v6808_v6, %v3714_v38 }
 0x29b   : > { %v3840_v45 = vadd.f32 %v6828_v10, %v3801_v25  ;;  %v3800_v16 = vadd.f32 %v3768_v41, %v3500_v52  ;;  %v4311_v41 = vpop.f32.mrf.mxu0 }
 0x29d   : > { %3873 = vst.msk [vmem:[%s6837_s14 + $0x98] sm:$0xff] %vm3853_vm7, %v3840_v45  ;;  %v3839_v27 = vadd.f32 %v6828_v10, %v3800_v16 }
 0x29f   : > { %3872 = vst.msk [vmem:[%s6837_s14 + $0x90] sm:$0xff] %vm3853_vm7, %v3839_v27  ;;  %v3779_v27 = vmul.f32 %v4311_v41, %v6808_v6 }
 0x2a9   : > { %v4249_v51 = vpop.f32.mrf.mxu1 }
 0x2aa   : > { %v3464_v59 = vmul.f32 %v4249_v51, %v6783_v55  ;;  %v3724_v51 = vpop.f32.mrf.mxu0 }
 0x2ab   : > { %v3377_v15 = vpop.f32.mrf.mxu1 }
 0x2ac   : > { %v3503_v56 = vadd.f32 %v6803_v43, %v3464_v59  ;;  %v3463_v19 = vmul.f32 %v6783_v55, %v3377_v15 }
 0x2ae   : > { %v3803_v23 = vadd.f32 %v3771_v17, %v3503_v56  ;;  %v3502_v61 = vadd.f32 %v6803_v43, %v3463_v19  ;;  %v3778_v56 = vmul.f32 %v6808_v6, %v3724_v51 }
 0x2b0   : > { %v3842_v37 = vadd.f32 %v6828_v10, %v3803_v23  ;;  %v3802_v21 = vadd.f32 %v3770_v39, %v3502_v61  ;;  %v4314_v39 = vpop.f32.mrf.mxu0 }
 0x2b2   : > { %3875 = vst.msk [vmem:[%s6837_s14 + $0xa8] sm:$0xff] %vm3853_vm7, %v3842_v37  ;;  %v3841_v3 = vadd.f32 %v6828_v10, %v3802_v21 }
 0x2b4   : > { %3874 = vst.msk [vmem:[%s6837_s14 + $0xa0] sm:$0xff] %vm3853_vm7, %v3841_v3  ;;  %v3781_v3 = vmul.f32 %v4314_v39, %v6808_v6 }
 0x2be   : > { %v4252_v63 = vpop.f32.mrf.mxu1 }
 0x2bf   : > { %v3466_v9 = vmul.f32 %v4252_v63, %v6783_v55  ;;  %v3734_v63 = vpop.f32.mrf.mxu0 }
 0x2c0   : > { %v3387_v48 = vpop.f32.mrf.mxu1 }
 0x2c1   : > { %v3505_v53 = vadd.f32 %v6803_v43, %v3466_v9  ;;  %v3465_v33 = vmul.f32 %v6783_v55, %v3387_v48 }
 0x2c3   : > { %v3805_v18 = vadd.f32 %v3773_v4, %v3505_v53  ;;  %v3504_v31 = vadd.f32 %v6803_v43, %v3465_v33  ;;  %v3780_v53 = vmul.f32 %v6808_v6, %v3734_v63 }
 0x2c5   : > { %v3844_v62 = vadd.f32 %v6828_v10, %v3805_v18  ;;  %v3804_v8 = vadd.f32 %v3772_v30, %v3504_v31 }
 0x2c7   : > { %3877 = vst.msk [vmem:[%s6837_s14 + $0xb8] sm:$0xff] %vm3853_vm7, %v3844_v62  ;;  %v3843_v36 = vadd.f32 %v6828_v10, %v3804_v8 }
 0x2c9   : > { %3876 = vst.msk [vmem:[%s6837_s14 + $0xb0] sm:$0xff] %vm3853_vm7, %v3843_v36 }
 0x2d1   : > { %v4255_v12 = vpop.f32.mrf.mxu1 }
 0x2d2   : > { %v3468_v29 = vmul.f32 %v4255_v12, %v6783_v55 }
 0x2d3   : > { %v3397_v11 = vpop.f32.mrf.mxu1 }
 0x2d4   : > { %v3507_v22 = vadd.f32 %v6803_v43, %v3468_v29  ;;  %v3467_v42 = vmul.f32 %v6783_v55, %v3397_v11 }
 0x2d6   : > { %v3807_v20 = vadd.f32 %v3775_v26, %v3507_v22  ;;  %v3506_v0 = vadd.f32 %v6803_v43, %v3467_v42 }
 0x2d8   : > { %v3846_v32 = vadd.f32 %v6828_v10, %v3807_v20  ;;  %v3806_v1 = vadd.f32 %v3774_v2, %v3506_v0 }
 0x2da   : > { %3879 = vst.msk [vmem:[%s6837_s14 + $0xc8] sm:$0xff] %vm3853_vm7, %v3846_v32  ;;  %v3845_v24 = vadd.f32 %v6828_v10, %v3806_v1 }
 0x2dc   : > { %3878 = vst.msk [vmem:[%s6837_s14 + $0xc0] sm:$0xff] %vm3853_vm7, %v3845_v24 }
 0x2e6   : > { %v4258_v60 = vpop.f32.mrf.mxu1 }
 0x2e7   : > { %v3470_v54 = vmul.f32 %v4258_v60, %v6783_v55 }
 0x2e8   : > { %v3407_v57 = vpop.f32.mrf.mxu1 }
 0x2e9   : > { %v3509_v35 = vadd.f32 %v6803_v43, %v3470_v54  ;;  %v3469_v58 = vmul.f32 %v6783_v55, %v3407_v57 }
 0x2eb   : > { %v3809_v7 = vadd.f32 %v3777_v40, %v3509_v35  ;;  %v3508_v34 = vadd.f32 %v6803_v43, %v3469_v58 }
 0x2ed   : > { %v3848_v50 = vadd.f32 %v6828_v10, %v3809_v7  ;;  %v3808_v25 = vadd.f32 %v3776_v49, %v3508_v34 }
 0x2ef   : > { %3881 = vst.msk [vmem:[%s6837_s14 + $0xd8] sm:$0xff] %vm3853_vm7, %v3848_v50  ;;  %v3847_v52 = vadd.f32 %v6828_v10, %v3808_v25 }
 0x2f1   : > { %3880 = vst.msk [vmem:[%s6837_s14 + $0xd0] sm:$0xff] %vm3853_vm7, %v3847_v52 }
 0x2f9   : > { %v4261_v45 = vpop.f32.mrf.mxu1 }
 0x2fa   : > { %v3472_v16 = vmul.f32 %v4261_v45, %v6783_v55 }
 0x2fb   : > { %v3417_v47 = vpop.f32.mrf.mxu1 }
 0x2fc   : > { %v3511_v59 = vadd.f32 %v6803_v43, %v3472_v16  ;;  %v3471_v17 = vmul.f32 %v6783_v55, %v3417_v47 }
 0x2fe   : > { %v3811_v15 = vadd.f32 %v3779_v27, %v3511_v59  ;;  %v3510_v13 = vadd.f32 %v6803_v43, %v3471_v17 }
 0x300   : > { %v3850_v19 = vadd.f32 %v6828_v10, %v3811_v15  ;;  %v3810_v23 = vadd.f32 %v3778_v56, %v3510_v13 }
 0x302   : > { %3883 = vst.msk [vmem:[%s6837_s14 + $0xe8] sm:$0xff] %vm3853_vm7, %v3850_v19  ;;  %v3849_v61 = vadd.f32 %v6828_v10, %v3810_v23 }
 0x304   : > { %3882 = vst.msk [vmem:[%s6837_s14 + $0xe0] sm:$0xff] %vm3853_vm7, %v3849_v61 }
 0x308   : > { %v4264_v37 = vpop.f32.mrf.mxu1 }
 0x309   : > { %v3474_v21 = vmul.f32 %v4264_v37, %v6783_v55 }
 0x30a   : > { %v3427_v44 = vpop.f32.mrf.mxu1 }
 0x30b   : > { %v3513_v9 = vadd.f32 %v6803_v43, %v3474_v21  ;;  %v3473_v4 = vmul.f32 %v6783_v55, %v3427_v44 }
 0x30d   : > { %v3813_v48 = vadd.f32 %v3781_v3, %v3513_v9  ;;  %v3512_v46 = vadd.f32 %v6803_v43, %v3473_v4 }
 0x30f   : > { %v3852_v33 = vadd.f32 %v6828_v10, %v3813_v48  ;;  %v3812_v18 = vadd.f32 %v3780_v53, %v3512_v46 }
 0x311   : > { %3885 = vst.msk [vmem:[%s6837_s14 + $0xf8] sm:$0xff] %vm3853_vm7, %v3852_v33  ;;  %v3851_v31 = vadd.f32 %v6828_v10, %v3812_v18 }
 0x313   : > { %3884 = vst.msk [vmem:[%s6837_s14 + $0xf0] sm:$0xff] %vm3853_vm7, %v3851_v31 }
 0x314 PF: > { %s23_s25 = sadd.s32 1, %s4350_s25  }
 0x315   : > { %p20_p4 = scmp.ge.s32.totalorder %s23_s25, 4  }
 0x317   :  { %22 = sbr.rel (!%p20_p4) target bundleno = 1 (0x1), region = 118 }

</bundles_post_ra>
